<compile_context>
chip_gen: v6e
topology: v6e:2x2x1
jax: 0.10.0
libtpu: 0.0.40
codegen_flags: <defaults>
</compile_context>

<pallas_src>
import functools

import jax
import jax.numpy as jnp
from jax.experimental import pallas as pl
from jax.experimental.pallas import tpu as pltpu


# ----------------------------------------------------------------------------
# In-kernel helpers (everything stays in VMEM)
# ----------------------------------------------------------------------------
def _reflect_pad_into(xp_ref, x, *, H, W, pad):
    """Write ReflectionPad2d(pad) of x (H, W, C) into xp_ref[:H+2p, :W+2p, :].

    Matches torch.nn.ReflectionPad2d: padded index i < pad maps to source
    index pad - i; padded index pad + W + i maps to source index W - 2 - i.
    One interior store + 2p column stores + 2p row stores; no concatenate
    intermediates (review item: scratch-ref padding).
    """
    p = pad
    Wp = W + 2 * p
    # Interior.
    xp_ref[p:p + H, p:p + W, :] = x
    # Reflected columns (interior rows only; corners come from the row copies).
    for i in range(p):
        xp_ref[p:p + H, i:i + 1, :] = x[:, p - i:p - i + 1, :]
        xp_ref[p:p + H, p + W + i:p + W + i + 1, :] = x[:, W - 2 - i:W - 1 - i, :]
    # Reflected rows, copied from the already column-padded interior rows so
    # the corner values come along for free (reflection is separable).
    for i in range(p):
        xp_ref[i:i + 1, 0:Wp, :] = xp_ref[2 * p - i:2 * p - i + 1, 0:Wp, :]
        xp_ref[p + H + i:p + H + i + 1, 0:Wp, :] = \
            xp_ref[p + H - 2 - i:p + H - 1 - i, 0:Wp, :]


def _conv3x3_instnorm(xp_ref, w_ref, *, H, W, C, dilation, compute_dtype):
    """3x3 dilated conv (accumulate form) + biased InstanceNorm (no affine).

    xp_ref: f32 VMEM scratch holding the reflection-padded plane in its
            top-left (H + 2d, W + 2d, C) region.
    w_ref:  (9, Cin, Cout) spectrally-normalized weights in compute_dtype;
            tap index t = ky*3 + kx.

    Review item: no im2col patch buffer -- 9 shifted (H*W, C) x (C, C)
    matmuls accumulate into a single f32 (H*W, C) value (cheap with v7x's
    in-place MRB, and removes ~9 planes of VMEM plus a store-bound copy phase
    on v5e/v6e).  Taps are cast to compute_dtype right at the matmul.
    """
    d = dilation
    acc = None
    for ky in range(3):
        for kx in range(3):
            tap = xp_ref[ky * d:ky * d + H, kx * d:kx * d + W, :]
            part = jnp.dot(tap.reshape(H * W, C).astype(compute_dtype),
                           w_ref[ky * 3 + kx],
                           preferred_element_type=jnp.float32)
            acc = part if acc is None else acc + part
    # Two-pass instance-norm statistics (review correctness item): mean first,
    # then centered sum of squares.  Biased variance, eps=1e-5, no affine --
    # matching nn.InstanceNorm2d(dim, track_running_stats=False) defaults.
    inv_n = 1.0 / (H * W)
    mean = jnp.sum(acc, axis=0, keepdims=True) * inv_n
    centered = acc - mean
    var = jnp.sum(centered * centered, axis=0, keepdims=True) * inv_n
    return centered * jax.lax.rsqrt(var + 1e-5)


def _residual_block_kernel(x_ref, w1_ref, w2_ref, out_ref, xp_ref, *,
                           H, W, C, compute_dtype):
    """Fused pad(2)+conv(d=2)+IN+ReLU+pad(1)+conv(d=1)+IN+residual-add.

    One batch element per grid step; the stage-1 activation never leaves VMEM.
    xp_ref ((H+4, W+4, C) f32) is reused by both stages.
    """
    x = x_ref[0]                                                  # (H, W, C) f32

    # Stage 1: ReflectionPad2d(2) -> conv3x3(dilation=2) -> IN -> ReLU.
    _reflect_pad_into(xp_ref, x, H=H, W=W, pad=2)
    h = _conv3x3_instnorm(xp_ref, w1_ref, H=H, W=W, C=C, dilation=2,
                          compute_dtype=compute_dtype)
    h = jnp.maximum(h, 0.0)                                       # (H*W, C) f32

    # Stage 2: ReflectionPad2d(1) -> conv3x3(dilation=1) -> IN.
    _reflect_pad_into(xp_ref, h.reshape(H, W, C), H=H, W=W, pad=1)
    g = _conv3x3_instnorm(xp_ref, w2_ref, H=H, W=W, C=C, dilation=1,
                          compute_dtype=compute_dtype)

    # Residual add in f32.
    out_ref[0] = (x + g.reshape(H, W, C)).astype(out_ref.dtype)


# ----------------------------------------------------------------------------
# Plain-JAX glue: spectral norm, weight packing, cost / VMEM accounting
# ----------------------------------------------------------------------------
def spectral_normalize(w, key, n_power_iterations=1, eps=1e-12):
    """PyTorch-style spectral norm: weight / sigma, sigma via power iteration
    on the (Cout, Cin*kh*kw) matrix, u initialized from a normal draw."""
    cout = w.shape[0]
    mat = w.reshape(cout, -1)
    u = jax.random.normal(key, (cout,), dtype=w.dtype)
    u = u / (jnp.linalg.norm(u) + eps)
    v = None
    for _ in range(n_power_iterations):
        v = mat.T @ u
        v = v / (jnp.linalg.norm(v) + eps)
        u = mat @ v
        u = u / (jnp.linalg.norm(u) + eps)
    sigma = u @ (mat @ v)
    return w / sigma


def _weight_to_taps(w_oihw):
    """(Cout, Cin, 3, 3) -> (9, Cin, Cout); tap index t = ky*3 + kx."""
    cout, cin = w_oihw.shape[0], w_oihw.shape[1]
    return jnp.transpose(w_oihw, (2, 3, 1, 0)).reshape(9, cin, cout)


def _vmem_limit_bytes(H, W, C, compute_dtype):
    """Per-grid-step VMEM need.  Threshold at half the smallest (16 MiB, v5e)
    default scoped budget; override capped at 75% of physical VMEM (never the
    full 64 MiB of v7x)."""
    f32 = 4
    cdt = jnp.dtype(compute_dtype).itemsize
    plane = H * W * C
    est = (
        2 * plane * f32                       # double-buffered x blocks
        + 2 * plane * f32                     # double-buffered out blocks
        + 2 * 2 * 9 * C * C * cdt             # double-buffered weight blocks
        + (H + 4) * (W + 4) * C * f32         # shared reflection-pad scratch
        + 4 * plane * f32                     # conv accumulator / IN temporaries
    ) + (2 << 20)                             # compiler-internal scratch headroom
    if est <= (8 << 20):
        return None                           # inside every generation's default
    try:
        cap = int(pltpu.get_tpu_info().vmem_capacity_bytes) * 3 // 4
    except Exception:
        cap = 48 << 20
    # TODO(synk): if est > cap the plane must be row-tiled (header TODO) rather
    # than given a bigger budget.
    return int(min(est, cap))


def residual_block_forward(x_nhwc, w1_oihw, w2_oihw, sn_key, *,
                           compute_dtype=jnp.bfloat16):
    """Forward matching ResidualBlock(dim).forward.

    Layout contract is NHWC (review item: no NCHW<->NHWC HBM transposes around
    the kernel -- keep the TPU pipeline channels-last).  Weights are in the
    torch OIHW layout.  compute_dtype is the MXU operand dtype (bf16 default
    on every TPU generation -- the v5e MXU is bf16-native too); accumulation,
    statistics and the residual add stay float32.
    """
    N, H, W, C = x_nhwc.shape
    assert H >= 3 and W >= 3, "reflection pad of 2 needs H, W >= 3"

    k1, k2 = jax.random.split(sn_key)
    w1 = _weight_to_taps(spectral_normalize(w1_oihw, k1)).astype(compute_dtype)
    w2 = _weight_to_taps(spectral_normalize(w2_oihw, k2)).astype(compute_dtype)
    x = x_nhwc.astype(jnp.float32)

    kernel = functools.partial(_residual_block_kernel, H=H, W=W, C=C,
                               compute_dtype=compute_dtype)

    itemsize = jnp.dtype(compute_dtype).itemsize
    cost = pl.CostEstimate(
        flops=2 * (2 * N * H * W * 9 * C * C),        # two convs, 2*M*K*N each
        transcendentals=2 * N * C,                    # rsqrt per channel per IN
        bytes_accessed=2 * N * H * W * C * 4 + 2 * 9 * C * C * itemsize,
    )

    return pl.pallas_call(
        kernel,
        out_shape=jax.ShapeDtypeStruct((N, H, W, C), jnp.float32),
        grid=(N,),
        in_specs=[
            pl.BlockSpec((1, H, W, C), lambda n: (n, 0, 0, 0)),
            pl.BlockSpec((9, C, C), lambda n: (0, 0, 0)),
            pl.BlockSpec((9, C, C), lambda n: (0, 0, 0)),
        ],
        out_specs=pl.BlockSpec((1, H, W, C), lambda n: (n, 0, 0, 0)),
        scratch_shapes=[pltpu.VMEM((H + 4, W + 4, C), jnp.float32)],
        compiler_params=pltpu.CompilerParams(
            dimension_semantics=("parallel",),         # batch across TCs
            vmem_limit_bytes=_vmem_limit_bytes(H, W, C, compute_dtype),
        ),
        cost_estimate=cost,
    )(x, w1, w2)


# ----------------------------------------------------------------------------
# Pure-JAX reference (NCHW, for a correctness sanity check)
# ----------------------------------------------------------------------------
def _instance_norm_nchw(h, eps=1e-5):
    mean = jnp.mean(h, axis=(2, 3), keepdims=True)
    var = jnp.mean((h - mean) ** 2, axis=(2, 3), keepdims=True)
    return (h - mean) * jax.lax.rsqrt(var + eps)


def reference_forward_nchw(x_nchw, w1_oihw, w2_oihw, sn_key):
    k1, k2 = jax.random.split(sn_key)
    w1 = spectral_normalize(w1_oihw, k1)
    w2 = spectral_normalize(w2_oihw, k2)
    dn = ("NCHW", "OIHW", "NCHW")
    xp = jnp.pad(x_nchw, ((0, 0), (0, 0), (2, 2), (2, 2)), mode="reflect")
    h = jax.lax.conv_general_dilated(xp, w1, (1, 1), "VALID",
                                     rhs_dilation=(2, 2), dimension_numbers=dn)
    h = jnp.maximum(_instance_norm_nchw(h), 0.0)
    hp = jnp.pad(h, ((0, 0), (0, 0), (1, 1), (1, 1)), mode="reflect")
    h2 = jax.lax.conv_general_dilated(hp, w2, (1, 1), "VALID",
                                      dimension_numbers=dn)
    return x_nchw + _instance_norm_nchw(h2)


# ----------------------------------------------------------------------------
if __name__ == "__main__":
    key = jax.random.PRNGKey(0)
    kx, kw1, kw2, ksn = jax.random.split(key, 4)

    N, DIM, H, W = 2, 4, 16, 16
    # torch-style NCHW demo data; converted ONCE to the op's NHWC contract in
    # the test harness (the op itself does no layout transposes).
    x_nchw = jax.random.normal(kx, (N, DIM, H, W), dtype=jnp.float32)
    x_nhwc = jnp.transpose(x_nchw, (0, 2, 3, 1))

    fan_in = DIM * 3 * 3
    bound = 1.0 / (fan_in ** 0.5)
    w1 = jax.random.uniform(kw1, (DIM, DIM, 3, 3), jnp.float32, -bound, bound)
    w2 = jax.random.uniform(kw2, (DIM, DIM, 3, 3), jnp.float32, -bound, bound)

    ref = jnp.transpose(reference_forward_nchw(x_nchw, w1, w2, ksn), (0, 2, 3, 1))
    ref = jax.block_until_ready(ref)

    # f32 MXU-operand path: the gating correctness check (tight tolerance).
    out_f32 = jax.block_until_ready(
        residual_block_forward(x_nhwc, w1, w2, ksn, compute_dtype=jnp.float32))
    assert out_f32.shape == (N, H, W, DIM)
    assert jnp.allclose(out_f32, ref, atol=1e-3, rtol=1e-3), \
        "f32 mismatch vs reference"

    # Default bf16 MXU-operand path (recommended on all generations incl. v5e).
    out_bf16 = jax.block_until_ready(
        residual_block_forward(x_nhwc, w1, w2, ksn))
    assert out_bf16.shape == (N, H, W, DIM)
    assert jnp.allclose(out_bf16, ref, atol=7.5e-2, rtol=5e-2), \
        "bf16 mismatch vs reference"

    print("KERNEL_OK")
</pallas_src>

<mosaic_0001>
module attributes {stable_mosaic.version = 11 : i64} {
  func.func @_residual_block_kernel(%arg0: i32, %arg1: memref<1x16x16x4xf32, #tpu.memory_space<vmem>>, %arg2: memref<9x4x4xf32, #tpu.memory_space<vmem>>, %arg3: memref<9x4x4xf32, #tpu.memory_space<vmem>>, %arg4: memref<1x16x16x4xf32, #tpu.memory_space<vmem>>, %arg5: memref<20x20x4xf32, #tpu.memory_space<vmem>>) attributes {dimension_semantics = [#tpu.dimension_semantics<parallel>], iteration_bounds = array<i64: 2>, scalar_prefetch = 0 : i64, scratch_operands = 1 : i64, tpu.core_type = #tpu.core_type<tc>, window_params = [{transform_indices = @transform_0, window_bounds = array<i64: 1, 16, 16, 4>}, {pipeline_mode = #tpu.pipeline_mode<synchronous>, transform_indices = @transform_1, window_bounds = array<i64: 9, 4, 4>}, {pipeline_mode = #tpu.pipeline_mode<synchronous>, transform_indices = @transform_2, window_bounds = array<i64: 9, 4, 4>}, {transform_indices = @transform_3, window_bounds = array<i64: 1, 16, 16, 4>}]} {
    %c0 = arith.constant 0 : index
    %c0_0 = arith.constant 0 : index
    %c0_1 = arith.constant 0 : index
    %c0_2 = arith.constant 0 : index
    %0 = vector.load %arg1[%c0, %c0_0, %c0_1, %c0_2] : memref<1x16x16x4xf32, #tpu.memory_space<vmem>>, vector<1x16x16x4xf32>
    %1 = vector.shape_cast %0 : vector<1x16x16x4xf32> to vector<16x16x4xf32>
    %c2 = arith.constant 2 : index
    %c2_3 = arith.constant 2 : index
    %c0_4 = arith.constant 0 : index
    %2 = vector.load %arg5[%c2, %c2_3, %c0_4] : memref<20x20x4xf32, #tpu.memory_space<vmem>>, vector<16x16x4xf32>
    tpu.vector_store %arg5[%c2, %c2_3, %c0_4], %1 {strides = array<i32>} : memref<20x20x4xf32, #tpu.memory_space<vmem>>, vector<16x16x4xf32>,
    %3 = vector.extract_strided_slice %1 {offsets = [0, 2, 0], sizes = [16, 1, 4], strides = [1, 1, 1]} : vector<16x16x4xf32> to vector<16x1x4xf32>
    %c2_5 = arith.constant 2 : index
    %c0_6 = arith.constant 0 : index
    %c0_7 = arith.constant 0 : index
    %4 = vector.load %arg5[%c2_5, %c0_6, %c0_7] : memref<20x20x4xf32, #tpu.memory_space<vmem>>, vector<16x1x4xf32>
    tpu.vector_store %arg5[%c2_5, %c0_6, %c0_7], %3 {strides = array<i32>} : memref<20x20x4xf32, #tpu.memory_space<vmem>>, vector<16x1x4xf32>,
    %5 = vector.extract_strided_slice %1 {offsets = [0, 14, 0], sizes = [16, 1, 4], strides = [1, 1, 1]} : vector<16x16x4xf32> to vector<16x1x4xf32>
    %c2_8 = arith.constant 2 : index
    %c18 = arith.constant 18 : index
    %c0_9 = arith.constant 0 : index
    %6 = vector.load %arg5[%c2_8, %c18, %c0_9] : memref<20x20x4xf32, #tpu.memory_space<vmem>>, vector<16x1x4xf32>
    tpu.vector_store %arg5[%c2_8, %c18, %c0_9], %5 {strides = array<i32>} : memref<20x20x4xf32, #tpu.memory_space<vmem>>, vector<16x1x4xf32>,
    %7 = vector.extract_strided_slice %1 {offsets = [0, 1, 0], sizes = [16, 1, 4], strides = [1, 1, 1]} : vector<16x16x4xf32> to vector<16x1x4xf32>
    %c2_10 = arith.constant 2 : index
    %c1 = arith.constant 1 : index
    %c0_11 = arith.constant 0 : index
    %8 = vector.load %arg5[%c2_10, %c1, %c0_11] : memref<20x20x4xf32, #tpu.memory_space<vmem>>, vector<16x1x4xf32>
    tpu.vector_store %arg5[%c2_10, %c1, %c0_11], %7 {strides = array<i32>} : memref<20x20x4xf32, #tpu.memory_space<vmem>>, vector<16x1x4xf32>,
    %9 = vector.extract_strided_slice %1 {offsets = [0, 13, 0], sizes = [16, 1, 4], strides = [1, 1, 1]} : vector<16x16x4xf32> to vector<16x1x4xf32>
    %c2_12 = arith.constant 2 : index
    %c19 = arith.constant 19 : index
    %c0_13 = arith.constant 0 : index
    %10 = vector.load %arg5[%c2_12, %c19, %c0_13] : memref<20x20x4xf32, #tpu.memory_space<vmem>>, vector<16x1x4xf32>
    tpu.vector_store %arg5[%c2_12, %c19, %c0_13], %9 {strides = array<i32>} : memref<20x20x4xf32, #tpu.memory_space<vmem>>, vector<16x1x4xf32>,
    %c4 = arith.constant 4 : index
    %c0_14 = arith.constant 0 : index
    %c0_15 = arith.constant 0 : index
    %11 = vector.load %arg5[%c4, %c0_14, %c0_15] : memref<20x20x4xf32, #tpu.memory_space<vmem>>, vector<1x20x4xf32>
    %c0_16 = arith.constant 0 : index
    %c0_17 = arith.constant 0 : index
    %c0_18 = arith.constant 0 : index
    %12 = vector.load %arg5[%c0_16, %c0_17, %c0_18] : memref<20x20x4xf32, #tpu.memory_space<vmem>>, vector<1x20x4xf32>
    tpu.vector_store %arg5[%c0_16, %c0_17, %c0_18], %11 {strides = array<i32>} : memref<20x20x4xf32, #tpu.memory_space<vmem>>, vector<1x20x4xf32>,
    %c16 = arith.constant 16 : index
    %c0_19 = arith.constant 0 : index
    %c0_20 = arith.constant 0 : index
    %13 = vector.load %arg5[%c16, %c0_19, %c0_20] : memref<20x20x4xf32, #tpu.memory_space<vmem>>, vector<1x20x4xf32>
    %c18_21 = arith.constant 18 : index
    %c0_22 = arith.constant 0 : index
    %c0_23 = arith.constant 0 : index
    %14 = vector.load %arg5[%c18_21, %c0_22, %c0_23] : memref<20x20x4xf32, #tpu.memory_space<vmem>>, vector<1x20x4xf32>
    tpu.vector_store %arg5[%c18_21, %c0_22, %c0_23], %13 {strides = array<i32>} : memref<20x20x4xf32, #tpu.memory_space<vmem>>, vector<1x20x4xf32>,
    %c3 = arith.constant 3 : index
    %c0_24 = arith.constant 0 : index
    %c0_25 = arith.constant 0 : index
    %15 = vector.load %arg5[%c3, %c0_24, %c0_25] : memref<20x20x4xf32, #tpu.memory_space<vmem>>, vector<1x20x4xf32>
    %c1_26 = arith.constant 1 : index
    %c0_27 = arith.constant 0 : index
    %c0_28 = arith.constant 0 : index
    %16 = vector.load %arg5[%c1_26, %c0_27, %c0_28] : memref<20x20x4xf32, #tpu.memory_space<vmem>>, vector<1x20x4xf32>
    tpu.vector_store %arg5[%c1_26, %c0_27, %c0_28], %15 {strides = array<i32>} : memref<20x20x4xf32, #tpu.memory_space<vmem>>, vector<1x20x4xf32>,
    %c15 = arith.constant 15 : index
    %c0_29 = arith.constant 0 : index
    %c0_30 = arith.constant 0 : index
    %17 = vector.load %arg5[%c15, %c0_29, %c0_30] : memref<20x20x4xf32, #tpu.memory_space<vmem>>, vector<1x20x4xf32>
    %c19_31 = arith.constant 19 : index
    %c0_32 = arith.constant 0 : index
    %c0_33 = arith.constant 0 : index
    %18 = vector.load %arg5[%c19_31, %c0_32, %c0_33] : memref<20x20x4xf32, #tpu.memory_space<vmem>>, vector<1x20x4xf32>
    tpu.vector_store %arg5[%c19_31, %c0_32, %c0_33], %17 {strides = array<i32>} : memref<20x20x4xf32, #tpu.memory_space<vmem>>, vector<1x20x4xf32>,
    %c0_34 = arith.constant 0 : index
    %c0_35 = arith.constant 0 : index
    %c0_36 = arith.constant 0 : index
    %19 = vector.load %arg5[%c0_34, %c0_35, %c0_36] : memref<20x20x4xf32, #tpu.memory_space<vmem>>, vector<16x16x4xf32>
    %20 = vector.shape_cast %19 : vector<16x16x4xf32> to vector<256x4xf32>
    %c0_37 = arith.constant 0 : index
    %c0_38 = arith.constant 0 : index
    %c0_39 = arith.constant 0 : index
    %21 = vector.load %arg2[%c0_37, %c0_38, %c0_39] : memref<9x4x4xf32, #tpu.memory_space<vmem>>, vector<1x4x4xf32>
    %22 = vector.shape_cast %21 : vector<1x4x4xf32> to vector<4x4xf32>
    %cst = arith.constant dense<0.000000e+00> : vector<256x4xf32>
    %23 = tpu.matmul %20, %22, %cst {dimension_numbers = #tpu.dot_dimension_numbers<[1], [0], [0], [1], [0, 0, 1, 1], [], []>} : vector<256x4xf32>, vector<4x4xf32>, vector<256x4xf32> -> vector<256x4xf32>
    %c0_40 = arith.constant 0 : index
    %c2_41 = arith.constant 2 : index
    %c0_42 = arith.constant 0 : index
    %24 = vector.load %arg5[%c0_40, %c2_41, %c0_42] : memref<20x20x4xf32, #tpu.memory_space<vmem>>, vector<16x16x4xf32>
    %25 = vector.shape_cast %24 : vector<16x16x4xf32> to vector<256x4xf32>
    %c1_43 = arith.constant 1 : index
    %c0_44 = arith.constant 0 : index
    %c0_45 = arith.constant 0 : index
    %26 = vector.load %arg2[%c1_43, %c0_44, %c0_45] : memref<9x4x4xf32, #tpu.memory_space<vmem>>, vector<1x4x4xf32>
    %27 = vector.shape_cast %26 : vector<1x4x4xf32> to vector<4x4xf32>
    %cst_46 = arith.constant dense<0.000000e+00> : vector<256x4xf32>
    %28 = tpu.matmul %25, %27, %cst_46 {dimension_numbers = #tpu.dot_dimension_numbers<[1], [0], [0], [1], [0, 0, 1, 1], [], []>} : vector<256x4xf32>, vector<4x4xf32>, vector<256x4xf32> -> vector<256x4xf32>
    %29 = arith.addf %23, %28 : vector<256x4xf32>
    %c0_47 = arith.constant 0 : index
    %c4_48 = arith.constant 4 : index
    %c0_49 = arith.constant 0 : index
    %30 = vector.load %arg5[%c0_47, %c4_48, %c0_49] : memref<20x20x4xf32, #tpu.memory_space<vmem>>, vector<16x16x4xf32>
    %31 = vector.shape_cast %30 : vector<16x16x4xf32> to vector<256x4xf32>
    %c2_50 = arith.constant 2 : index
    %c0_51 = arith.constant 0 : index
    %c0_52 = arith.constant 0 : index
    %32 = vector.load %arg2[%c2_50, %c0_51, %c0_52] : memref<9x4x4xf32, #tpu.memory_space<vmem>>, vector<1x4x4xf32>
    %33 = vector.shape_cast %32 : vector<1x4x4xf32> to vector<4x4xf32>
    %cst_53 = arith.constant dense<0.000000e+00> : vector<256x4xf32>
    %34 = tpu.matmul %31, %33, %cst_53 {dimension_numbers = #tpu.dot_dimension_numbers<[1], [0], [0], [1], [0, 0, 1, 1], [], []>} : vector<256x4xf32>, vector<4x4xf32>, vector<256x4xf32> -> vector<256x4xf32>
    %35 = arith.addf %29, %34 : vector<256x4xf32>
    %c2_54 = arith.constant 2 : index
    %c0_55 = arith.constant 0 : index
    %c0_56 = arith.constant 0 : index
    %36 = vector.load %arg5[%c2_54, %c0_55, %c0_56] : memref<20x20x4xf32, #tpu.memory_space<vmem>>, vector<16x16x4xf32>
    %37 = vector.shape_cast %36 : vector<16x16x4xf32> to vector<256x4xf32>
    %c3_57 = arith.constant 3 : index
    %c0_58 = arith.constant 0 : index
    %c0_59 = arith.constant 0 : index
    %38 = vector.load %arg2[%c3_57, %c0_58, %c0_59] : memref<9x4x4xf32, #tpu.memory_space<vmem>>, vector<1x4x4xf32>
    %39 = vector.shape_cast %38 : vector<1x4x4xf32> to vector<4x4xf32>
    %cst_60 = arith.constant dense<0.000000e+00> : vector<256x4xf32>
    %40 = tpu.matmul %37, %39, %cst_60 {dimension_numbers = #tpu.dot_dimension_numbers<[1], [0], [0], [1], [0, 0, 1, 1], [], []>} : vector<256x4xf32>, vector<4x4xf32>, vector<256x4xf32> -> vector<256x4xf32>
    %41 = arith.addf %35, %40 : vector<256x4xf32>
    %c2_61 = arith.constant 2 : index
    %c2_62 = arith.constant 2 : index
    %c0_63 = arith.constant 0 : index
    %42 = vector.load %arg5[%c2_61, %c2_62, %c0_63] : memref<20x20x4xf32, #tpu.memory_space<vmem>>, vector<16x16x4xf32>
    %43 = vector.shape_cast %42 : vector<16x16x4xf32> to vector<256x4xf32>
    %c4_64 = arith.constant 4 : index
    %c0_65 = arith.constant 0 : index
    %c0_66 = arith.constant 0 : index
    %44 = vector.load %arg2[%c4_64, %c0_65, %c0_66] : memref<9x4x4xf32, #tpu.memory_space<vmem>>, vector<1x4x4xf32>
    %45 = vector.shape_cast %44 : vector<1x4x4xf32> to vector<4x4xf32>
    %cst_67 = arith.constant dense<0.000000e+00> : vector<256x4xf32>
    %46 = tpu.matmul %43, %45, %cst_67 {dimension_numbers = #tpu.dot_dimension_numbers<[1], [0], [0], [1], [0, 0, 1, 1], [], []>} : vector<256x4xf32>, vector<4x4xf32>, vector<256x4xf32> -> vector<256x4xf32>
    %47 = arith.addf %41, %46 : vector<256x4xf32>
    %c2_68 = arith.constant 2 : index
    %c4_69 = arith.constant 4 : index
    %c0_70 = arith.constant 0 : index
    %48 = vector.load %arg5[%c2_68, %c4_69, %c0_70] : memref<20x20x4xf32, #tpu.memory_space<vmem>>, vector<16x16x4xf32>
    %49 = vector.shape_cast %48 : vector<16x16x4xf32> to vector<256x4xf32>
    %c5 = arith.constant 5 : index
    %c0_71 = arith.constant 0 : index
    %c0_72 = arith.constant 0 : index
    %50 = vector.load %arg2[%c5, %c0_71, %c0_72] : memref<9x4x4xf32, #tpu.memory_space<vmem>>, vector<1x4x4xf32>
    %51 = vector.shape_cast %50 : vector<1x4x4xf32> to vector<4x4xf32>
    %cst_73 = arith.constant dense<0.000000e+00> : vector<256x4xf32>
    %52 = tpu.matmul %49, %51, %cst_73 {dimension_numbers = #tpu.dot_dimension_numbers<[1], [0], [0], [1], [0, 0, 1, 1], [], []>} : vector<256x4xf32>, vector<4x4xf32>, vector<256x4xf32> -> vector<256x4xf32>
    %53 = arith.addf %47, %52 : vector<256x4xf32>
    %c4_74 = arith.constant 4 : index
    %c0_75 = arith.constant 0 : index
    %c0_76 = arith.constant 0 : index
    %54 = vector.load %arg5[%c4_74, %c0_75, %c0_76] : memref<20x20x4xf32, #tpu.memory_space<vmem>>, vector<16x16x4xf32>
    %55 = vector.shape_cast %54 : vector<16x16x4xf32> to vector<256x4xf32>
    %c6 = arith.constant 6 : index
    %c0_77 = arith.constant 0 : index
    %c0_78 = arith.constant 0 : index
    %56 = vector.load %arg2[%c6, %c0_77, %c0_78] : memref<9x4x4xf32, #tpu.memory_space<vmem>>, vector<1x4x4xf32>
    %57 = vector.shape_cast %56 : vector<1x4x4xf32> to vector<4x4xf32>
    %cst_79 = arith.constant dense<0.000000e+00> : vector<256x4xf32>
    %58 = tpu.matmul %55, %57, %cst_79 {dimension_numbers = #tpu.dot_dimension_numbers<[1], [0], [0], [1], [0, 0, 1, 1], [], []>} : vector<256x4xf32>, vector<4x4xf32>, vector<256x4xf32> -> vector<256x4xf32>
    %59 = arith.addf %53, %58 : vector<256x4xf32>
    %c4_80 = arith.constant 4 : index
    %c2_81 = arith.constant 2 : index
    %c0_82 = arith.constant 0 : index
    %60 = vector.load %arg5[%c4_80, %c2_81, %c0_82] : memref<20x20x4xf32, #tpu.memory_space<vmem>>, vector<16x16x4xf32>
    %61 = vector.shape_cast %60 : vector<16x16x4xf32> to vector<256x4xf32>
    %c7 = arith.constant 7 : index
    %c0_83 = arith.constant 0 : index
    %c0_84 = arith.constant 0 : index
    %62 = vector.load %arg2[%c7, %c0_83, %c0_84] : memref<9x4x4xf32, #tpu.memory_space<vmem>>, vector<1x4x4xf32>
    %63 = vector.shape_cast %62 : vector<1x4x4xf32> to vector<4x4xf32>
    %cst_85 = arith.constant dense<0.000000e+00> : vector<256x4xf32>
    %64 = tpu.matmul %61, %63, %cst_85 {dimension_numbers = #tpu.dot_dimension_numbers<[1], [0], [0], [1], [0, 0, 1, 1], [], []>} : vector<256x4xf32>, vector<4x4xf32>, vector<256x4xf32> -> vector<256x4xf32>
    %65 = arith.addf %59, %64 : vector<256x4xf32>
    %c4_86 = arith.constant 4 : index
    %c4_87 = arith.constant 4 : index
    %c0_88 = arith.constant 0 : index
    %66 = vector.load %arg5[%c4_86, %c4_87, %c0_88] : memref<20x20x4xf32, #tpu.memory_space<vmem>>, vector<16x16x4xf32>
    %67 = vector.shape_cast %66 : vector<16x16x4xf32> to vector<256x4xf32>
    %c8 = arith.constant 8 : index
    %c0_89 = arith.constant 0 : index
    %c0_90 = arith.constant 0 : index
    %68 = vector.load %arg2[%c8, %c0_89, %c0_90] : memref<9x4x4xf32, #tpu.memory_space<vmem>>, vector<1x4x4xf32>
    %69 = vector.shape_cast %68 : vector<1x4x4xf32> to vector<4x4xf32>
    %cst_91 = arith.constant dense<0.000000e+00> : vector<256x4xf32>
    %70 = tpu.matmul %67, %69, %cst_91 {dimension_numbers = #tpu.dot_dimension_numbers<[1], [0], [0], [1], [0, 0, 1, 1], [], []>} : vector<256x4xf32>, vector<4x4xf32>, vector<256x4xf32> -> vector<256x4xf32>
    %71 = arith.addf %65, %70 : vector<256x4xf32>
    %cst_92 = arith.constant dense<0.000000e+00> : vector<4xf32>
    %72 = vector.multi_reduction <add>, %71, %cst_92 [0] : vector<256x4xf32> to vector<4xf32>
    %73 = vector.shape_cast %72 : vector<4xf32> to vector<1x4xf32>
    %cst_93 = arith.constant 3.906250e-03 : f32
    %74 = vector.broadcast %cst_93 : f32 to vector<1x4xf32>
    %75 = arith.mulf %73, %74 : vector<1x4xf32>
    %76 = vector.broadcast %75 : vector<1x4xf32> to vector<256x4xf32>
    %77 = arith.subf %71, %76 : vector<256x4xf32>
    %78 = arith.mulf %77, %77 : vector<256x4xf32>
    %cst_94 = arith.constant dense<0.000000e+00> : vector<4xf32>
    %79 = vector.multi_reduction <add>, %78, %cst_94 [0] : vector<256x4xf32> to vector<4xf32>
    %80 = vector.shape_cast %79 : vector<4xf32> to vector<1x4xf32>
    %cst_95 = arith.constant 3.906250e-03 : f32
    %81 = vector.broadcast %cst_95 : f32 to vector<1x4xf32>
    %82 = arith.mulf %80, %81 : vector<1x4xf32>
    %cst_96 = arith.constant 9.99999974E-6 : f32
    %83 = vector.broadcast %cst_96 : f32 to vector<1x4xf32>
    %84 = arith.addf %82, %83 : vector<1x4xf32>
    %85 = math.rsqrt %84 : vector<1x4xf32>
    %86 = vector.broadcast %85 : vector<1x4xf32> to vector<256x4xf32>
    %87 = arith.mulf %77, %86 : vector<256x4xf32>
    %cst_97 = arith.constant 0.000000e+00 : f32
    %88 = vector.broadcast %cst_97 : f32 to vector<256x4xf32>
    %89 = arith.maximumf %87, %88 : vector<256x4xf32>
    %90 = vector.shape_cast %89 : vector<256x4xf32> to vector<16x16x4xf32>
    %c1_98 = arith.constant 1 : index
    %c1_99 = arith.constant 1 : index
    %c0_100 = arith.constant 0 : index
    %91 = vector.load %arg5[%c1_98, %c1_99, %c0_100] : memref<20x20x4xf32, #tpu.memory_space<vmem>>, vector<16x16x4xf32>
    tpu.vector_store %arg5[%c1_98, %c1_99, %c0_100], %90 {strides = array<i32>} : memref<20x20x4xf32, #tpu.memory_space<vmem>>, vector<16x16x4xf32>,
    %92 = vector.extract_strided_slice %90 {offsets = [0, 1, 0], sizes = [16, 1, 4], strides = [1, 1, 1]} : vector<16x16x4xf32> to vector<16x1x4xf32>
    %c1_101 = arith.constant 1 : index
    %c0_102 = arith.constant 0 : index
    %c0_103 = arith.constant 0 : index
    %93 = vector.load %arg5[%c1_101, %c0_102, %c0_103] : memref<20x20x4xf32, #tpu.memory_space<vmem>>, vector<16x1x4xf32>
    tpu.vector_store %arg5[%c1_101, %c0_102, %c0_103], %92 {strides = array<i32>} : memref<20x20x4xf32, #tpu.memory_space<vmem>>, vector<16x1x4xf32>,
    %94 = vector.extract_strided_slice %90 {offsets = [0, 14, 0], sizes = [16, 1, 4], strides = [1, 1, 1]} : vector<16x16x4xf32> to vector<16x1x4xf32>
    %c1_104 = arith.constant 1 : index
    %c17 = arith.constant 17 : index
    %c0_105 = arith.constant 0 : index
    %95 = vector.load %arg5[%c1_104, %c17, %c0_105] : memref<20x20x4xf32, #tpu.memory_space<vmem>>, vector<16x1x4xf32>
    tpu.vector_store %arg5[%c1_104, %c17, %c0_105], %94 {strides = array<i32>} : memref<20x20x4xf32, #tpu.memory_space<vmem>>, vector<16x1x4xf32>,
    %c2_106 = arith.constant 2 : index
    %c0_107 = arith.constant 0 : index
    %c0_108 = arith.constant 0 : index
    %96 = vector.load %arg5[%c2_106, %c0_107, %c0_108] : memref<20x20x4xf32, #tpu.memory_space<vmem>>, vector<1x18x4xf32>
    %c0_109 = arith.constant 0 : index
    %c0_110 = arith.constant 0 : index
    %c0_111 = arith.constant 0 : index
    %97 = vector.load %arg5[%c0_109, %c0_110, %c0_111] : memref<20x20x4xf32, #tpu.memory_space<vmem>>, vector<1x18x4xf32>
    tpu.vector_store %arg5[%c0_109, %c0_110, %c0_111], %96 {strides = array<i32>} : memref<20x20x4xf32, #tpu.memory_space<vmem>>, vector<1x18x4xf32>,
    %c15_112 = arith.constant 15 : index
    %c0_113 = arith.constant 0 : index
    %c0_114 = arith.constant 0 : index
    %98 = vector.load %arg5[%c15_112, %c0_113, %c0_114] : memref<20x20x4xf32, #tpu.memory_space<vmem>>, vector<1x18x4xf32>
    %c17_115 = arith.constant 17 : index
    %c0_116 = arith.constant 0 : index
    %c0_117 = arith.constant 0 : index
    %99 = vector.load %arg5[%c17_115, %c0_116, %c0_117] : memref<20x20x4xf32, #tpu.memory_space<vmem>>, vector<1x18x4xf32>
    tpu.vector_store %arg5[%c17_115, %c0_116, %c0_117], %98 {strides = array<i32>} : memref<20x20x4xf32, #tpu.memory_space<vmem>>, vector<1x18x4xf32>,
    %c0_118 = arith.constant 0 : index
    %c0_119 = arith.constant 0 : index
    %c0_120 = arith.constant 0 : index
    %100 = vector.load %arg5[%c0_118, %c0_119, %c0_120] : memref<20x20x4xf32, #tpu.memory_space<vmem>>, vector<16x16x4xf32>
    %101 = vector.shape_cast %100 : vector<16x16x4xf32> to vector<256x4xf32>
    %c0_121 = arith.constant 0 : index
    %c0_122 = arith.constant 0 : index
    %c0_123 = arith.constant 0 : index
    %102 = vector.load %arg3[%c0_121, %c0_122, %c0_123] : memref<9x4x4xf32, #tpu.memory_space<vmem>>, vector<1x4x4xf32>
    %103 = vector.shape_cast %102 : vector<1x4x4xf32> to vector<4x4xf32>
    %cst_124 = arith.constant dense<0.000000e+00> : vector<256x4xf32>
    %104 = tpu.matmul %101, %103, %cst_124 {dimension_numbers = #tpu.dot_dimension_numbers<[1], [0], [0], [1], [0, 0, 1, 1], [], []>} : vector<256x4xf32>, vector<4x4xf32>, vector<256x4xf32> -> vector<256x4xf32>
    %c0_125 = arith.constant 0 : index
    %c1_126 = arith.constant 1 : index
    %c0_127 = arith.constant 0 : index
    %105 = vector.load %arg5[%c0_125, %c1_126, %c0_127] : memref<20x20x4xf32, #tpu.memory_space<vmem>>, vector<16x16x4xf32>
    %106 = vector.shape_cast %105 : vector<16x16x4xf32> to vector<256x4xf32>
    %c1_128 = arith.constant 1 : index
    %c0_129 = arith.constant 0 : index
    %c0_130 = arith.constant 0 : index
    %107 = vector.load %arg3[%c1_128, %c0_129, %c0_130] : memref<9x4x4xf32, #tpu.memory_space<vmem>>, vector<1x4x4xf32>
    %108 = vector.shape_cast %107 : vector<1x4x4xf32> to vector<4x4xf32>
    %cst_131 = arith.constant dense<0.000000e+00> : vector<256x4xf32>
    %109 = tpu.matmul %106, %108, %cst_131 {dimension_numbers = #tpu.dot_dimension_numbers<[1], [0], [0], [1], [0, 0, 1, 1], [], []>} : vector<256x4xf32>, vector<4x4xf32>, vector<256x4xf32> -> vector<256x4xf32>
    %110 = arith.addf %104, %109 : vector<256x4xf32>
    %c0_132 = arith.constant 0 : index
    %c2_133 = arith.constant 2 : index
    %c0_134 = arith.constant 0 : index
    %111 = vector.load %arg5[%c0_132, %c2_133, %c0_134] : memref<20x20x4xf32, #tpu.memory_space<vmem>>, vector<16x16x4xf32>
    %112 = vector.shape_cast %111 : vector<16x16x4xf32> to vector<256x4xf32>
    %c2_135 = arith.constant 2 : index
    %c0_136 = arith.constant 0 : index
    %c0_137 = arith.constant 0 : index
    %113 = vector.load %arg3[%c2_135, %c0_136, %c0_137] : memref<9x4x4xf32, #tpu.memory_space<vmem>>, vector<1x4x4xf32>
    %114 = vector.shape_cast %113 : vector<1x4x4xf32> to vector<4x4xf32>
    %cst_138 = arith.constant dense<0.000000e+00> : vector<256x4xf32>
    %115 = tpu.matmul %112, %114, %cst_138 {dimension_numbers = #tpu.dot_dimension_numbers<[1], [0], [0], [1], [0, 0, 1, 1], [], []>} : vector<256x4xf32>, vector<4x4xf32>, vector<256x4xf32> -> vector<256x4xf32>
    %116 = arith.addf %110, %115 : vector<256x4xf32>
    %c1_139 = arith.constant 1 : index
    %c0_140 = arith.constant 0 : index
    %c0_141 = arith.constant 0 : index
    %117 = vector.load %arg5[%c1_139, %c0_140, %c0_141] : memref<20x20x4xf32, #tpu.memory_space<vmem>>, vector<16x16x4xf32>
    %118 = vector.shape_cast %117 : vector<16x16x4xf32> to vector<256x4xf32>
    %c3_142 = arith.constant 3 : index
    %c0_143 = arith.constant 0 : index
    %c0_144 = arith.constant 0 : index
    %119 = vector.load %arg3[%c3_142, %c0_143, %c0_144] : memref<9x4x4xf32, #tpu.memory_space<vmem>>, vector<1x4x4xf32>
    %120 = vector.shape_cast %119 : vector<1x4x4xf32> to vector<4x4xf32>
    %cst_145 = arith.constant dense<0.000000e+00> : vector<256x4xf32>
    %121 = tpu.matmul %118, %120, %cst_145 {dimension_numbers = #tpu.dot_dimension_numbers<[1], [0], [0], [1], [0, 0, 1, 1], [], []>} : vector<256x4xf32>, vector<4x4xf32>, vector<256x4xf32> -> vector<256x4xf32>
    %122 = arith.addf %116, %121 : vector<256x4xf32>
    %c1_146 = arith.constant 1 : index
    %c1_147 = arith.constant 1 : index
    %c0_148 = arith.constant 0 : index
    %123 = vector.load %arg5[%c1_146, %c1_147, %c0_148] : memref<20x20x4xf32, #tpu.memory_space<vmem>>, vector<16x16x4xf32>
    %124 = vector.shape_cast %123 : vector<16x16x4xf32> to vector<256x4xf32>
    %c4_149 = arith.constant 4 : index
    %c0_150 = arith.constant 0 : index
    %c0_151 = arith.constant 0 : index
    %125 = vector.load %arg3[%c4_149, %c0_150, %c0_151] : memref<9x4x4xf32, #tpu.memory_space<vmem>>, vector<1x4x4xf32>
    %126 = vector.shape_cast %125 : vector<1x4x4xf32> to vector<4x4xf32>
    %cst_152 = arith.constant dense<0.000000e+00> : vector<256x4xf32>
    %127 = tpu.matmul %124, %126, %cst_152 {dimension_numbers = #tpu.dot_dimension_numbers<[1], [0], [0], [1], [0, 0, 1, 1], [], []>} : vector<256x4xf32>, vector<4x4xf32>, vector<256x4xf32> -> vector<256x4xf32>
    %128 = arith.addf %122, %127 : vector<256x4xf32>
    %c1_153 = arith.constant 1 : index
    %c2_154 = arith.constant 2 : index
    %c0_155 = arith.constant 0 : index
    %129 = vector.load %arg5[%c1_153, %c2_154, %c0_155] : memref<20x20x4xf32, #tpu.memory_space<vmem>>, vector<16x16x4xf32>
    %130 = vector.shape_cast %129 : vector<16x16x4xf32> to vector<256x4xf32>
    %c5_156 = arith.constant 5 : index
    %c0_157 = arith.constant 0 : index
    %c0_158 = arith.constant 0 : index
    %131 = vector.load %arg3[%c5_156, %c0_157, %c0_158] : memref<9x4x4xf32, #tpu.memory_space<vmem>>, vector<1x4x4xf32>
    %132 = vector.shape_cast %131 : vector<1x4x4xf32> to vector<4x4xf32>
    %cst_159 = arith.constant dense<0.000000e+00> : vector<256x4xf32>
    %133 = tpu.matmul %130, %132, %cst_159 {dimension_numbers = #tpu.dot_dimension_numbers<[1], [0], [0], [1], [0, 0, 1, 1], [], []>} : vector<256x4xf32>, vector<4x4xf32>, vector<256x4xf32> -> vector<256x4xf32>
    %134 = arith.addf %128, %133 : vector<256x4xf32>
    %c2_160 = arith.constant 2 : index
    %c0_161 = arith.constant 0 : index
    %c0_162 = arith.constant 0 : index
    %135 = vector.load %arg5[%c2_160, %c0_161, %c0_162] : memref<20x20x4xf32, #tpu.memory_space<vmem>>, vector<16x16x4xf32>
    %136 = vector.shape_cast %135 : vector<16x16x4xf32> to vector<256x4xf32>
    %c6_163 = arith.constant 6 : index
    %c0_164 = arith.constant 0 : index
    %c0_165 = arith.constant 0 : index
    %137 = vector.load %arg3[%c6_163, %c0_164, %c0_165] : memref<9x4x4xf32, #tpu.memory_space<vmem>>, vector<1x4x4xf32>
    %138 = vector.shape_cast %137 : vector<1x4x4xf32> to vector<4x4xf32>
    %cst_166 = arith.constant dense<0.000000e+00> : vector<256x4xf32>
    %139 = tpu.matmul %136, %138, %cst_166 {dimension_numbers = #tpu.dot_dimension_numbers<[1], [0], [0], [1], [0, 0, 1, 1], [], []>} : vector<256x4xf32>, vector<4x4xf32>, vector<256x4xf32> -> vector<256x4xf32>
    %140 = arith.addf %134, %139 : vector<256x4xf32>
    %c2_167 = arith.constant 2 : index
    %c1_168 = arith.constant 1 : index
    %c0_169 = arith.constant 0 : index
    %141 = vector.load %arg5[%c2_167, %c1_168, %c0_169] : memref<20x20x4xf32, #tpu.memory_space<vmem>>, vector<16x16x4xf32>
    %142 = vector.shape_cast %141 : vector<16x16x4xf32> to vector<256x4xf32>
    %c7_170 = arith.constant 7 : index
    %c0_171 = arith.constant 0 : index
    %c0_172 = arith.constant 0 : index
    %143 = vector.load %arg3[%c7_170, %c0_171, %c0_172] : memref<9x4x4xf32, #tpu.memory_space<vmem>>, vector<1x4x4xf32>
    %144 = vector.shape_cast %143 : vector<1x4x4xf32> to vector<4x4xf32>
    %cst_173 = arith.constant dense<0.000000e+00> : vector<256x4xf32>
    %145 = tpu.matmul %142, %144, %cst_173 {dimension_numbers = #tpu.dot_dimension_numbers<[1], [0], [0], [1], [0, 0, 1, 1], [], []>} : vector<256x4xf32>, vector<4x4xf32>, vector<256x4xf32> -> vector<256x4xf32>
    %146 = arith.addf %140, %145 : vector<256x4xf32>
    %c2_174 = arith.constant 2 : index
    %c2_175 = arith.constant 2 : index
    %c0_176 = arith.constant 0 : index
    %147 = vector.load %arg5[%c2_174, %c2_175, %c0_176] : memref<20x20x4xf32, #tpu.memory_space<vmem>>, vector<16x16x4xf32>
    %148 = vector.shape_cast %147 : vector<16x16x4xf32> to vector<256x4xf32>
    %c8_177 = arith.constant 8 : index
    %c0_178 = arith.constant 0 : index
    %c0_179 = arith.constant 0 : index
    %149 = vector.load %arg3[%c8_177, %c0_178, %c0_179] : memref<9x4x4xf32, #tpu.memory_space<vmem>>, vector<1x4x4xf32>
    %150 = vector.shape_cast %149 : vector<1x4x4xf32> to vector<4x4xf32>
    %cst_180 = arith.constant dense<0.000000e+00> : vector<256x4xf32>
    %151 = tpu.matmul %148, %150, %cst_180 {dimension_numbers = #tpu.dot_dimension_numbers<[1], [0], [0], [1], [0, 0, 1, 1], [], []>} : vector<256x4xf32>, vector<4x4xf32>, vector<256x4xf32> -> vector<256x4xf32>
    %152 = arith.addf %146, %151 : vector<256x4xf32>
    %cst_181 = arith.constant dense<0.000000e+00> : vector<4xf32>
    %153 = vector.multi_reduction <add>, %152, %cst_181 [0] : vector<256x4xf32> to vector<4xf32>
    %154 = vector.shape_cast %153 : vector<4xf32> to vector<1x4xf32>
    %cst_182 = arith.constant 3.906250e-03 : f32
    %155 = vector.broadcast %cst_182 : f32 to vector<1x4xf32>
    %156 = arith.mulf %154, %155 : vector<1x4xf32>
    %157 = vector.broadcast %156 : vector<1x4xf32> to vector<256x4xf32>
    %158 = arith.subf %152, %157 : vector<256x4xf32>
    %159 = arith.mulf %158, %158 : vector<256x4xf32>
    %cst_183 = arith.constant dense<0.000000e+00> : vector<4xf32>
    %160 = vector.multi_reduction <add>, %159, %cst_183 [0] : vector<256x4xf32> to vector<4xf32>
    %161 = vector.shape_cast %160 : vector<4xf32> to vector<1x4xf32>
    %cst_184 = arith.constant 3.906250e-03 : f32
    %162 = vector.broadcast %cst_184 : f32 to vector<1x4xf32>
    %163 = arith.mulf %161, %162 : vector<1x4xf32>
    %cst_185 = arith.constant 9.99999974E-6 : f32
    %164 = vector.broadcast %cst_185 : f32 to vector<1x4xf32>
    %165 = arith.addf %163, %164 : vector<1x4xf32>
    %166 = math.rsqrt %165 : vector<1x4xf32>
    %167 = vector.broadcast %166 : vector<1x4xf32> to vector<256x4xf32>
    %168 = arith.mulf %158, %167 : vector<256x4xf32>
    %169 = vector.shape_cast %168 : vector<256x4xf32> to vector<16x16x4xf32>
    %170 = arith.addf %1, %169 : vector<16x16x4xf32>
    %c0_186 = arith.constant 0 : index
    %c0_187 = arith.constant 0 : index
    %c0_188 = arith.constant 0 : index
    %c0_189 = arith.constant 0 : index
    %171 = vector.load %arg4[%c0_186, %c0_187, %c0_188, %c0_189] : memref<1x16x16x4xf32, #tpu.memory_space<vmem>>, vector<1x16x16x4xf32>
    %172 = vector.shape_cast %171 : vector<1x16x16x4xf32> to vector<16x16x4xf32>
    %173 = vector.shape_cast %170 : vector<16x16x4xf32> to vector<1x16x16x4xf32>
    tpu.vector_store %arg4[%c0_186, %c0_187, %c0_188, %c0_189], %173 {strides = array<i32>} : memref<1x16x16x4xf32, #tpu.memory_space<vmem>>, vector<1x16x16x4xf32>,
    return
  }
  func.func @transform_0(%arg0: i32) -> (i32, i32, i32, i32) {
    %c0_i32 = arith.constant 0 : i32
    %c0_i32_0 = arith.constant 0 : i32
    %c0_i32_1 = arith.constant 0 : i32
    %c0_i32_2 = arith.constant 0 : i32
    return %arg0, %c0_i32, %c0_i32_0, %c0_i32_1 : i32, i32, i32, i32
  }
  func.func @transform_1(%arg0: i32) -> (i32, i32, i32) {
    %c0_i32 = arith.constant 0 : i32
    %c0_i32_0 = arith.constant 0 : i32
    %c0_i32_1 = arith.constant 0 : i32
    %c0_i32_2 = arith.constant 0 : i32
    return %c0_i32, %c0_i32_0, %c0_i32_1 : i32, i32, i32
  }
  func.func @transform_2(%arg0: i32) -> (i32, i32, i32) {
    %c0_i32 = arith.constant 0 : i32
    %c0_i32_0 = arith.constant 0 : i32
    %c0_i32_1 = arith.constant 0 : i32
    %c0_i32_2 = arith.constant 0 : i32
    return %c0_i32, %c0_i32_0, %c0_i32_1 : i32, i32, i32
  }
  func.func @transform_3(%arg0: i32) -> (i32, i32, i32, i32) {
    %c0_i32 = arith.constant 0 : i32
    %c0_i32_0 = arith.constant 0 : i32
    %c0_i32_1 = arith.constant 0 : i32
    %c0_i32_2 = arith.constant 0 : i32
    return %arg0, %c0_i32, %c0_i32_0, %c0_i32_1 : i32, i32, i32, i32
  }
}

</mosaic_0001>

<bundles_post_ra>
// kernel: tpu_custom_call.1
= control target key start
LH: loop header
LB: loop body
LE: loop exit
PB: predicated region body
PF: predicated region fallthrough
CT: control target
= control target key end

     0   :  { %s10090_s12 = smov 0   ;;  %s14016_s0 = inlined_call_operand.vmem [shape: f32[2,16,16,4], index: 0, kind: input, shape index: {}]   ;;  %s14017_s1 = inlined_call_operand.vmem [shape: f32[9,4,4], index: 1, kind: input, shape index: {}]   ;;  %s14018_s2 = inlined_call_operand.vmem [shape: f32[9,4,4], index: 2, kind: input, shape index: {}]   ;;  %s14019_s3 = inlined_call_operand.vmem [shape: f32[2,16,16,4], index: 3, kind: output, shape index: {}]  }
   0x1 LB: > { %s7933_s13 = sadd.s32 4294967295, %s10068_s12   ;;  %p7937_p0 = scmp.ge.s32.totalorder %s10068_s12, 1  ;;  %s10068_s12 = sphi %s10090_s12, %s13_s12  }
   0x2   : > { %p137_p1 = scmp.lt.s32.totalorder %s10068_s12, 3 }
   0x4   : > { %p138_p2 = pnand %p7937_p0, %p137_p1 }
   0x6   : > { %141 = sbr.rel (%p138_p2) target bundleno = 1422 (0x58e), region = 32 }
   0xb   : > { %v7942_v0 = vld [vmem:[%s14017_s1 + $0x4] sm:$0xf]  ;;  %vm500_vm0 = vcmask 1043456   ;;  %v369_v1 = vld [vmem:[%s14017_s1] sm:$0xf]  ;;  %p161_p3 = scmp.lt.s32.totalorder %s7933_s13, 1 }
   0xc   : > { %9150 = vmatprep.subr.msk.mxu0 %vm500_vm0, %v7942_v0  ;;  %9200 = vmatprep.subr.msk.mxu1 %vm500_vm0, %v369_v1  ;;  %v10109_v2 = vld [vmem:[%s14017_s1 + $0x8] sm:$0xf]  ;;  %v10118_v3 = vld [vmem:[%s14017_s1 + $0xc] sm:$0xf]  ;;  %vm204_vm1 = vcmask 31744   ;;  %vm237_vm2 = vcmask 26626  }
   0xd   : > { %9151 = vmatpush3.msk.msra.mxu0 %vm500_vm0, %v7942_v0  ;;  %s14460_s13 = smov (!%p161_p3, %s7933_s13), 1  ;;  %9201 = vmatpush3.msk.msra.mxu1 %vm500_vm0, %v369_v1  ;;  %vm271_vm3 = vcmask 25601   ;;  %vm254_vm4 = vcmask 30726   ;;  %vm288_vm5 = vcmask 29701   ;;  %vm311_vm6 = vcmask 27648  }
   0xe   : > { %9250 = vmatprep.subr.msk.mxu0 %vm500_vm0, %v10109_v2  ;;  %9300 = vmatprep.subr.msk.mxu1 %vm500_vm0, %v10118_v3  ;;  %s8554_s22 = sshll.u32 %s14460_s13, 8  ;;  %v10373_v40 = vld [vmem:[%s14017_s1 + $0x10] sm:$0xf]  ;;  %vm4122_vm7 = vcmask 25600  }
   0xf   : > { %s10130_s25 = scalar_lea.vmem %s14016_s0, %s8554_s22  ;;  %s13911_s5 = scalar_lea.vmem %s14019_s3, %s8554_s22 }
  0x10   : > { %v10133_v4 = vld [vmem:[%s10130_s25 + $0x20] sm:$0xff]  ;;  %v10136_v5 = vld [vmem:[%s10130_s25 + $0x28] sm:$0xff]  ;;  %v10139_v6 = vld [vmem:[%s10130_s25 + $0x10] sm:$0xff] }
  0x11   : > { %14105 = vst [vmem:[#allocation3_spill] sm:$0xff] %v10133_v4  ;;  %14106 = vst [vmem:[#allocation4_spill] sm:$0xff] %v10136_v5  ;;  %v10154_v7 = vld [vmem:[%s10130_s25 + $0x18] sm:$0xff]  ;;  %v10163_v8 = vld [vmem:[%s10130_s25] sm:$0xff] }
  0x12   : > { %14107 = vst [vmem:[#allocation5_spill] sm:$0xff] %v10139_v6  ;;  %209 = vst.msk [vmem:[#allocation2 + $0x62] sm:$0xff] %vm204_vm1, %v10133_v4  ;;  %v10166_v9 = vld [vmem:[%s10130_s25 + $0x8] sm:$0xff]  ;;  %v10187_v10 = vld [vmem:[%s10130_s25 + $0x30] sm:$0xff] }
  0x13   : > { %210 = vst.msk [vmem:[#allocation2 + $0x6a] sm:$0xff] %vm204_vm1, %v10136_v5  ;;  %14108 = vst [vmem:[#allocation6_spill] sm:$0xff] %v10154_v7  ;;  %v10190_v11 = vld [vmem:[%s10130_s25 + $0x38] sm:$0xff]  ;;  %v10193_v12 = vld [vmem:[%s10130_s25 + $0x40] sm:$0xff] }
  0x14   : > { %240 = vst.msk [vmem:[#allocation2 + $0x5e] sm:$0x4] %vm237_vm2, %v10133_v4  ;;  %239 = vst.msk [vmem:[#allocation2 + $0x46] sm:$0x4] %vm237_vm2, %v10139_v6  ;;  %v10214_v13 = vld [vmem:[%s10130_s25 + $0x48] sm:$0xff]  ;;  %v10217_v14 = vld [vmem:[%s10130_s25 + $0x50] sm:$0xff] }
  0x15   : > { %274 = vst.msk [vmem:[#allocation2 + $0x60] sm:$0x2] %vm271_vm3, %v10133_v4  ;;  %273 = vst.msk [vmem:[#allocation2 + $0x48] sm:$0x2] %vm271_vm3, %v10139_v6  ;;  %v10220_v15 = vld [vmem:[%s10130_s25 + $0x58] sm:$0xff]  ;;  %v10241_v16 = vld [vmem:[%s10130_s25 + $0x60] sm:$0xff] }
  0x16   : > { %257 = vst.msk [vmem:[#allocation2 + $0x6c] sm:$0x40] %vm254_vm4, %v10136_v5  ;;  %14109 = vst [vmem:[#allocation7_spill] sm:$0xff] %v10163_v8  ;;  %v10244_v17 = vld [vmem:[%s10130_s25 + $0x68] sm:$0xff]  ;;  %v10247_v18 = vld [vmem:[%s10130_s25 + $0x70] sm:$0xff] }
  0x17   : > { %291 = vst.msk [vmem:[#allocation2 + $0x6e] sm:$0x20] %vm288_vm5, %v10136_v5  ;;  %14110 = vst [vmem:[#allocation8_spill] sm:$0xff] %v10166_v9  ;;  %v10268_v19 = vld [vmem:[%s10130_s25 + $0x78] sm:$0xff]  ;;  %v10271_v20 = vld [vmem:[%s10130_s25 + $0x80] sm:$0xff] }
  0x18   : > { %207 = vst.msk [vmem:[#allocation2 + $0x4a] sm:$0xff] %vm204_vm1, %v10139_v6  ;;  %208 = vst.msk [vmem:[#allocation2 + $0x52] sm:$0xff] %vm204_vm1, %v10154_v7  ;;  %v10274_v21 = vld [vmem:[%s10130_s25 + $0x88] sm:$0xff]  ;;  %v10295_v22 = vld [vmem:[%s10130_s25 + $0x90] sm:$0xff] }
  0x19   : > { %256 = vst.msk [vmem:[#allocation2 + $0x54] sm:$0x40] %vm254_vm4, %v10154_v7  ;;  %255 = vst.msk [vmem:[#allocation2 + $0x3c] sm:$0x40] %vm254_vm4, %v10166_v9  ;;  %v10298_v23 = vld [vmem:[%s10130_s25 + $0x98] sm:$0xff]  ;;  %v10301_v24 = vld [vmem:[%s10130_s25 + $0xa0] sm:$0xff] }
  0x1a   : > { %290 = vst.msk [vmem:[#allocation2 + $0x56] sm:$0x20] %vm288_vm5, %v10154_v7  ;;  %289 = vst.msk [vmem:[#allocation2 + $0x3e] sm:$0x20] %vm288_vm5, %v10166_v9  ;;  %v10322_v25 = vld [vmem:[%s10130_s25 + $0xa8] sm:$0xff]  ;;  %v10325_v26 = vld [vmem:[%s10130_s25 + $0xb0] sm:$0xff] }
  0x1b   : > { %205 = vst.msk [vmem:[#allocation2 + $0x32] sm:$0xff] %vm204_vm1, %v10163_v8  ;;  %206 = vst.msk [vmem:[#allocation2 + $0x3a] sm:$0xff] %vm204_vm1, %v10166_v9  ;;  %v10328_v27 = vld [vmem:[%s10130_s25 + $0xb8] sm:$0xff]  ;;  %v10332_v29 = vld [vmem:[#allocation2 + $0x68] sm:$0xff] }
  0x1c   : > { %238 = vst.msk [vmem:[#allocation2 + $0x2e] sm:$0x4] %vm237_vm2, %v10163_v8  ;;  %14111 = vst [vmem:[#allocation9_spill] sm:$0xff] %v10187_v10  ;;  %v10330_v28 = vld [vmem:[#allocation2 + $0x60] sm:$0xff]  ;;  %v10413_v50 = vld [vmem:[%s10130_s25 + $0xc8] sm:$0xff] }
  0x1d   : > { %272 = vst.msk [vmem:[#allocation2 + $0x30] sm:$0x2] %vm271_vm3, %v10163_v8  ;;  %14112 = vst [vmem:[#allocation10_spill] sm:$0xff] %v10190_v11  ;;  %v10410_v49 = vld [vmem:[%s10130_s25 + $0xc0] sm:$0xff]  ;;  %v10430_v52 = vld [vmem:[%s10130_s25 + $0xd0] sm:$0xff] }
  0x1e   : > { %14113 = vst [vmem:[#allocation11_spill] sm:$0xff] %v10193_v12  ;;  %211 = vst.msk [vmem:[#allocation2 + $0x7a] sm:$0xff] %vm204_vm1, %v10187_v10  ;;  %v308_v30 = vld [vmem:[#allocation2 + $0x70] sm:$0xf]  ;;  %v10415_v51 = vld [vmem:[#allocation2 + $0x62] sm:$0xff] }
  0x1f   : > { %241 = vst.msk [vmem:[#allocation2 + $0x76] sm:$0x4] %vm237_vm2, %v10187_v10  ;;  %242 = vst.msk [vmem:[#allocation2 + $0x8e] sm:$0x4] %vm237_vm2, %v10193_v12  ;;  %v10357_v31 = vld [vmem:[#allocation2 + $0x48] sm:$0xff]  ;;  %v10359_v32 = vld [vmem:[#allocation2 + $0x50] sm:$0xff] }
  0x20   : > { %275 = vst.msk [vmem:[#allocation2 + $0x78] sm:$0x2] %vm271_vm3, %v10187_v10  ;;  %276 = vst.msk [vmem:[#allocation2 + $0x90] sm:$0x2] %vm271_vm3, %v10193_v12  ;;  %v10397_v47 = vld [vmem:[#allocation2 + $0x4a] sm:$0xff]  ;;  %v10407_v48 = vld [vmem:[#allocation2 + $0x52] sm:$0xff] }
  0x21   : > { %212 = vst.msk [vmem:[#allocation2 + $0x82] sm:$0xff] %vm204_vm1, %v10190_v11  ;;  %213 = vst.msk [vmem:[#allocation2 + $0x92] sm:$0xff] %vm204_vm1, %v10193_v12  ;;  %v324_v33 = vld [vmem:[#allocation2 + $0x58] sm:$0xf]  ;;  %v10455_v54 = vld [vmem:[#allocation2 + $0x6a] sm:$0xff] }
  0x22   : > { %258 = vst.msk [vmem:[#allocation2 + $0x84] sm:$0x40] %vm254_vm4, %v10190_v11  ;;  %14114 = vst [vmem:[#allocation12_spill] sm:$0xff] %v10214_v13  ;;  %v10379_v43 = vld [vmem:[#allocation2 + $0x32] sm:$0xff]  ;;  %v10393_v45 = vld [vmem:[#allocation2 + $0x3a] sm:$0xff] }
  0x23   : > { %292 = vst.msk [vmem:[#allocation2 + $0x86] sm:$0x20] %vm288_vm5, %v10190_v11  ;;  %14115 = vst [vmem:[#allocation13_spill] sm:$0xff] %v10217_v14  ;;  %v10395_v46 = vld [vmem:[#allocation2 + $0x38] sm:$0xff]  ;;  %v10494_v1 = vld [vmem:[%s10130_s25 + $0xe0] sm:$0xff] }
  0x24   : > { %14116 = vst [vmem:[#allocation14_spill] sm:$0xff] %v10220_v15  ;;  %214 = vst.msk [vmem:[#allocation2 + $0x9a] sm:$0xff] %vm204_vm1, %v10214_v13  ;;  %v10381_v44 = vld [vmem:[#allocation2 + $0x30] sm:$0xff]  ;;  %v10433_v53 = vld [vmem:[%s10130_s25 + $0xd8] sm:$0xff] }
  0x25   : > { %259 = vst.msk [vmem:[#allocation2 + $0x9c] sm:$0x40] %vm254_vm4, %v10214_v13  ;;  %260 = vst.msk [vmem:[#allocation2 + $0xb4] sm:$0x40] %vm254_vm4, %v10220_v15  ;;  %v10457_v55 = vld [vmem:[#allocation2 + $0x7a] sm:$0xff] }
  0x26   : > { %293 = vst.msk [vmem:[#allocation2 + $0x9e] sm:$0x20] %vm288_vm5, %v10214_v13  ;;  %294 = vst.msk [vmem:[#allocation2 + $0xb6] sm:$0x20] %vm288_vm5, %v10220_v15  ;;  %v10697_v8 = vld [vmem:[%s14017_s1 + $0x18] sm:$0xf] }
  0x27   : > { %215 = vst.msk [vmem:[#allocation2 + $0xaa] sm:$0xff] %vm204_vm1, %v10217_v14  ;;  %216 = vst.msk [vmem:[#allocation2 + $0xb2] sm:$0xff] %vm204_vm1, %v10220_v15  ;;  %v10459_v56 = vld [vmem:[#allocation2 + $0x78] sm:$0xff] }
  0x28   : > { %243 = vst.msk [vmem:[#allocation2 + $0xa6] sm:$0x4] %vm237_vm2, %v10217_v14  ;;  %14117 = vst [vmem:[#allocation15_spill] sm:$0xff] %v10241_v16  ;;  %v10469_v57 = vld [vmem:[#allocation2 + $0x82] sm:$0xff]  ;;  %v10473_v59 = vld [vmem:[#allocation2 + $0x92] sm:$0xff] }
  0x29   : > { %277 = vst.msk [vmem:[#allocation2 + $0xa8] sm:$0x2] %vm271_vm3, %v10217_v14  ;;  %14118 = vst [vmem:[#allocation16_spill] sm:$0xff] %v10244_v17  ;;  %v10471_v58 = vld [vmem:[#allocation2 + $0x80] sm:$0xff]  ;;  %v10475_v60 = vld [vmem:[#allocation2 + $0x90] sm:$0xff] }
  0x2a   : > { %14119 = vst [vmem:[#allocation17_spill] sm:$0xff] %v10247_v18  ;;  %217 = vst.msk [vmem:[#allocation2 + $0xc2] sm:$0xff] %vm204_vm1, %v10241_v16 }
  0x2b   : > { %244 = vst.msk [vmem:[#allocation2 + $0xbe] sm:$0x4] %vm237_vm2, %v10241_v16  ;;  %245 = vst.msk [vmem:[#allocation2 + $0xd6] sm:$0x4] %vm237_vm2, %v10247_v18  ;;  %v10485_v61 = vld [vmem:[#allocation2 + $0x9a] sm:$0xff] }
  0x2c   : > { %278 = vst.msk [vmem:[#allocation2 + $0xc0] sm:$0x2] %vm271_vm3, %v10241_v16  ;;  %279 = vst.msk [vmem:[#allocation2 + $0xd8] sm:$0x2] %vm271_vm3, %v10247_v18  ;;  %v10487_v62 = vld [vmem:[#allocation2 + $0x98] sm:$0xff] }
  0x2d   : > { %218 = vst.msk [vmem:[#allocation2 + $0xca] sm:$0xff] %vm204_vm1, %v10244_v17  ;;  %219 = vst.msk [vmem:[#allocation2 + $0xda] sm:$0xff] %vm204_vm1, %v10247_v18 }
  0x2e   : > { %261 = vst.msk [vmem:[#allocation2 + $0xcc] sm:$0x40] %vm254_vm4, %v10244_v17  ;;  %14120 = vst [vmem:[#allocation18_spill] sm:$0xff] %v10268_v19  ;;  %v10489_v63 = vld [vmem:[#allocation2 + $0xaa] sm:$0xff] }
  0x2f   : > { %295 = vst.msk [vmem:[#allocation2 + $0xce] sm:$0x20] %vm288_vm5, %v10244_v17  ;;  %14121 = vst [vmem:[#allocation19_spill] sm:$0xff] %v10271_v20 }
  0x30   : > { %14122 = vst [vmem:[#allocation20_spill] sm:$0xff] %v10274_v21  ;;  %220 = vst.msk [vmem:[#allocation2 + $0xe2] sm:$0xff] %vm204_vm1, %v10268_v19  ;;  %v10491_v0 = vld [vmem:[#allocation2 + $0xa8] sm:$0xff] }
  0x31   : > { %262 = vst.msk [vmem:[#allocation2 + $0xe4] sm:$0x40] %vm254_vm4, %v10268_v19  ;;  %263 = vst.msk [vmem:[#allocation2 + $0xfc] sm:$0x40] %vm254_vm4, %v10274_v21 }
  0x32   : > { %296 = vst.msk [vmem:[#allocation2 + $0xe6] sm:$0x20] %vm288_vm5, %v10268_v19  ;;  %297 = vst.msk [vmem:[#allocation2 + $0xfe] sm:$0x20] %vm288_vm5, %v10274_v21 }
  0x33   : > { %221 = vst.msk [vmem:[#allocation2 + $0xf2] sm:$0xff] %vm204_vm1, %v10271_v20  ;;  %222 = vst.msk [vmem:[#allocation2 + $0xfa] sm:$0xff] %vm204_vm1, %v10274_v21 }
  0x34   : > { %246 = vst.msk [vmem:[#allocation2 + $0xee] sm:$0x4] %vm237_vm2, %v10271_v20  ;;  %14123 = vst [vmem:[#allocation21_spill] sm:$0xff] %v10295_v22 }
  0x35   : > { %280 = vst.msk [vmem:[#allocation2 + $0xf0] sm:$0x2] %vm271_vm3, %v10271_v20  ;;  %14124 = vst [vmem:[#allocation22_spill] sm:$0xff] %v10298_v23 }
  0x36   : > { %14125 = vst [vmem:[#allocation23_spill] sm:$0xff] %v10301_v24  ;;  %223 = vst.msk [vmem:[#allocation2 + $0x10a] sm:$0xff] %vm204_vm1, %v10295_v22 }
  0x37   : > { %247 = vst.msk [vmem:[#allocation2 + $0x106] sm:$0x4] %vm237_vm2, %v10295_v22  ;;  %248 = vst.msk [vmem:[#allocation2 + $0x11e] sm:$0x4] %vm237_vm2, %v10301_v24 }
  0x38   : > { %281 = vst.msk [vmem:[#allocation2 + $0x108] sm:$0x2] %vm271_vm3, %v10295_v22  ;;  %282 = vst.msk [vmem:[#allocation2 + $0x120] sm:$0x2] %vm271_vm3, %v10301_v24 }
  0x39   : > { %224 = vst.msk [vmem:[#allocation2 + $0x112] sm:$0xff] %vm204_vm1, %v10298_v23  ;;  %225 = vst.msk [vmem:[#allocation2 + $0x122] sm:$0xff] %vm204_vm1, %v10301_v24 }
  0x3a   : > { %264 = vst.msk [vmem:[#allocation2 + $0x114] sm:$0x40] %vm254_vm4, %v10298_v23  ;;  %14126 = vst [vmem:[#allocation24_spill] sm:$0xff] %v10322_v25 }
  0x3b   : > { %298 = vst.msk [vmem:[#allocation2 + $0x116] sm:$0x20] %vm288_vm5, %v10298_v23  ;;  %14127 = vst [vmem:[#allocation25_spill] sm:$0xff] %v10325_v26 }
  0x3c   : > { %14128 = vst [vmem:[#allocation26_spill] sm:$0xff] %v10328_v27  ;;  %226 = vst.msk [vmem:[#allocation2 + $0x12a] sm:$0xff] %vm204_vm1, %v10322_v25 }
  0x3d   : > { %265 = vst.msk [vmem:[#allocation2 + $0x12c] sm:$0x40] %vm254_vm4, %v10322_v25  ;;  %266 = vst.msk [vmem:[#allocation2 + $0x144] sm:$0x40] %vm254_vm4, %v10328_v27 }
  0x3e   : > { %299 = vst.msk [vmem:[#allocation2 + $0x12e] sm:$0x20] %vm288_vm5, %v10322_v25  ;;  %300 = vst.msk [vmem:[#allocation2 + $0x146] sm:$0x20] %vm288_vm5, %v10328_v27 }
  0x3f   : > { %227 = vst.msk [vmem:[#allocation2 + $0x13a] sm:$0xff] %vm204_vm1, %v10325_v26  ;;  %228 = vst.msk [vmem:[#allocation2 + $0x142] sm:$0xff] %vm204_vm1, %v10328_v27  ;;  %v10604_v27 = vld [vmem:[#allocation2 + $0x10a] sm:$0xff] }
  0x40   : > { %249 = vst.msk [vmem:[#allocation2 + $0x136] sm:$0x4] %vm237_vm2, %v10325_v26  ;;  %14129 = vst [vmem:[#allocation27_spill] sm:$0xff] %v10410_v49  ;;  %v10616_v25 = vld [vmem:[#allocation2 + $0x112] sm:$0xff]  ;;  %v10620_v23 = vld [vmem:[#allocation2 + $0x122] sm:$0xff] }
  0x41   : > { %283 = vst.msk [vmem:[#allocation2 + $0x138] sm:$0x2] %vm271_vm3, %v10325_v26  ;;  %14130 = vst [vmem:[#allocation28_spill] sm:$0xff] %v10413_v50  ;;  %v10606_v26 = vld [vmem:[#allocation2 + $0x108] sm:$0xff]  ;;  %v10618_v24 = vld [vmem:[#allocation2 + $0x110] sm:$0xff] }
  0x42   : > { %309 = vst.msk [vmem:[#allocation2] sm:$0xff] %vm204_vm1, %v10330_v28  ;;  %310 = vst.msk [vmem:[#allocation2 + $0x8] sm:$0xff] %vm204_vm1, %v10332_v29  ;;  %v10622_v22 = vld [vmem:[#allocation2 + $0x120] sm:$0xff] }
  0x43   : > { %312 = vst.msk [vmem:[#allocation2 + $0x10] sm:$0xf] %vm311_vm6, %v308_v30  ;;  %328 = vst.msk [vmem:[#allocation2 + $0x28] sm:$0xf] %vm311_vm6, %v324_v33  ;;  %v10518_v30 = vld [vmem:[%s10130_s25 + $0xf0] sm:$0xff]  ;;  %v10634_v20 = vld [vmem:[#allocation2 + $0x128] sm:$0xff] }
  0x44   : > { %326 = vst.msk [vmem:[#allocation2 + $0x18] sm:$0xff] %vm204_vm1, %v10357_v31  ;;  %327 = vst.msk [vmem:[#allocation2 + $0x20] sm:$0xff] %vm204_vm1, %v10359_v32  ;;  %v10524_v33 = vld [vmem:[#allocation2 + $0xb0] sm:$0xff] }
  0x45   : > { %229 = vst.msk [vmem:[#allocation2 + $0x152] sm:$0xff] %vm204_vm1, %v10410_v49  ;;  %230 = vst.msk [vmem:[#allocation2 + $0x15a] sm:$0xff] %vm204_vm1, %v10413_v50  ;;  %v10632_v21 = vld [vmem:[#allocation2 + $0x12a] sm:$0xff] }
  0x46   : > { %250 = vst.msk [vmem:[#allocation2 + $0x14e] sm:$0x4] %vm237_vm2, %v10410_v49  ;;  %14131 = vst [vmem:[#allocation29_spill] sm:$0xff] %v10430_v52  ;;  %v10636_v19 = vld [vmem:[#allocation2 + $0x13a] sm:$0xff]  ;;  %v10648_v17 = vld [vmem:[#allocation2 + $0x142] sm:$0xff] }
  0x47   : > { %284 = vst.msk [vmem:[#allocation2 + $0x150] sm:$0x2] %vm271_vm3, %v10410_v49  ;;  %14132 = vst [vmem:[#allocation30_spill] sm:$0xff] %v10433_v53  ;;  %v10602_v49 = vld [vmem:[#allocation2 + $0xf8] sm:$0xff]  ;;  %v10650_v16 = vld [vmem:[#allocation2 + $0x140] sm:$0xff] }
  0x48   : > { %267 = vst.msk [vmem:[#allocation2 + $0x15c] sm:$0x40] %vm254_vm4, %v10413_v50  ;;  %268 = vst.msk [vmem:[#allocation2 + $0x174] sm:$0x40] %vm254_vm4, %v10433_v53  ;;  %v10638_v18 = vld [vmem:[#allocation2 + $0x138] sm:$0xff] }
  0x49   : > { %v370_v34 = vld [vmem:[#allocation2 + $0x2] sm:$0xff]  ;;  %301 = vst.msk [vmem:[#allocation2 + $0x15e] sm:$0x20] %vm288_vm5, %v10413_v50  ;;  %302 = vst.msk [vmem:[#allocation2 + $0x176] sm:$0x20] %vm288_vm5, %v10433_v53  ;;  %v10600_v50 = vld [vmem:[#allocation2 + $0xfa] sm:$0xff] }
  0x4a   : > { %v337_v35 = vld [vmem:[#allocation2] sm:$0xff]  ;;  %v371_v36 = vld [vmem:[#allocation2 + $0xa] sm:$0xff]  ;;  %9152 = vmatprep.mubr.msk.f32.mxu0 %vm204_vm1, %v370_v34  ;;  %231 = vst.msk [vmem:[#allocation2 + $0x16a] sm:$0xff] %vm204_vm1, %v10430_v52  ;;  %232 = vst.msk [vmem:[#allocation2 + $0x172] sm:$0xff] %vm204_vm1, %v10433_v53 }
  0x4b   : > { %9202 = vmatprep.mubr.msk.f32.mxu1 %vm204_vm1, %v337_v35  ;;  %v338_v37 = vld [vmem:[#allocation2 + $0x8] sm:$0xff]  ;;  %v372_v38 = vld [vmem:[#allocation2 + $0x1a] sm:$0xff]  ;;  %9153 = vmatmul.mubr.msk.f32.vlgmr.msra.gmra.mxu0 %vm204_vm1, %v371_v36  ;;  %251 = vst.msk [vmem:[#allocation2 + $0x166] sm:$0x4] %vm237_vm2, %v10430_v52  ;;  %14133 = vst [vmem:[#allocation31_spill] sm:$0xff] %v10475_v60 }
  0x4c   : > { %v339_v39 = vld [vmem:[#allocation2 + $0x18] sm:$0xff]  ;;  %9203 = vmatmul.mubr.msk.f32.vlgmr.msra.gmra.mxu1 %vm204_vm1, %v338_v37  ;;  %9251 = vmatpush3.msk.msra.mxu0 %vm500_vm0, %v10109_v2  ;;  %v373_v41 = vld [vmem:[#allocation2 + $0x22] sm:$0xff]  ;;  %285 = vst.msk [vmem:[#allocation2 + $0x168] sm:$0x2] %vm271_vm3, %v10430_v52  ;;  %14134 = vst [vmem:[#allocation32_spill] sm:$0xff] %v10487_v62 }
  0x4d   : > { %9155 = vmatprep.mubr.msk.f32.mxu0 %vm204_vm1, %v372_v38  ;;  %v340_v42 = vld [vmem:[#allocation2 + $0x20] sm:$0xff]  ;;  %9205 = vmatprep.mubr.msk.f32.mxu1 %vm204_vm1, %v339_v39  ;;  %14135 = vst [vmem:[#allocation33_spill] sm:$0xff] %v10491_v0  ;;  %14136 = vst [vmem:[#allocation34_spill] sm:$0xff] %v10494_v1  ;;  %v10497_v2 = vld [vmem:[%s10130_s25 + $0xe8] sm:$0xff] }
  0x4e   : > { %9301 = vmatpush3.msk.msra.mxu1 %vm500_vm0, %v10118_v3  ;;  %9350 = vmatprep.subr.msk.mxu0 %vm500_vm0, %v10373_v40  ;;  %14137 = vst [vmem:[#allocation35_spill] sm:$0xff] %v10497_v2  ;;  %v10503_v3 = vld [vmem:[#allocation2 + $0xb2] sm:$0xff]  ;;  %233 = vst.msk [vmem:[#allocation2 + $0x182] sm:$0xff] %vm204_vm1, %v10494_v1  ;;  %v10540_v36 = vld [vmem:[#allocation2 + $0xc2] sm:$0xff] }
  0x4f   : > { %9156 = vmatmul.mubr.msk.f32.gmra.mxu0 %vm204_vm1, %v373_v41  ;;  %252 = vst.msk [vmem:[#allocation2 + $0x17e] sm:$0x4] %vm237_vm2, %v10494_v1  ;;  %14138 = vst [vmem:[#allocation36_spill] sm:$0xff] %v10518_v30  ;;  %v10535_v34 = vld [vmem:[%s14017_s1 + $0x14] sm:$0xf]  ;;  %v10538_v35 = vld [vmem:[%s10130_s25 + $0xf8] sm:$0xff] }
  0x50   : > { %9206 = vmatmul.mubr.msk.f32.gmra.mxu1 %vm204_vm1, %v340_v42  ;;  %9158 = vmatprep.mubr.msk.f32.mxu0 %vm204_vm1, %v10379_v43  ;;  %286 = vst.msk [vmem:[#allocation2 + $0x180] sm:$0x2] %vm271_vm3, %v10494_v1  ;;  %14139 = vst [vmem:[#allocation37_spill] sm:$0xff] %v10524_v33  ;;  %v10542_v37 = vld [vmem:[#allocation2 + $0xc0] sm:$0xff]  ;;  %v10560_v38 = vld [vmem:[#allocation2 + $0xca] sm:$0xff] }
  0x51   : > { %9208 = vmatprep.mubr.msk.f32.mxu1 %vm204_vm1, %v10381_v44  ;;  %234 = vst.msk [vmem:[#allocation2 + $0x18a] sm:$0xff] %vm204_vm1, %v10497_v2  ;;  %235 = vst.msk [vmem:[#allocation2 + $0x19a] sm:$0xff] %vm204_vm1, %v10518_v30  ;;  %9400 = vmatprep.subr.msk.mxu1 %vm500_vm0, %v10535_v34  ;;  %v10562_v39 = vld [vmem:[#allocation2 + $0xc8] sm:$0xff]  ;;  %v10564_v41 = vld [vmem:[#allocation2 + $0xda] sm:$0xff] }
  0x52   : > { %269 = vst.msk [vmem:[#allocation2 + $0x18c] sm:$0x40] %vm254_vm4, %v10497_v2  ;;  %14140 = vst [vmem:[#allocation38_spill] sm:$0xff] %v10538_v35  ;;  %v10566_v42 = vld [vmem:[#allocation2 + $0xd8] sm:$0xff]  ;;  %v10586_v1 = vld [vmem:[#allocation2 + $0xe0] sm:$0xff] }
  0x53   : > { %9159 = vmatmul.mubr.msk.f32.gmra.mxu0 %vm204_vm1, %v10393_v45  ;;  %303 = vst.msk [vmem:[#allocation2 + $0x18e] sm:$0x20] %vm288_vm5, %v10497_v2  ;;  %14141 = vst [vmem:[#allocation39_spill] sm:$0xff] %v10542_v37  ;;  %v10584_v2 = vld [vmem:[#allocation2 + $0xe2] sm:$0xff]  ;;  %v10588_v53 = vld [vmem:[#allocation2 + $0xf2] sm:$0xff] }
  0x54   : > { %9209 = vmatmul.mubr.msk.f32.gmra.mxu1 %vm204_vm1, %v10395_v46  ;;  %9161 = vmatprep.mubr.msk.f32.mxu0 %vm204_vm1, %v10397_v47  ;;  %253 = vst.msk [vmem:[#allocation2 + $0x196] sm:$0x4] %vm237_vm2, %v10518_v30  ;;  %14142 = vst [vmem:[#allocation40_spill] sm:$0xff] %v10562_v39  ;;  %v10590_v52 = vld [vmem:[#allocation2 + $0xf0] sm:$0xff]  ;;  %v10664_v13 = vld [vmem:[#allocation2 + $0x15a] sm:$0xff] }
  0x55   : > { %9211 = vmatprep.mubr.msk.f32.mxu1 %vm204_vm1, %v10357_v31  ;;  %287 = vst.msk [vmem:[#allocation2 + $0x198] sm:$0x2] %vm271_vm3, %v10518_v30  ;;  %14143 = vst [vmem:[#allocation41_spill] sm:$0xff] %v10566_v42  ;;  %v10652_v15 = vld [vmem:[#allocation2 + $0x152] sm:$0xff]  ;;  %v10668_v11 = vld [vmem:[#allocation2 + $0x16a] sm:$0xff] }
  0x56   : > { %236 = vst.msk [vmem:[#allocation2 + $0x1a2] sm:$0xff] %vm204_vm1, %v10538_v35  ;;  %14145 = vst [vmem:[#allocation43_spill] sm:$0xff] %v10586_v1  ;;  %v10654_v14 = vld [vmem:[#allocation2 + $0x150] sm:$0xff]  ;;  %v10666_v12 = vld [vmem:[#allocation2 + $0x158] sm:$0xff] }
  0x57   : > { %9162 = vmatmul.mubr.msk.f32.gmra.mxu0 %vm204_vm1, %v10407_v48  ;;  %270 = vst.msk [vmem:[#allocation2 + $0x1a4] sm:$0x40] %vm254_vm4, %v10538_v35  ;;  %14146 = vst [vmem:[#allocation44_spill] sm:$0xff] %v10590_v52  ;;  %v10670_v10 = vld [vmem:[#allocation2 + $0x168] sm:$0xff]  ;;  %v10680_v5 = vld [vmem:[#allocation2 + $0x172] sm:$0xff] }
  0x58   : > { %9212 = vmatmul.mubr.msk.f32.gmra.mxu1 %vm204_vm1, %v10359_v32  ;;  %9164 = vmatprep.mubr.msk.f32.mxu0 %vm204_vm1, %v10415_v51  ;;  %304 = vst.msk [vmem:[#allocation2 + $0x1a6] sm:$0x20] %vm288_vm5, %v10538_v35  ;;  %v10568_v35 = vld [vmem:[#allocation2 + $0x180] sm:$0xff]  ;;  %v10570_v30 = vld [vmem:[#allocation2 + $0x188] sm:$0xff]  ;;  %14147 = vst [vmem:[#allocation45_spill] sm:$0xff] %v10602_v49 }
  0x59   : > { %9214 = vmatprep.mubr.msk.f32.mxu1 %vm204_vm1, %v10330_v28  ;;  %14144 = vst [vmem:[#allocation42_spill] sm:$0xff] %v10568_v35  ;;  %318 = vst.msk [vmem:[#allocation2 + $0x1b0] sm:$0xff] %vm204_vm1, %v10568_v35  ;;  %v10682_v4 = vld [vmem:[#allocation2 + $0x170] sm:$0xff]  ;;  %v1053_v7 = vld [vmem:[#allocation2 + $0x4] sm:$0xff] }
  0x5a   : > { %319 = vst.msk [vmem:[#allocation2 + $0x1b8] sm:$0xff] %vm204_vm1, %v10570_v30  ;;  %14148 = vst [vmem:[#allocation46_spill] sm:$0xff] %v10606_v26  ;;  %v1054_v6 = vld [vmem:[#allocation2 + $0xc] sm:$0xff]  ;;  %v1055_v9 = vld [vmem:[#allocation2 + $0x1c] sm:$0xff] }
  0x5b   : > { %9165 = vmatmul.mubr.msk.f32.gmra.mxu0 %vm204_vm1, %v10455_v54  ;;  %14149 = vst [vmem:[#allocation47_spill] sm:$0xff] %v10618_v24  ;;  %14150 = vst [vmem:[#allocation48_spill] sm:$0xff] %v10622_v22 }
  0x5c   : > { %9215 = vmatmul.mubr.msk.f32.gmra.mxu1 %vm204_vm1, %v10332_v29  ;;  %9167 = vmatprep.mubr.msk.f32.mxu0 %vm204_vm1, %v10457_v55  ;;  %14151 = vst [vmem:[#allocation49_spill] sm:$0xff] %v10634_v20  ;;  %14152 = vst [vmem:[#allocation50_spill] sm:$0xff] %v10638_v18 }
  0x5d   : > { %9217 = vmatprep.mubr.msk.f32.mxu1 %vm204_vm1, %v10459_v56  ;;  %14153 = vst [vmem:[#allocation51_spill] sm:$0xff] %v10650_v16  ;;  %14154 = vst [vmem:[#allocation52_spill] sm:$0xff] %v10654_v14 }
  0x5e   : > { %14155 = vst [vmem:[#allocation53_spill] sm:$0xff] %v10666_v12  ;;  %14156 = vst [vmem:[#allocation54_spill] sm:$0xff] %v10670_v10 }
  0x5f   : > { %9168 = vmatmul.mubr.msk.f32.gmra.mxu0 %vm204_vm1, %v10469_v57  ;;  %14157 = vst [vmem:[#allocation55_spill] sm:$0xff] %v10680_v5 }
  0x60   : > { %9218 = vmatmul.mubr.msk.f32.gmra.mxu1 %vm204_vm1, %v10471_v58  ;;  %9170 = vmatprep.mubr.msk.f32.mxu0 %vm204_vm1, %v10473_v59 }
  0x61   : > { %9220 = vmatprep.mubr.msk.f32.mxu1 %vm204_vm1, %v10475_v60 }
  0x63   : > { %9171 = vmatmul.mubr.msk.f32.gmra.mxu0 %vm204_vm1, %v10485_v61 }
  0x64   : > { %9221 = vmatmul.mubr.msk.f32.gmra.mxu1 %vm204_vm1, %v10487_v62  ;;  %9173 = vmatprep.mubr.msk.f32.mxu0 %vm204_vm1, %v10489_v63 }
  0x65   : > { %9223 = vmatprep.mubr.msk.f32.mxu1 %vm204_vm1, %v10491_v0 }
  0x67   : > { %9174 = vmatmul.mubr.msk.f32.gmra.mxu0 %vm204_vm1, %v10503_v3 }
  0x68   : > { %9224 = vmatmul.mubr.msk.f32.gmra.mxu1 %vm204_vm1, %v10524_v33  ;;  %9176 = vmatprep.mubr.msk.f32.mxu0 %vm204_vm1, %v10540_v36 }
  0x69   : > { %9226 = vmatprep.mubr.msk.f32.mxu1 %vm204_vm1, %v10542_v37 }
  0x6b   : > { %9177 = vmatmul.mubr.msk.f32.gmra.mxu0 %vm204_vm1, %v10560_v38 }
  0x6c   : > { %9227 = vmatmul.mubr.msk.f32.gmra.mxu1 %vm204_vm1, %v10562_v39  ;;  %9179 = vmatprep.mubr.msk.f32.mxu0 %vm204_vm1, %v10564_v41 }
  0x6d   : > { %9229 = vmatprep.mubr.msk.f32.mxu1 %vm204_vm1, %v10566_v42 }
  0x6f   : > { %9180 = vmatmul.mubr.msk.f32.gmra.mxu0 %vm204_vm1, %v10584_v2 }
  0x70   : > { %9230 = vmatmul.mubr.msk.f32.gmra.mxu1 %vm204_vm1, %v10586_v1  ;;  %9182 = vmatprep.mubr.msk.f32.mxu0 %vm204_vm1, %v10588_v53 }
  0x71   : > { %9232 = vmatprep.mubr.msk.f32.mxu1 %vm204_vm1, %v10590_v52 }
  0x73   : > { %9183 = vmatmul.mubr.msk.f32.gmra.mxu0 %vm204_vm1, %v10600_v50 }
  0x74   : > { %9233 = vmatmul.mubr.msk.f32.gmra.mxu1 %vm204_vm1, %v10602_v49  ;;  %9185 = vmatprep.mubr.msk.f32.mxu0 %vm204_vm1, %v10604_v27 }
  0x75   : > { %9235 = vmatprep.mubr.msk.f32.mxu1 %vm204_vm1, %v10606_v26 }
  0x77   : > { %9186 = vmatmul.mubr.msk.f32.gmra.mxu0 %vm204_vm1, %v10616_v25 }
  0x78   : > { %9236 = vmatmul.mubr.msk.f32.gmra.mxu1 %vm204_vm1, %v10618_v24  ;;  %9188 = vmatprep.mubr.msk.f32.mxu0 %vm204_vm1, %v10620_v23 }
  0x79   : > { %9238 = vmatprep.mubr.msk.f32.mxu1 %vm204_vm1, %v10622_v22 }
  0x7b   : > { %9189 = vmatmul.mubr.msk.f32.gmra.mxu0 %vm204_vm1, %v10632_v21 }
  0x7c   : > { %9239 = vmatmul.mubr.msk.f32.gmra.mxu1 %vm204_vm1, %v10634_v20  ;;  %9191 = vmatprep.mubr.msk.f32.mxu0 %vm204_vm1, %v10636_v19 }
  0x7d   : > { %9241 = vmatprep.mubr.msk.f32.mxu1 %vm204_vm1, %v10638_v18 }
  0x7f   : > { %9192 = vmatmul.mubr.msk.f32.gmra.mxu0 %vm204_vm1, %v10648_v17 }
  0x80   : > { %9242 = vmatmul.mubr.msk.f32.gmra.mxu1 %vm204_vm1, %v10650_v16  ;;  %9194 = vmatprep.mubr.msk.f32.mxu0 %vm204_vm1, %v10652_v15 }
  0x81   : > { %9244 = vmatprep.mubr.msk.f32.mxu1 %vm204_vm1, %v10654_v14 }
  0x83   : > { %9195 = vmatmul.mubr.msk.f32.gmra.mxu0 %vm204_vm1, %v10664_v13 }
  0x84   : > { %9245 = vmatmul.mubr.msk.f32.gmra.mxu1 %vm204_vm1, %v10666_v12  ;;  %9197 = vmatprep.mubr.msk.f32.mxu0 %vm204_vm1, %v10668_v11 }
  0x85   : > { %9247 = vmatprep.mubr.msk.f32.mxu1 %vm204_vm1, %v10670_v10 }
  0x87   : > { %9198 = vmatmul.mubr.msk.f32.gmra.mxu0 %vm204_vm1, %v10680_v5  ;;  %v10702_v5 = vld [vmem:[%s14017_s1 + $0x1c] sm:$0xf] }
  0x88   : > { %9248 = vmatmul.mubr.msk.f32.gmra.mxu1 %vm204_vm1, %v10682_v4  ;;  %9252 = vmatprep.mubr.msk.f32.mxu0 %vm204_vm1, %v1053_v7  ;;  %v1056_v7 = vld [vmem:[#allocation2 + $0x24] sm:$0xff] }
  0x89   : > { %9302 = vmatprep.mubr.msk.f32.mxu1 %vm204_vm1, %v10381_v44  ;;  %v10758_v44 = vld [vmem:[#allocation2 + $0x84] sm:$0xff] }
  0x8b   : > { %9253 = vmatmul.mubr.msk.f32.vlgmr.msra.gmra.mxu0 %vm204_vm1, %v1054_v6  ;;  %v10709_v6 = vld [vmem:[#allocation2 + $0x34] sm:$0xff] }
  0x8c   : > { %9303 = vmatmul.mubr.msk.f32.vlgmr.msra.gmra.mxu1 %vm204_vm1, %v10395_v46  ;;  %9351 = vmatpush3.msk.msra.mxu0 %vm500_vm0, %v10373_v40  ;;  %v10738_v40 = vld [vmem:[#allocation2 + $0x64] sm:$0xff]  ;;  %v10762_v46 = vld [vmem:[#allocation2 + $0x94] sm:$0xff] }
  0x8d   : > { %9255 = vmatprep.mubr.msk.f32.mxu0 %vm204_vm1, %v1055_v9  ;;  %9305 = vmatprep.mubr.msk.f32.mxu1 %vm204_vm1, %v10357_v31  ;;  %v10722_v9 = vld [vmem:[#allocation2 + $0x3c] sm:$0xff]  ;;  %v10726_v31 = vld [vmem:[#allocation2 + $0x4c] sm:$0xff] }
  0x8e   : > { %9401 = vmatpush3.msk.msra.mxu1 %vm500_vm0, %v10535_v34  ;;  %9450 = vmatprep.subr.msk.mxu0 %vm500_vm0, %v10697_v8  ;;  %v10770_v34 = vld [vmem:[#allocation2 + $0x9c] sm:$0xff] }
  0x8f   : > { %9500 = vmatprep.subr.msk.mxu1 %vm500_vm0, %v10702_v5  ;;  %9256 = vmatmul.mubr.msk.f32.gmra.mxu0 %vm204_vm1, %v1056_v7  ;;  %v10774_v7 = vld [vmem:[#allocation2 + $0xac] sm:$0xff] }
  0x90   : > { %9306 = vmatmul.mubr.msk.f32.gmra.mxu1 %vm204_vm1, %v10359_v32  ;;  %9258 = vmatprep.mubr.msk.f32.mxu0 %vm204_vm1, %v10709_v6  ;;  %v10734_v32 = vld [vmem:[#allocation2 + $0x54] sm:$0xff] }
  0x91   : > { %9308 = vmatprep.mubr.msk.f32.mxu1 %vm204_vm1, %v10330_v28  ;;  %v10746_v28 = vld [vmem:[#allocation2 + $0x6c] sm:$0xff] }
  0x93   : > { %9259 = vmatmul.mubr.msk.f32.gmra.mxu0 %vm204_vm1, %v10722_v9 }
  0x94   : > { %9309 = vmatmul.mubr.msk.f32.gmra.mxu1 %vm204_vm1, %v10332_v29  ;;  %9261 = vmatprep.mubr.msk.f32.mxu0 %vm204_vm1, %v10726_v31  ;;  %v10750_v29 = vld [vmem:[#allocation2 + $0x7c] sm:$0xff] }
  0x95   : > { %9311 = vmatprep.mubr.msk.f32.mxu1 %vm204_vm1, %v10459_v56 }
  0x97   : > { %9262 = vmatmul.mubr.msk.f32.gmra.mxu0 %vm204_vm1, %v10734_v32 }
  0x98   : > { %9312 = vmatmul.mubr.msk.f32.gmra.mxu1 %vm204_vm1, %v10471_v58  ;;  %9264 = vmatprep.mubr.msk.f32.mxu0 %vm204_vm1, %v10738_v40 }
  0x99   : > { %9314 = vmatprep.mubr.msk.f32.mxu1 %vm204_vm1, %v10475_v60  ;;  %v331_v60 = vld [vmem:[#allocation2 + $0x170] sm:$0xff] }
  0x9a   : > { %335 = vst.msk [vmem:[#allocation2 + $0x1d0] sm:$0xff] %vm204_vm1, %v331_v60  ;;  %v10884_v60 = vld [vmem:[#allocation2 + $0x174] sm:$0xff] }
  0x9b   : > { %9265 = vmatmul.mubr.msk.f32.gmra.mxu0 %vm204_vm1, %v10746_v28 }
  0x9c   : > { %9315 = vmatmul.mubr.msk.f32.gmra.mxu1 %vm204_vm1, %v10487_v62  ;;  %9267 = vmatprep.mubr.msk.f32.mxu0 %vm204_vm1, %v10750_v29  ;;  %v10858_v62 = vld [vmem:[#allocation2 + $0x154] sm:$0xff] }
  0x9d   : > { %9317 = vmatprep.mubr.msk.f32.mxu1 %vm204_vm1, %v10491_v0  ;;  %v10786_v0 = vld [vmem:[#allocation2 + $0xc4] sm:$0xff] }
  0x9f   : > { %9268 = vmatmul.mubr.msk.f32.gmra.mxu0 %vm204_vm1, %v10758_v44 }
  0xa0   : > { %9318 = vmatmul.mubr.msk.f32.gmra.mxu1 %vm204_vm1, %v10524_v33  ;;  %9270 = vmatprep.mubr.msk.f32.mxu0 %vm204_vm1, %v10762_v46  ;;  %v10782_v33 = vld [vmem:[#allocation2 + $0xb4] sm:$0xff] }
  0xa1   : > { %9320 = vmatprep.mubr.msk.f32.mxu1 %vm204_vm1, %v10542_v37  ;;  %v10798_v37 = vld [vmem:[#allocation2 + $0xdc] sm:$0xff] }
  0xa3   : > { %9271 = vmatmul.mubr.msk.f32.gmra.mxu0 %vm204_vm1, %v10770_v34 }
  0xa4   : > { %9321 = vmatmul.mubr.msk.f32.gmra.mxu1 %vm204_vm1, %v10562_v39  ;;  %9273 = vmatprep.mubr.msk.f32.mxu0 %vm204_vm1, %v10774_v7  ;;  %v10794_v39 = vld [vmem:[#allocation2 + $0xcc] sm:$0xff] }
  0xa5   : > { %9323 = vmatprep.mubr.msk.f32.mxu1 %vm204_vm1, %v10566_v42  ;;  %v10810_v42 = vld [vmem:[#allocation2 + $0xf4] sm:$0xff] }
  0xa7   : > { %9274 = vmatmul.mubr.msk.f32.gmra.mxu0 %vm204_vm1, %v10782_v33 }
  0xa8   : > { %9324 = vmatmul.mubr.msk.f32.gmra.mxu1 %vm204_vm1, %v10586_v1  ;;  %9276 = vmatprep.mubr.msk.f32.mxu0 %vm204_vm1, %v10786_v0  ;;  %v10806_v1 = vld [vmem:[#allocation2 + $0xe4] sm:$0xff] }
  0xa9   : > { %9326 = vmatprep.mubr.msk.f32.mxu1 %vm204_vm1, %v10590_v52  ;;  %v10822_v52 = vld [vmem:[#allocation2 + $0x10c] sm:$0xff] }
  0xab   : > { %9277 = vmatmul.mubr.msk.f32.gmra.mxu0 %vm204_vm1, %v10794_v39 }
  0xac   : > { %9327 = vmatmul.mubr.msk.f32.gmra.mxu1 %vm204_vm1, %v10602_v49  ;;  %9279 = vmatprep.mubr.msk.f32.mxu0 %vm204_vm1, %v10798_v37  ;;  %v10818_v49 = vld [vmem:[#allocation2 + $0xfc] sm:$0xff] }
  0xad   : > { %9329 = vmatprep.mubr.msk.f32.mxu1 %vm204_vm1, %v10606_v26  ;;  %v10834_v26 = vld [vmem:[#allocation2 + $0x124] sm:$0xff] }
  0xaf   : > { %9280 = vmatmul.mubr.msk.f32.gmra.mxu0 %vm204_vm1, %v10806_v1 }
  0xb0   : > { %9330 = vmatmul.mubr.msk.f32.gmra.mxu1 %vm204_vm1, %v10618_v24  ;;  %9282 = vmatprep.mubr.msk.f32.mxu0 %vm204_vm1, %v10810_v42  ;;  %v10830_v24 = vld [vmem:[#allocation2 + $0x114] sm:$0xff] }
  0xb1   : > { %9332 = vmatprep.mubr.msk.f32.mxu1 %vm204_vm1, %v10622_v22  ;;  %v10846_v22 = vld [vmem:[#allocation2 + $0x13c] sm:$0xff] }
  0xb3   : > { %9283 = vmatmul.mubr.msk.f32.gmra.mxu0 %vm204_vm1, %v10818_v49 }
  0xb4   : > { %9333 = vmatmul.mubr.msk.f32.gmra.mxu1 %vm204_vm1, %v10634_v20  ;;  %9285 = vmatprep.mubr.msk.f32.mxu0 %vm204_vm1, %v10822_v52  ;;  %v10842_v20 = vld [vmem:[#allocation2 + $0x12c] sm:$0xff] }
  0xb5   : > { %9335 = vmatprep.mubr.msk.f32.mxu1 %vm204_vm1, %v10638_v18  ;;  %v316_v18 = vld [vmem:[#allocation2 + $0x190] sm:$0xf] }
  0xb6   : > { %320 = vst.msk [vmem:[#allocation2 + $0x1c0] sm:$0xf] %vm311_vm6, %v316_v18  ;;  %v332_v18 = vld [vmem:[#allocation2 + $0x178] sm:$0xf] }
  0xb7   : > { %9286 = vmatmul.mubr.msk.f32.gmra.mxu0 %vm204_vm1, %v10830_v24  ;;  %336 = vst.msk [vmem:[#allocation2 + $0x1d8] sm:$0xf] %vm311_vm6, %v332_v18  ;;  %v10905_v18 = vld [vmem:[%s14017_s1 + $0x20] sm:$0xf] }
  0xb8   : > { %9336 = vmatmul.mubr.msk.f32.gmra.mxu1 %vm204_vm1, %v10650_v16  ;;  %9288 = vmatprep.mubr.msk.f32.mxu0 %vm204_vm1, %v10834_v26  ;;  %v10854_v16 = vld [vmem:[#allocation2 + $0x144] sm:$0xff] }
  0xb9   : > { %9338 = vmatprep.mubr.msk.f32.mxu1 %vm204_vm1, %v10654_v14  ;;  %v330_v14 = vld [vmem:[#allocation2 + $0x168] sm:$0xff] }
  0xba   : > { %334 = vst.msk [vmem:[#allocation2 + $0x1c8] sm:$0xff] %vm204_vm1, %v330_v14  ;;  %v10875_v14 = vld [vmem:[#allocation2 + $0x198] sm:$0xff] }
  0xbb   : > { %9289 = vmatmul.mubr.msk.f32.gmra.mxu0 %vm204_vm1, %v10842_v20 }
  0xbc   : > { %9339 = vmatmul.mubr.msk.f32.gmra.mxu1 %vm204_vm1, %v10666_v12  ;;  %9291 = vmatprep.mubr.msk.f32.mxu0 %vm204_vm1, %v10846_v22  ;;  %v10873_v12 = vld [vmem:[#allocation2 + $0x16c] sm:$0xff] }
  0xbd   : > { %9341 = vmatprep.mubr.msk.f32.mxu1 %vm204_vm1, %v10670_v10  ;;  %v10869_v10 = vld [vmem:[#allocation2 + $0x15c] sm:$0xff] }
  0xbf   : > { %9292 = vmatmul.mubr.msk.f32.gmra.mxu0 %vm204_vm1, %v10854_v16 }
  0xc0   : > { %9342 = vmatmul.mubr.msk.f32.gmra.mxu1 %vm204_vm1, %v10682_v4  ;;  %9294 = vmatprep.mubr.msk.f32.mxu0 %vm204_vm1, %v10858_v62 }
  0xc1   : > { %9344 = vmatprep.mubr.msk.f32.mxu1 %vm204_vm1, %v10568_v35  ;;  %v10888_v35 = vld [vmem:[#allocation2 + $0x1a0] sm:$0xff] }
  0xc3   : > { %9295 = vmatmul.mubr.msk.f32.gmra.mxu0 %vm204_vm1, %v10869_v10 }
  0xc4   : > { %9345 = vmatmul.mubr.msk.f32.gmra.mxu1 %vm204_vm1, %v10570_v30  ;;  %9297 = vmatprep.mubr.msk.f32.mxu0 %vm204_vm1, %v10873_v12 }
  0xc5   : > { %9347 = vmatprep.mubr.msk.f32.mxu1 %vm204_vm1, %v10875_v14 }
  0xc7   : > { %9298 = vmatmul.mubr.msk.f32.gmra.mxu0 %vm204_vm1, %v10884_v60 }
  0xc8   : > { %9348 = vmatmul.mubr.msk.f32.gmra.mxu1 %vm204_vm1, %v10888_v35  ;;  %9352 = vmatprep.mubr.msk.f32.mxu0 %vm204_vm1, %v10379_v43  ;;  %v2613_v43 = vld [vmem:[#allocation2 + $0x60] sm:$0xff] }
  0xc9   : > { %9402 = vmatprep.mubr.msk.f32.mxu1 %vm204_vm1, %v10709_v6 }
  0xcb   : > { %9353 = vmatmul.mubr.msk.f32.vlgmr.msra.gmra.mxu0 %vm204_vm1, %v10393_v45  ;;  %v2614_v45 = vld [vmem:[#allocation2 + $0x68] sm:$0xff] }
  0xcc   : > { %9403 = vmatmul.mubr.msk.f32.vlgmr.msra.gmra.mxu1 %vm204_vm1, %v10722_v9  ;;  %9451 = vmatpush3.msk.msra.mxu0 %vm500_vm0, %v10697_v8  ;;  %v11015_v8 = vld [vmem:[#allocation2 + $0x184] sm:$0xff] }
  0xcd   : > { %9355 = vmatprep.mubr.msk.f32.mxu0 %vm204_vm1, %v10397_v47  ;;  %9405 = vmatprep.mubr.msk.f32.mxu1 %vm204_vm1, %v10726_v31  ;;  %v14159_v31 = vld [vmem:[#allocation31_spill] sm:$0xff] }
  0xce   : > { %9501 = vmatpush3.msk.msra.mxu1 %vm500_vm0, %v10702_v5  ;;  %9550 = vmatprep.subr.msk.mxu0 %vm500_vm0, %v10905_v18  ;;  %v11013_v5 = vld [vmem:[#allocation2 + $0x182] sm:$0xff] }
  0xcf   : > { %9356 = vmatmul.mubr.msk.f32.gmra.mxu0 %vm204_vm1, %v10407_v48 }
  0xd0   : > { %9406 = vmatmul.mubr.msk.f32.gmra.mxu1 %vm204_vm1, %v10734_v32  ;;  %9358 = vmatprep.mubr.msk.f32.mxu0 %vm204_vm1, %v10415_v51 }
  0xd1   : > { %9408 = vmatprep.mubr.msk.f32.mxu1 %vm204_vm1, %v10738_v40 }
  0xd3   : > { %9359 = vmatmul.mubr.msk.f32.gmra.mxu0 %vm204_vm1, %v10455_v54 }
  0xd4   : > { %9409 = vmatmul.mubr.msk.f32.gmra.mxu1 %vm204_vm1, %v10746_v28  ;;  %9361 = vmatprep.mubr.msk.f32.mxu0 %vm204_vm1, %v10457_v55 }
  0xd5   : > { %9411 = vmatprep.mubr.msk.f32.mxu1 %vm204_vm1, %v10750_v29 }
  0xd7   : > { %9362 = vmatmul.mubr.msk.f32.gmra.mxu0 %vm204_vm1, %v10469_v57 }
  0xd8   : > { %9412 = vmatmul.mubr.msk.f32.gmra.mxu1 %vm204_vm1, %v10758_v44  ;;  %9364 = vmatprep.mubr.msk.f32.mxu0 %vm204_vm1, %v10473_v59 }
  0xd9   : > { %9414 = vmatprep.mubr.msk.f32.mxu1 %vm204_vm1, %v10762_v46 }
  0xdb   : > { %9365 = vmatmul.mubr.msk.f32.gmra.mxu0 %vm204_vm1, %v10485_v61 }
  0xdc   : > { %9415 = vmatmul.mubr.msk.f32.gmra.mxu1 %vm204_vm1, %v10770_v34  ;;  %9367 = vmatprep.mubr.msk.f32.mxu0 %vm204_vm1, %v10489_v63 }
  0xdd   : > { %9417 = vmatprep.mubr.msk.f32.mxu1 %vm204_vm1, %v10774_v7 }
  0xdf   : > { %9368 = vmatmul.mubr.msk.f32.gmra.mxu0 %vm204_vm1, %v10503_v3 }
  0xe0   : > { %9418 = vmatmul.mubr.msk.f32.gmra.mxu1 %vm204_vm1, %v10782_v33  ;;  %9370 = vmatprep.mubr.msk.f32.mxu0 %vm204_vm1, %v10540_v36 }
  0xe1   : > { %9420 = vmatprep.mubr.msk.f32.mxu1 %vm204_vm1, %v10786_v0 }
  0xe3   : > { %9371 = vmatmul.mubr.msk.f32.gmra.mxu0 %vm204_vm1, %v10560_v38 }
  0xe4   : > { %9421 = vmatmul.mubr.msk.f32.gmra.mxu1 %vm204_vm1, %v10794_v39  ;;  %9373 = vmatprep.mubr.msk.f32.mxu0 %vm204_vm1, %v10564_v41 }
  0xe5   : > { %9423 = vmatprep.mubr.msk.f32.mxu1 %vm204_vm1, %v10798_v37 }
  0xe7   : > { %9374 = vmatmul.mubr.msk.f32.gmra.mxu0 %vm204_vm1, %v10584_v2 }
  0xe8   : > { %9424 = vmatmul.mubr.msk.f32.gmra.mxu1 %vm204_vm1, %v10806_v1  ;;  %9376 = vmatprep.mubr.msk.f32.mxu0 %vm204_vm1, %v10588_v53 }
  0xe9   : > { %9426 = vmatprep.mubr.msk.f32.mxu1 %vm204_vm1, %v10810_v42 }
  0xeb   : > { %9377 = vmatmul.mubr.msk.f32.gmra.mxu0 %vm204_vm1, %v10600_v50 }
  0xec   : > { %9427 = vmatmul.mubr.msk.f32.gmra.mxu1 %vm204_vm1, %v10818_v49  ;;  %9379 = vmatprep.mubr.msk.f32.mxu0 %vm204_vm1, %v10604_v27 }
  0xed   : > { %9429 = vmatprep.mubr.msk.f32.mxu1 %vm204_vm1, %v10822_v52 }
  0xef   : > { %9380 = vmatmul.mubr.msk.f32.gmra.mxu0 %vm204_vm1, %v10616_v25 }
  0xf0   : > { %9430 = vmatmul.mubr.msk.f32.gmra.mxu1 %vm204_vm1, %v10830_v24  ;;  %9382 = vmatprep.mubr.msk.f32.mxu0 %vm204_vm1, %v10620_v23  ;;  %v11039_v24 = vld [vmem:[#allocation2 + $0x1a2] sm:$0xff] }
  0xf1   : > { %9432 = vmatprep.mubr.msk.f32.mxu1 %vm204_vm1, %v10834_v26  ;;  %v11043_v26 = vld [vmem:[#allocation2 + $0x1a4] sm:$0xff] }
  0xf3   : > { %9383 = vmatmul.mubr.msk.f32.gmra.mxu0 %vm204_vm1, %v10632_v21 }
  0xf4   : > { %9433 = vmatmul.mubr.msk.f32.gmra.mxu1 %vm204_vm1, %v10842_v20  ;;  %9385 = vmatprep.mubr.msk.f32.mxu0 %vm204_vm1, %v10636_v19  ;;  %v11027_v20 = vld [vmem:[#allocation2 + $0x18c] sm:$0xff] }
  0xf5   : > { %9435 = vmatprep.mubr.msk.f32.mxu1 %vm204_vm1, %v10846_v22  ;;  %v11031_v22 = vld [vmem:[#allocation2 + $0x19c] sm:$0xff] }
  0xf7   : > { %9386 = vmatmul.mubr.msk.f32.gmra.mxu0 %vm204_vm1, %v10648_v17 }
  0xf8   : > { %9436 = vmatmul.mubr.msk.f32.gmra.mxu1 %vm204_vm1, %v10854_v16  ;;  %9388 = vmatprep.mubr.msk.f32.mxu0 %vm204_vm1, %v10652_v15  ;;  %v14158_v16 = vld [vmem:[#allocation55_spill] sm:$0xff] }
  0xf9   : > { %9438 = vmatprep.mubr.msk.f32.mxu1 %vm204_vm1, %v10858_v62 }
  0xfb   : > { %9389 = vmatmul.mubr.msk.f32.gmra.mxu0 %vm204_vm1, %v10664_v13 }
  0xfc   : > { %9439 = vmatmul.mubr.msk.f32.gmra.mxu1 %vm204_vm1, %v10869_v10  ;;  %9391 = vmatprep.mubr.msk.f32.mxu0 %vm204_vm1, %v10668_v11  ;;  %v11023_v10 = vld [vmem:[#allocation2 + $0x18a] sm:$0xff] }
  0xfd   : > { %9441 = vmatprep.mubr.msk.f32.mxu1 %vm204_vm1, %v10873_v12  ;;  %v11029_v12 = vld [vmem:[#allocation2 + $0x19a] sm:$0xff] }
  0xff   : > { %9392 = vmatmul.mubr.msk.f32.gmra.mxu0 %vm204_vm1, %v14158_v16 }
 0x100   : > { %9442 = vmatmul.mubr.msk.f32.gmra.mxu1 %vm204_vm1, %v10884_v60  ;;  %9394 = vmatprep.mubr.msk.f32.mxu0 %vm204_vm1, %v11013_v5 }
 0x101   : > { %9444 = vmatprep.mubr.msk.f32.mxu1 %vm204_vm1, %v11015_v8 }
 0x103   : > { %9395 = vmatmul.mubr.msk.f32.gmra.mxu0 %vm204_vm1, %v11023_v10 }
 0x104   : > { %9445 = vmatmul.mubr.msk.f32.gmra.mxu1 %vm204_vm1, %v11027_v20  ;;  %9397 = vmatprep.mubr.msk.f32.mxu0 %vm204_vm1, %v11029_v12 }
 0x105   : > { %9447 = vmatprep.mubr.msk.f32.mxu1 %vm204_vm1, %v11031_v22 }
 0x107   : > { %9398 = vmatmul.mubr.msk.f32.gmra.mxu0 %vm204_vm1, %v11039_v24 }
 0x108   : > { %9448 = vmatmul.mubr.msk.f32.gmra.mxu1 %vm204_vm1, %v11043_v26  ;;  %9452 = vmatprep.mubr.msk.f32.mxu0 %vm204_vm1, %v2613_v43  ;;  %v14160_v43 = vld [vmem:[#allocation32_spill] sm:$0xff] }
 0x109   : > { %9502 = vmatprep.mubr.msk.f32.mxu1 %vm204_vm1, %v10415_v51 }
 0x10b   : > { %v9154_v47 = vpop.f32.mrf.mxu0  ;;  %9453 = vmatmul.mubr.msk.f32.vlgmr.msra.gmra.mxu0 %vm204_vm1, %v2614_v45 }
 0x10c   : > { %v9204_v48 = vpop.f32.mrf.mxu1  ;;  %9503 = vmatmul.mubr.msk.f32.vlgmr.msra.gmra.mxu1 %vm204_vm1, %v10455_v54  ;;  %9551 = vmatpush3.msk.msra.mxu0 %vm500_vm0, %v10905_v18 }
 0x10d   : > { %v11055_v49 = vadd.f32 %v9204_v48, %v9154_v47  ;;  %9455 = vmatprep.mubr.msk.f32.mxu0 %vm204_vm1, %v10459_v56  ;;  %v570_v52 = vpop.f32.mrf.mxu0  ;;  %9505 = vmatprep.mubr.msk.f32.mxu1 %vm204_vm1, %v10457_v55 }
 0x10e   : > { %v894_v62 = vpop.f32.mrf.mxu1 }
 0x10f   : > { %v11063_v51 = vadd.f32 %v894_v62, %v570_v52  ;;  %v9157_v6 = vpop.f32.mrf.mxu0  ;;  %9456 = vmatmul.mubr.msk.f32.gmra.mxu0 %vm204_vm1, %v10471_v58  ;;  %v14161_v58 = vld [vmem:[#allocation33_spill] sm:$0xff] }
 0x110   : > { %v9207_v9 = vpop.f32.mrf.mxu1  ;;  %9506 = vmatmul.mubr.msk.f32.gmra.mxu1 %vm204_vm1, %v10469_v57  ;;  %9458 = vmatprep.mubr.msk.f32.mxu0 %vm204_vm1, %v14159_v31  ;;  %v14162_v62 = vld [vmem:[#allocation37_spill] sm:$0xff] }
 0x111   : > { %v11069_v54 = vadd.f32 %v9207_v9, %v9157_v6  ;;  %9508 = vmatprep.mubr.msk.f32.mxu1 %vm204_vm1, %v10473_v59  ;;  %v580_v56 = vpop.f32.mrf.mxu0  ;;  %v14163_v6 = vld [vmem:[#allocation39_spill] sm:$0xff] }
 0x112   : > { %v904_v55 = vpop.f32.mrf.mxu1 }
 0x113   : > { %v11075_v32 = vadd.f32 %v904_v55, %v580_v56  ;;  %v9160_v60 = vpop.f32.mrf.mxu0  ;;  %9459 = vmatmul.mubr.msk.f32.gmra.mxu0 %vm204_vm1, %v14160_v43 }
 0x114   : > { %v9210_v18 = vpop.f32.mrf.mxu1  ;;  %9509 = vmatmul.mubr.msk.f32.gmra.mxu1 %vm204_vm1, %v10485_v61  ;;  %9461 = vmatprep.mubr.msk.f32.mxu0 %vm204_vm1, %v14161_v58 }
 0x115   : > { %v11081_v57 = vadd.f32 %v9210_v18, %v9160_v60  ;;  %9511 = vmatprep.mubr.msk.f32.mxu1 %vm204_vm1, %v10489_v63  ;;  %v590_v59 = vpop.f32.mrf.mxu0  ;;  %v14164_v60 = vld [vmem:[#allocation40_spill] sm:$0xff]  ;;  %v14165_v18 = vld [vmem:[#allocation41_spill] sm:$0xff] }
 0x116   : > { %v914_v45 = vpop.f32.mrf.mxu1 }
 0x117   : > { %v11087_v47 = vadd.f32 %v914_v45, %v590_v59  ;;  %v9163_v48 = vpop.f32.mrf.mxu0  ;;  %9462 = vmatmul.mubr.msk.f32.gmra.mxu0 %vm204_vm1, %v14162_v62 }
 0x118   : > { %v9213_v52 = vpop.f32.mrf.mxu1  ;;  %9512 = vmatmul.mubr.msk.f32.gmra.mxu1 %vm204_vm1, %v10503_v3  ;;  %9464 = vmatprep.mubr.msk.f32.mxu0 %vm204_vm1, %v14163_v6 }
 0x119   : > { %v11093_v61 = vadd.f32 %v9213_v52, %v9163_v48  ;;  %9514 = vmatprep.mubr.msk.f32.mxu1 %vm204_vm1, %v10540_v36  ;;  %v600_v63 = vpop.f32.mrf.mxu0  ;;  %v14166_v48 = vld [vmem:[#allocation43_spill] sm:$0xff]  ;;  %v14167_v52 = vld [vmem:[#allocation44_spill] sm:$0xff] }
 0x11a   : > { %v924_v9 = vpop.f32.mrf.mxu1 }
 0x11b   : > { %v11099_v31 = vadd.f32 %v924_v9, %v600_v63  ;;  %v9166_v56 = vpop.f32.mrf.mxu0  ;;  %9465 = vmatmul.mubr.msk.f32.gmra.mxu0 %vm204_vm1, %v14164_v60 }
 0x11c   : > { %v9216_v55 = vpop.f32.mrf.mxu1  ;;  %9515 = vmatmul.mubr.msk.f32.gmra.mxu1 %vm204_vm1, %v10560_v38  ;;  %9467 = vmatprep.mubr.msk.f32.mxu0 %vm204_vm1, %v14165_v18 }
 0x11d   : > { %v11105_v3 = vadd.f32 %v9216_v55, %v9166_v56  ;;  %9517 = vmatprep.mubr.msk.f32.mxu1 %vm204_vm1, %v10564_v41  ;;  %v610_v36 = vpop.f32.mrf.mxu0  ;;  %v14168_v56 = vld [vmem:[#allocation45_spill] sm:$0xff]  ;;  %v14169_v55 = vld [vmem:[#allocation46_spill] sm:$0xff] }
 0x11e   : > { %v934_v43 = vpop.f32.mrf.mxu1 }
 0x11f   : > { %v11111_v58 = vadd.f32 %v934_v43, %v610_v36  ;;  %v9169_v59 = vpop.f32.mrf.mxu0  ;;  %9468 = vmatmul.mubr.msk.f32.gmra.mxu0 %vm204_vm1, %v14166_v48 }
 0x120   : > { %v9219_v45 = vpop.f32.mrf.mxu1  ;;  %9518 = vmatmul.mubr.msk.f32.gmra.mxu1 %vm204_vm1, %v10584_v2  ;;  %9470 = vmatprep.mubr.msk.f32.mxu0 %vm204_vm1, %v14167_v52 }
 0x121   : > { %v11117_v38 = vadd.f32 %v9219_v45, %v9169_v59  ;;  %9520 = vmatprep.mubr.msk.f32.mxu1 %vm204_vm1, %v10588_v53  ;;  %v620_v41 = vpop.f32.mrf.mxu0  ;;  %v14170_v59 = vld [vmem:[#allocation47_spill] sm:$0xff]  ;;  %v14171_v45 = vld [vmem:[#allocation48_spill] sm:$0xff] }
 0x122   : > { %v944_v62 = vpop.f32.mrf.mxu1 }
 0x123   : > { %v11123_v6 = vadd.f32 %v944_v62, %v620_v41  ;;  %v9172_v63 = vpop.f32.mrf.mxu0  ;;  %9471 = vmatmul.mubr.msk.f32.gmra.mxu0 %vm204_vm1, %v14168_v56 }
 0x124   : > { %v9222_v9 = vpop.f32.mrf.mxu1  ;;  %9521 = vmatmul.mubr.msk.f32.gmra.mxu1 %vm204_vm1, %v10600_v50  ;;  %9473 = vmatprep.mubr.msk.f32.mxu0 %vm204_vm1, %v14169_v55 }
 0x125   : > { %v11129_v2 = vadd.f32 %v9222_v9, %v9172_v63  ;;  %9523 = vmatprep.mubr.msk.f32.mxu1 %vm204_vm1, %v10604_v27  ;;  %v630_v53 = vpop.f32.mrf.mxu0  ;;  %v14172_v63 = vld [vmem:[#allocation49_spill] sm:$0xff]  ;;  %v14173_v9 = vld [vmem:[#allocation50_spill] sm:$0xff] }
 0x126   : > { %v954_v60 = vpop.f32.mrf.mxu1 }
 0x127   : > { %v11135_v18 = vadd.f32 %v954_v60, %v630_v53  ;;  %v9175_v36 = vpop.f32.mrf.mxu0  ;;  %9474 = vmatmul.mubr.msk.f32.gmra.mxu0 %vm204_vm1, %v14170_v59  ;;  %v14174_v60 = vld [vmem:[#allocation51_spill] sm:$0xff] }
 0x128   : > { %v9225_v43 = vpop.f32.mrf.mxu1  ;;  %9524 = vmatmul.mubr.msk.f32.gmra.mxu1 %vm204_vm1, %v10616_v25  ;;  %9476 = vmatprep.mubr.msk.f32.mxu0 %vm204_vm1, %v14171_v45 }
 0x129   : > { %v11141_v50 = vadd.f32 %v9225_v43, %v9175_v36  ;;  %9526 = vmatprep.mubr.msk.f32.mxu1 %vm204_vm1, %v10620_v23  ;;  %v640_v27 = vpop.f32.mrf.mxu0  ;;  %v14175_v36 = vld [vmem:[#allocation52_spill] sm:$0xff] }
 0x12a   : > { %v964_v48 = vpop.f32.mrf.mxu1 }
 0x12b   : > { %v11147_v52 = vadd.f32 %v964_v48, %v640_v27  ;;  %v9178_v41 = vpop.f32.mrf.mxu0  ;;  %9477 = vmatmul.mubr.msk.f32.gmra.mxu0 %vm204_vm1, %v14172_v63  ;;  %v14178_v27 = vld [vmem:[#allocation53_spill] sm:$0xff]  ;;  %v14179_v48 = vld [vmem:[#allocation54_spill] sm:$0xff] }
 0x12c   : > { %v9228_v62 = vpop.f32.mrf.mxu1  ;;  %9527 = vmatmul.mubr.msk.f32.gmra.mxu1 %vm204_vm1, %v10632_v21  ;;  %9479 = vmatprep.mubr.msk.f32.mxu0 %vm204_vm1, %v14173_v9  ;;  %v14182_v9 = vld [vmem:[#allocation42_spill] sm:$0xff] }
 0x12d   : > { %v11153_v25 = vadd.f32 %v9228_v62, %v9178_v41  ;;  %9529 = vmatprep.mubr.msk.f32.mxu1 %vm204_vm1, %v10636_v19  ;;  %v11159_v23 = vpop.f32.mrf.mxu0 }
 0x12e   : > { %v11161_v56 = vpop.f32.mrf.mxu1 }
 0x12f   : > { %v9181_v55 = vpop.f32.mrf.mxu0  ;;  %9480 = vmatmul.mubr.msk.f32.gmra.mxu0 %vm204_vm1, %v14174_v60 }
 0x130   : > { %v9231_v53 = vpop.f32.mrf.mxu1  ;;  %9530 = vmatmul.mubr.msk.f32.gmra.mxu1 %vm204_vm1, %v10648_v17  ;;  %9482 = vmatprep.mubr.msk.f32.mxu0 %vm204_vm1, %v14175_v36  ;;  %v2641_v36 = vld [vmem:[#allocation2 + $0x1b0] sm:$0xff] }
 0x131   : > { %v11167_v21 = vadd.f32 %v9231_v53, %v9181_v55  ;;  %9532 = vmatprep.mubr.msk.f32.mxu1 %vm204_vm1, %v10652_v15  ;;  %v11173_v19 = vpop.f32.mrf.mxu0 }
 0x132   : > { %14176 = vst [vmem:[#allocation55_spill] sm:$0xff] %v11173_v19  ;;  %v11175_v43 = vpop.f32.mrf.mxu1 }
 0x133   : > { %14177 = vst [vmem:[#allocation31_spill] sm:$0xff] %v11175_v43  ;;  %v9184_v59 = vpop.f32.mrf.mxu0  ;;  %9483 = vmatmul.mubr.msk.f32.gmra.mxu0 %vm204_vm1, %v14178_v27 }
 0x134   : > { %v9234_v45 = vpop.f32.mrf.mxu1  ;;  %9533 = vmatmul.mubr.msk.f32.gmra.mxu1 %vm204_vm1, %v10664_v13  ;;  %9485 = vmatprep.mubr.msk.f32.mxu0 %vm204_vm1, %v14179_v48 }
 0x135   : > { %v11181_v17 = vadd.f32 %v9234_v45, %v9184_v59  ;;  %9535 = vmatprep.mubr.msk.f32.mxu1 %vm204_vm1, %v10668_v11  ;;  %v11187_v15 = vpop.f32.mrf.mxu0  ;;  %v3031_v59 = vld [vmem:[#allocation2 + $0x1b2] sm:$0xff] }
 0x136   : > { %14180 = vst [vmem:[#allocation32_spill] sm:$0xff] %v11187_v15  ;;  %v11189_v41 = vpop.f32.mrf.mxu1 }
 0x137   : > { %14181 = vst [vmem:[#allocation33_spill] sm:$0xff] %v11189_v41  ;;  %v9187_v62 = vpop.f32.mrf.mxu0  ;;  %9486 = vmatmul.mubr.msk.f32.gmra.mxu0 %vm204_vm1, %v10682_v4 }
 0x138   : > { %v9237_v63 = vpop.f32.mrf.mxu1  ;;  %9536 = vmatmul.mubr.msk.f32.gmra.mxu1 %vm204_vm1, %v14158_v16  ;;  %9488 = vmatprep.mubr.msk.f32.mxu0 %vm204_vm1, %v14182_v9 }
 0x139   : > { %v11195_v13 = vadd.f32 %v9237_v63, %v9187_v62  ;;  %9538 = vmatprep.mubr.msk.f32.mxu1 %vm204_vm1, %v11013_v5  ;;  %v11201_v11 = vpop.f32.mrf.mxu0  ;;  %v2643_v62 = vld [vmem:[#allocation2 + $0x1c8] sm:$0xff] }
 0x13a   : > { %14183 = vst [vmem:[#allocation37_spill] sm:$0xff] %v11201_v11  ;;  %v11203_v55 = vpop.f32.mrf.mxu1  ;;  %v3033_v63 = vld [vmem:[#allocation2 + $0x1ca] sm:$0xff] }
 0x13b   : > { %14184 = vst [vmem:[#allocation39_spill] sm:$0xff] %v11203_v55  ;;  %v9190_v53 = vpop.f32.mrf.mxu0  ;;  %9489 = vmatmul.mubr.msk.f32.gmra.mxu0 %vm204_vm1, %v10570_v30 }
 0x13c   : > { %v9240_v60 = vpop.f32.mrf.mxu1  ;;  %9539 = vmatmul.mubr.msk.f32.gmra.mxu1 %vm204_vm1, %v11023_v10  ;;  %9491 = vmatprep.mubr.msk.f32.mxu0 %vm204_vm1, %v10875_v14  ;;  %v2642_v14 = vld [vmem:[#allocation2 + $0x1b8] sm:$0xff] }
 0x13d   : > { %v11209_v4 = vadd.f32 %v9240_v60, %v9190_v53  ;;  %9541 = vmatprep.mubr.msk.f32.mxu1 %vm204_vm1, %v11029_v12  ;;  %v11215_v5 = vpop.f32.mrf.mxu0  ;;  %v3032_v10 = vld [vmem:[#allocation2 + $0x1ba] sm:$0xff]  ;;  %v3034_v60 = vld [vmem:[#allocation2 + $0x1d2] sm:$0xff] }
 0x13e   : > { %14185 = vst [vmem:[#allocation40_spill] sm:$0xff] %v11215_v5  ;;  %v11217_v16 = vpop.f32.mrf.mxu1 }
 0x13f   : > { %14186 = vst [vmem:[#allocation41_spill] sm:$0xff] %v11217_v16  ;;  %v9193_v45 = vpop.f32.mrf.mxu0  ;;  %9492 = vmatmul.mubr.msk.f32.gmra.mxu0 %vm204_vm1, %v10888_v35 }
 0x140   : > { %v9243_v27 = vpop.f32.mrf.mxu1  ;;  %9542 = vmatmul.mubr.msk.f32.gmra.mxu1 %vm204_vm1, %v11039_v24  ;;  %9494 = vmatprep.mubr.msk.f32.mxu0 %vm204_vm1, %v2641_v36  ;;  %v2644_v24 = vld [vmem:[#allocation2 + $0x1d0] sm:$0xff] }
 0x141   : > { %v11223_v30 = vadd.f32 %v9243_v27, %v9193_v45  ;;  %9544 = vmatprep.mubr.msk.f32.mxu1 %vm204_vm1, %v3031_v59  ;;  %v11227_v12 = vpop.f32.mrf.mxu0 }
 0x142   : > { %14187 = vst [vmem:[#allocation43_spill] sm:$0xff] %v11227_v12  ;;  %v11229_v48 = vpop.f32.mrf.mxu1 }
 0x143   : > { %14188 = vst [vmem:[#allocation44_spill] sm:$0xff] %v11229_v48  ;;  %v9196_v9 = vpop.f32.mrf.mxu0  ;;  %9495 = vmatmul.mubr.msk.f32.gmra.mxu0 %vm204_vm1, %v2642_v14 }
 0x144   : > { %v9246_v53 = vpop.f32.mrf.mxu1  ;;  %9545 = vmatmul.mubr.msk.f32.gmra.mxu1 %vm204_vm1, %v3032_v10  ;;  %9497 = vmatprep.mubr.msk.f32.mxu0 %vm204_vm1, %v2643_v62 }
 0x145   : > { %v11233_v35 = vadd.f32 %v9246_v53, %v9196_v9  ;;  %9547 = vmatprep.mubr.msk.f32.mxu1 %vm204_vm1, %v3033_v63  ;;  %v11237_v36 = vpop.f32.mrf.mxu0 }
 0x146   : > { %14189 = vst [vmem:[#allocation45_spill] sm:$0xff] %v11237_v36  ;;  %v11239_v59 = vpop.f32.mrf.mxu1 }
 0x147   : > { %14190 = vst [vmem:[#allocation46_spill] sm:$0xff] %v11239_v59  ;;  %v9199_v45 = vpop.f32.mrf.mxu0  ;;  %9498 = vmatmul.mubr.msk.f32.gmra.mxu0 %vm204_vm1, %v2644_v24 }
 0x148   : > { %v9249_v27 = vpop.f32.mrf.mxu1  ;;  %9548 = vmatmul.mubr.msk.f32.gmra.mxu1 %vm204_vm1, %v3034_v60  ;;  %9552 = vmatprep.mubr.msk.f32.mxu0 %vm204_vm1, %v10738_v40 }
 0x149   : > { %v11243_v14 = vadd.f32 %v9249_v27, %v9199_v45  ;;  %v11247_v10 = vpop.f32.mrf.mxu0 }
 0x14a   : > { %14191 = vst [vmem:[#allocation47_spill] sm:$0xff] %v11247_v10  ;;  %v11249_v62 = vpop.f32.mrf.mxu1 }
 0x14b   : > { %14192 = vst [vmem:[#allocation48_spill] sm:$0xff] %v11249_v62  ;;  %v9254_v63 = vpop.f32.mrf.mxu0  ;;  %9553 = vmatmul.mubr.msk.f32.vlgmr.msra.gmra.mxu0 %vm204_vm1, %v10746_v28 }
 0x14c   : > { %v9304_v9 = vpop.f32.mrf.mxu1  ;;  %v1412_v53 = vadd.f32 %v9254_v63, %v11055_v49  ;;  %9555 = vmatprep.mubr.msk.f32.mxu0 %vm204_vm1, %v10750_v29 }
 0x14d   : > { %v1252_v24 = vpop.f32.mrf.mxu0 }
 0x14e   : > { %v11256_v60 = vpop.f32.mrf.mxu1  ;;  %v11259_v45 = vadd.f32 %v1252_v24, %v11063_v51  ;;  %v11261_v40 = vadd.f32 %v9304_v9, %v1412_v53 }
 0x14f   : > { %v9257_v27 = vpop.f32.mrf.mxu0  ;;  %9556 = vmatmul.mubr.msk.f32.gmra.mxu0 %vm204_vm1, %v10758_v44 }
 0x150   : > { %v9307_v62 = vpop.f32.mrf.mxu1  ;;  %v1414_v28 = vadd.f32 %v9257_v27, %v11069_v54  ;;  %9558 = vmatprep.mubr.msk.f32.mxu0 %vm204_vm1, %v10762_v46 }
 0x151   : > { %v1262_v49 = vpop.f32.mrf.mxu0 }
 0x152   : > { %v11268_v29 = vpop.f32.mrf.mxu1  ;;  %v11271_v63 = vadd.f32 %v1262_v49, %v11075_v32  ;;  %v11273_v51 = vadd.f32 %v9307_v62, %v1414_v28 }
 0x153   : > { %v9260_v9 = vpop.f32.mrf.mxu0  ;;  %9559 = vmatmul.mubr.msk.f32.gmra.mxu0 %vm204_vm1, %v10770_v34 }
 0x154   : > { %v9310_v53 = vpop.f32.mrf.mxu1  ;;  %v1416_v44 = vadd.f32 %v9260_v9, %v11081_v57  ;;  %9561 = vmatprep.mubr.msk.f32.mxu0 %vm204_vm1, %v10774_v7 }
 0x155   : > { %v1272_v54 = vpop.f32.mrf.mxu0 }
 0x156   : > { %v11280_v46 = vpop.f32.mrf.mxu1  ;;  %v11283_v24 = vadd.f32 %v1272_v54, %v11087_v47  ;;  %v11285_v32 = vadd.f32 %v9310_v53, %v1416_v44 }
 0x157   : > { %v9263_v62 = vpop.f32.mrf.mxu0  ;;  %9562 = vmatmul.mubr.msk.f32.gmra.mxu0 %vm204_vm1, %v10782_v33 }
 0x158   : > { %v9313_v27 = vpop.f32.mrf.mxu1  ;;  %v1418_v34 = vadd.f32 %v9263_v62, %v11093_v61  ;;  %9564 = vmatprep.mubr.msk.f32.mxu0 %vm204_vm1, %v10786_v0 }
 0x159   : > { %v1282_v57 = vpop.f32.mrf.mxu0 }
 0x15a   : > { %v11292_v7 = vpop.f32.mrf.mxu1  ;;  %v11295_v28 = vadd.f32 %v1282_v57, %v11099_v31  ;;  %v11297_v47 = vadd.f32 %v9313_v27, %v1418_v34  ;;  %v3407_v27 = vld [vmem:[#allocation2 + $0x10c] sm:$0xff] }
 0x15b   : > { %v9266_v49 = vpop.f32.mrf.mxu0  ;;  %9565 = vmatmul.mubr.msk.f32.gmra.mxu0 %vm204_vm1, %v10794_v39 }
 0x15c   : > { %v9316_v9 = vpop.f32.mrf.mxu1  ;;  %v1420_v33 = vadd.f32 %v9266_v49, %v11105_v3  ;;  %9567 = vmatprep.mubr.msk.f32.mxu0 %vm204_vm1, %v10798_v37  ;;  %v3406_v3 = vld [vmem:[#allocation2 + $0xfc] sm:$0xff] }
 0x15d   : > { %v1292_v61 = vpop.f32.mrf.mxu0 }
 0x15e   : > { %v11304_v0 = vpop.f32.mrf.mxu1  ;;  %v11307_v53 = vadd.f32 %v1292_v61, %v11111_v58  ;;  %v11309_v31 = vadd.f32 %v9316_v9, %v1420_v33  ;;  %v3409_v33 = vld [vmem:[#allocation2 + $0x124] sm:$0xff] }
 0x15f   : > { %v9269_v44 = vpop.f32.mrf.mxu0  ;;  %9568 = vmatmul.mubr.msk.f32.gmra.mxu0 %vm204_vm1, %v10806_v1 }
 0x160   : > { %v9319_v54 = vpop.f32.mrf.mxu1  ;;  %v1422_v39 = vadd.f32 %v9269_v44, %v11117_v38  ;;  %9570 = vmatprep.mubr.msk.f32.mxu0 %vm204_vm1, %v10810_v42  ;;  %v3408_v38 = vld [vmem:[#allocation2 + $0x114] sm:$0xff] }
 0x161   : > { %v1302_v37 = vpop.f32.mrf.mxu0 }
 0x162   : > { %v11316_v62 = vpop.f32.mrf.mxu1  ;;  %v11319_v58 = vadd.f32 %v1302_v37, %v11123_v6  ;;  %v11321_v34 = vadd.f32 %v9319_v54, %v1422_v39 }
 0x163   : > { %v9272_v57 = vpop.f32.mrf.mxu0  ;;  %9571 = vmatmul.mubr.msk.f32.gmra.mxu0 %vm204_vm1, %v3406_v3 }
 0x164   : > { %v9322_v1 = vpop.f32.mrf.mxu1  ;;  %v1424_v49 = vadd.f32 %v9272_v57, %v11129_v2  ;;  %9573 = vmatprep.mubr.msk.f32.mxu0 %vm204_vm1, %v3407_v27  ;;  %v3410_v2 = vld [vmem:[#allocation2 + $0x12c] sm:$0xff]  ;;  %v3411_v27 = vld [vmem:[#allocation2 + $0x13c] sm:$0xff] }
 0x165   : > { %v1312_v42 = vpop.f32.mrf.mxu0 }
 0x166   : > { %v11326_v9 = vpop.f32.mrf.mxu1  ;;  %v11329_v61 = vadd.f32 %v1312_v42, %v11135_v18  ;;  %v11331_v6 = vadd.f32 %v9322_v1, %v1424_v49 }
 0x167   : > { %v9275_v44 = vpop.f32.mrf.mxu0  ;;  %9574 = vmatmul.mubr.msk.f32.gmra.mxu0 %vm204_vm1, %v3408_v38 }
 0x168   : > { %v9325_v54 = vpop.f32.mrf.mxu1  ;;  %v1426_v39 = vadd.f32 %v9275_v44, %v11141_v50  ;;  %9576 = vmatprep.mubr.msk.f32.mxu0 %vm204_vm1, %v3409_v33  ;;  %v3412_v50 = vld [vmem:[#allocation2 + $0x144] sm:$0xff]  ;;  %v3413_v44 = vld [vmem:[#allocation2 + $0x154] sm:$0xff] }
 0x169   : > { %v1322_v3 = vpop.f32.mrf.mxu0 }
 0x16a   : > { %v11336_v37 = vpop.f32.mrf.mxu1  ;;  %v11339_v57 = vadd.f32 %v1322_v3, %v11147_v52  ;;  %v11341_v18 = vadd.f32 %v9325_v54, %v1426_v39 }
 0x16b   : > { %14193 = vst [vmem:[#allocation49_spill] sm:$0xff] %v11336_v37  ;;  %v9278_v1 = vpop.f32.mrf.mxu0  ;;  %9577 = vmatmul.mubr.msk.f32.gmra.mxu0 %vm204_vm1, %v3410_v2  ;;  %v3414_v2 = vld [vmem:[#allocation2 + $0x15c] sm:$0xff] }
 0x16c   : > { %14194 = vst [vmem:[#allocation50_spill] sm:$0xff] %v11339_v57  ;;  %v9328_v49 = vpop.f32.mrf.mxu1  ;;  %v1428_v38 = vadd.f32 %v9278_v1, %v11153_v25  ;;  %9579 = vmatprep.mubr.msk.f32.mxu0 %vm204_vm1, %v3411_v27  ;;  %v3415_v27 = vld [vmem:[#allocation2 + $0x16c] sm:$0xff] }
 0x16d   : > { %v11346_v42 = vpop.f32.mrf.mxu0 }
 0x16e   : > { %14195 = vst [vmem:[#allocation51_spill] sm:$0xff] %v11346_v42  ;;  %v11348_v33 = vpop.f32.mrf.mxu1  ;;  %v11350_v10 = vadd.f32 %v9328_v49, %v1428_v38 }
 0x16f   : > { %14196 = vst [vmem:[#allocation52_spill] sm:$0xff] %v11348_v33  ;;  %v9281_v52 = vpop.f32.mrf.mxu0  ;;  %9580 = vmatmul.mubr.msk.f32.gmra.mxu0 %vm204_vm1, %v3412_v50  ;;  %v3416_v50 = vld [vmem:[#allocation2 + $0x174] sm:$0xff] }
 0x170   : > { %v9331_v54 = vpop.f32.mrf.mxu1  ;;  %v1430_v39 = vadd.f32 %v9281_v52, %v11167_v21  ;;  %9582 = vmatprep.mubr.msk.f32.mxu0 %vm204_vm1, %v3413_v44 }
 0x171   : > { %v11355_v25 = vpop.f32.mrf.mxu0 }
 0x172   : > { %14197 = vst [vmem:[#allocation53_spill] sm:$0xff] %v11355_v25  ;;  %v11357_v3 = vpop.f32.mrf.mxu1  ;;  %v11359_v1 = vadd.f32 %v9331_v54, %v1430_v39 }
 0x173   : > { %14198 = vst [vmem:[#allocation54_spill] sm:$0xff] %v11357_v3  ;;  %v9284_v59 = vpop.f32.mrf.mxu0  ;;  %9583 = vmatmul.mubr.msk.f32.gmra.mxu0 %vm204_vm1, %v3414_v2 }
 0x174   : > { %v9334_v49 = vpop.f32.mrf.mxu1  ;;  %v1432_v38 = vadd.f32 %v9284_v59, %v11181_v17  ;;  %9585 = vmatprep.mubr.msk.f32.mxu0 %vm204_vm1, %v3415_v27 }
 0x175   : > { %v11364_v21 = vpop.f32.mrf.mxu0 }
 0x176   : > { %14199 = vst [vmem:[#allocation42_spill] sm:$0xff] %v11364_v21  ;;  %v11366_v44 = vpop.f32.mrf.mxu1  ;;  %v11368_v52 = vadd.f32 %v9334_v49, %v1432_v38 }
 0x177   : > { %14200 = vst [vmem:[#allocation56_spill] sm:$0xff] %v11366_v44  ;;  %v9287_v36 = vpop.f32.mrf.mxu0  ;;  %9586 = vmatmul.mubr.msk.f32.gmra.mxu0 %vm204_vm1, %v3416_v50 }
 0x178   : > { %v9337_v54 = vpop.f32.mrf.mxu1  ;;  %v1434_v39 = vadd.f32 %v9287_v36, %v11195_v13  ;;  %9588 = vmatprep.mubr.msk.f32.mxu0 %vm204_vm1, %v11015_v8  ;;  %v3421_v8 = vld [vmem:[#allocation2 + $0x1b4] sm:$0xff] }
 0x179   : > { %v11374_v2 = vpop.f32.mrf.mxu0 }
 0x17a   : > { %14201 = vst [vmem:[#allocation57_spill] sm:$0xff] %v11374_v2  ;;  %v11376_v17 = vpop.f32.mrf.mxu1  ;;  %v11378_v59 = vadd.f32 %v9337_v54, %v1434_v39 }
 0x17b   : > { %14202 = vst [vmem:[#allocation58_spill] sm:$0xff] %v11376_v17  ;;  %v9290_v27 = vpop.f32.mrf.mxu0  ;;  %9589 = vmatmul.mubr.msk.f32.gmra.mxu0 %vm204_vm1, %v11027_v20 }
 0x17c   : > { %v9340_v49 = vpop.f32.mrf.mxu1  ;;  %v1436_v38 = vadd.f32 %v9290_v27, %v11209_v4  ;;  %9591 = vmatprep.mubr.msk.f32.mxu0 %vm204_vm1, %v11031_v22  ;;  %v3422_v4 = vld [vmem:[#allocation2 + $0x1bc] sm:$0xff]  ;;  %v3423_v27 = vld [vmem:[#allocation2 + $0x1cc] sm:$0xff] }
 0x17d   : > { %v11385_v13 = vpop.f32.mrf.mxu0 }
 0x17e   : > { %14203 = vst [vmem:[#allocation59_spill] sm:$0xff] %v11385_v13  ;;  %v11387_v36 = vpop.f32.mrf.mxu1  ;;  %v11389_v50 = vadd.f32 %v9340_v49, %v1436_v38 }
 0x17f   : > { %14204 = vst [vmem:[#allocation60_spill] sm:$0xff] %v11387_v36  ;;  %v9293_v48 = vpop.f32.mrf.mxu0  ;;  %9592 = vmatmul.mubr.msk.f32.gmra.mxu0 %vm204_vm1, %v11043_v26  ;;  %v3424_v26 = vld [vmem:[#allocation2 + $0x1d4] sm:$0xff] }
 0x180   : > { %v9343_v54 = vpop.f32.mrf.mxu1  ;;  %v1438_v20 = vadd.f32 %v9293_v48, %v11223_v30  ;;  %9594 = vmatprep.mubr.msk.f32.mxu0 %vm204_vm1, %v3421_v8 }
 0x181   : > { %v11395_v39 = vpop.f32.mrf.mxu0 }
 0x182   : > { %14205 = vst [vmem:[#allocation61_spill] sm:$0xff] %v11395_v39  ;;  %v11397_v22 = vpop.f32.mrf.mxu1  ;;  %v11399_v12 = vadd.f32 %v9343_v54, %v1438_v20 }
 0x183   : > { %14206 = vst [vmem:[#allocation62_spill] sm:$0xff] %v11397_v22  ;;  %v9296_v36 = vpop.f32.mrf.mxu0  ;;  %9595 = vmatmul.mubr.msk.f32.gmra.mxu0 %vm204_vm1, %v3422_v4 }
 0x184   : > { %v9346_v49 = vpop.f32.mrf.mxu1  ;;  %v1440_v38 = vadd.f32 %v9296_v36, %v11233_v35  ;;  %9597 = vmatprep.mubr.msk.f32.mxu0 %vm204_vm1, %v3423_v27 }
 0x185   : > { %v11404_v30 = vpop.f32.mrf.mxu0 }
 0x186   : > { %14207 = vst [vmem:[#allocation63_spill] sm:$0xff] %v11404_v30  ;;  %v11406_v48 = vpop.f32.mrf.mxu1  ;;  %v11408_v8 = vadd.f32 %v9346_v49, %v1440_v38 }
 0x187   : > { %14208 = vst [vmem:[#allocation64_spill] sm:$0xff] %v11406_v48  ;;  %v9299_v39 = vpop.f32.mrf.mxu0  ;;  %9598 = vmatmul.mubr.msk.f32.gmra.mxu0 %vm204_vm1, %v3424_v26 }
 0x188   : > { %v9349_v54 = vpop.f32.mrf.mxu1  ;;  %v1442_v20 = vadd.f32 %v9299_v39, %v11243_v14 }
 0x189   : > { %v11412_v22 = vpop.f32.mrf.mxu0 }
 0x18a   : > { %14209 = vst [vmem:[#allocation65_spill] sm:$0xff] %v11412_v22  ;;  %v11414_v4 = vpop.f32.mrf.mxu1  ;;  %v11416_v35 = vadd.f32 %v9349_v54, %v1442_v20 }
 0x18b   : > { %14210 = vst [vmem:[#allocation66_spill] sm:$0xff] %v11414_v4  ;;  %v9354_v36 = vpop.f32.mrf.mxu0 }
 0x18c   : > { %v9404_v27 = vpop.f32.mrf.mxu1  ;;  %v2192_v30 = vadd.f32 %v9354_v36, %v11261_v40 }
 0x18d   : > { %v11419_v13 = vpop.f32.mrf.mxu0 }
 0x18e   : > { %v11421_v49 = vpop.f32.mrf.mxu1  ;;  %v11423_v38 = vadd.f32 %v9404_v27, %v2192_v30 }
 0x18f   : > { %v9357_v26 = vpop.f32.mrf.mxu0 }
 0x190   : > { %v9407_v48 = vpop.f32.mrf.mxu1  ;;  %v2194_v14 = vadd.f32 %v9357_v26, %v11273_v51 }
 0x191   : > { %v11426_v39 = vpop.f32.mrf.mxu0 }
 0x192   : > { %v11428_v22 = vpop.f32.mrf.mxu1  ;;  %v11430_v54 = vadd.f32 %v9407_v48, %v2194_v14 }
 0x193   : > { %v9360_v20 = vpop.f32.mrf.mxu0 }
 0x194   : > { %v9410_v4 = vpop.f32.mrf.mxu1  ;;  %v2196_v40 = vadd.f32 %v9360_v20, %v11285_v32 }
 0x195   : > { %v11433_v36 = vpop.f32.mrf.mxu0 }
 0x196   : > { %v11435_v17 = vpop.f32.mrf.mxu1  ;;  %v11437_v30 = vadd.f32 %v9410_v4, %v2196_v40 }
 0x197   : > { %v9363_v27 = vpop.f32.mrf.mxu0 }
 0x198   : > { %v9413_v16 = vpop.f32.mrf.mxu1  ;;  %v2198_v51 = vadd.f32 %v9363_v27, %v11297_v47 }
 0x199   : > { %v11440_v26 = vpop.f32.mrf.mxu0 }
 0x19a   : > { %v11442_v5 = vpop.f32.mrf.mxu1  ;;  %v11444_v48 = vadd.f32 %v9413_v16, %v2198_v51 }
 0x19b   : > { %v9366_v14 = vpop.f32.mrf.mxu0 }
 0x19c   : > { %v9416_v2 = vpop.f32.mrf.mxu1  ;;  %v2200_v32 = vadd.f32 %v9366_v14, %v11309_v31 }
 0x19d   : > { %v11447_v20 = vpop.f32.mrf.mxu0 }
 0x19e   : > { %v11449_v44 = vpop.f32.mrf.mxu1  ;;  %v11451_v4 = vadd.f32 %v9416_v2, %v2200_v32 }
 0x19f   : > { %v9369_v40 = vpop.f32.mrf.mxu0 }
 0x1a0   : > { %v9419_v55 = vpop.f32.mrf.mxu1  ;;  %v2202_v47 = vadd.f32 %v9369_v40, %v11321_v34 }
 0x1a1   : > { %v11454_v27 = vpop.f32.mrf.mxu0 }
 0x1a2   : > { %v11456_v11 = vpop.f32.mrf.mxu1  ;;  %v11458_v16 = vadd.f32 %v9419_v55, %v2202_v47 }
 0x1a3   : > { %14211 = vst [vmem:[#allocation67_spill] sm:$0xff] %v11456_v11  ;;  %v9372_v51 = vpop.f32.mrf.mxu0 }
 0x1a4   : > { %v9422_v21 = vpop.f32.mrf.mxu1  ;;  %v2204_v31 = vadd.f32 %v9372_v51, %v11331_v6 }
 0x1a5   : > { %v11461_v14 = vpop.f32.mrf.mxu0 }
 0x1a6   : > { %14212 = vst [vmem:[#allocation68_spill] sm:$0xff] %v11461_v14  ;;  %v11463_v3 = vpop.f32.mrf.mxu1  ;;  %v11465_v2 = vadd.f32 %v9422_v21, %v2204_v31 }
 0x1a7   : > { %14213 = vst [vmem:[#allocation69_spill] sm:$0xff] %v11463_v3  ;;  %v9375_v32 = vpop.f32.mrf.mxu0 }
 0x1a8   : > { %v9425_v41 = vpop.f32.mrf.mxu1  ;;  %v2206_v34 = vadd.f32 %v9375_v32, %v11341_v18 }
 0x1a9   : > { %v11468_v40 = vpop.f32.mrf.mxu0 }
 0x1aa   : > { %14214 = vst [vmem:[#allocation70_spill] sm:$0xff] %v11468_v40  ;;  %v11470_v15 = vpop.f32.mrf.mxu1  ;;  %v11472_v55 = vadd.f32 %v9425_v41, %v2206_v34 }
 0x1ab   : > { %14215 = vst [vmem:[#allocation71_spill] sm:$0xff] %v11470_v15  ;;  %v9378_v47 = vpop.f32.mrf.mxu0 }
 0x1ac   : > { %v9428_v25 = vpop.f32.mrf.mxu1  ;;  %v2208_v6 = vadd.f32 %v9378_v47, %v11350_v10 }
 0x1ad   : > { %v11475_v51 = vpop.f32.mrf.mxu0 }
 0x1ae   : > { %14216 = vst [vmem:[#allocation72_spill] sm:$0xff] %v11475_v51  ;;  %v11477_v33 = vpop.f32.mrf.mxu1  ;;  %v11479_v21 = vadd.f32 %v9428_v25, %v2208_v6 }
 0x1af   : > { %14217 = vst [vmem:[#allocation73_spill] sm:$0xff] %v11477_v33  ;;  %v9381_v31 = vpop.f32.mrf.mxu0 }
 0x1b0   : > { %v9431_v3 = vpop.f32.mrf.mxu1  ;;  %v2210_v18 = vadd.f32 %v9381_v31, %v11359_v1 }
 0x1b1   : > { %v11482_v32 = vpop.f32.mrf.mxu0 }
 0x1b2   : > { %14218 = vst [vmem:[#allocation74_spill] sm:$0xff] %v11482_v32  ;;  %v11484_v40 = vpop.f32.mrf.mxu1  ;;  %v11486_v41 = vadd.f32 %v9431_v3, %v2210_v18 }
 0x1b3   : > { %14219 = vst [vmem:[#allocation75_spill] sm:$0xff] %v11484_v40  ;;  %v9384_v34 = vpop.f32.mrf.mxu0 }
 0x1b4   : > { %v9434_v15 = vpop.f32.mrf.mxu1  ;;  %v2212_v10 = vadd.f32 %v9384_v34, %v11368_v52 }
 0x1b5   : > { %v11489_v47 = vpop.f32.mrf.mxu0 }
 0x1b6   : > { %14220 = vst [vmem:[#allocation76_spill] sm:$0xff] %v11489_v47  ;;  %v11491_v51 = vpop.f32.mrf.mxu1  ;;  %v11493_v25 = vadd.f32 %v9434_v15, %v2212_v10 }
 0x1b7   : > { %14221 = vst [vmem:[#allocation77_spill] sm:$0xff] %v11491_v51  ;;  %v9387_v6 = vpop.f32.mrf.mxu0 }
 0x1b8   : > { %v9437_v33 = vpop.f32.mrf.mxu1  ;;  %v2214_v1 = vadd.f32 %v9387_v6, %v11378_v59 }
 0x1b9   : > { %v11496_v31 = vpop.f32.mrf.mxu0 }
 0x1ba   : > { %14222 = vst [vmem:[#allocation78_spill] sm:$0xff] %v11496_v31  ;;  %v11498_v32 = vpop.f32.mrf.mxu1  ;;  %v11500_v3 = vadd.f32 %v9437_v33, %v2214_v1 }
 0x1bb   : > { %14223 = vst [vmem:[#allocation79_spill] sm:$0xff] %v11498_v32  ;;  %v9390_v18 = vpop.f32.mrf.mxu0 }
 0x1bc   : > { %v9440_v40 = vpop.f32.mrf.mxu1  ;;  %v2216_v52 = vadd.f32 %v9390_v18, %v11389_v50 }
 0x1bd   : > { %v11503_v34 = vpop.f32.mrf.mxu0 }
 0x1be   : > { %14224 = vst [vmem:[#allocation80_spill] sm:$0xff] %v11503_v34  ;;  %v11505_v47 = vpop.f32.mrf.mxu1  ;;  %v11507_v15 = vadd.f32 %v9440_v40, %v2216_v52 }
 0x1bf   : > { %14225 = vst [vmem:[#allocation81_spill] sm:$0xff] %v11505_v47  ;;  %v9393_v10 = vpop.f32.mrf.mxu0 }
 0x1c0   : > { %v9443_v51 = vpop.f32.mrf.mxu1  ;;  %v2218_v59 = vadd.f32 %v9393_v10, %v11399_v12 }
 0x1c1   : > { %v11510_v6 = vpop.f32.mrf.mxu0 }
 0x1c2   : > { %14226 = vst [vmem:[#allocation82_spill] sm:$0xff] %v11510_v6  ;;  %v11512_v31 = vpop.f32.mrf.mxu1  ;;  %v11514_v33 = vadd.f32 %v9443_v51, %v2218_v59 }
 0x1c3   : > { %14227 = vst [vmem:[#allocation83_spill] sm:$0xff] %v11512_v31  ;;  %v9396_v1 = vpop.f32.mrf.mxu0 }
 0x1c4   : > { %v9446_v32 = vpop.f32.mrf.mxu1  ;;  %v2220_v50 = vadd.f32 %v9396_v1, %v11408_v8 }
 0x1c5   : > { %v11517_v18 = vpop.f32.mrf.mxu0 }
 0x1c6   : > { %14228 = vst [vmem:[#allocation84_spill] sm:$0xff] %v11517_v18  ;;  %v11519_v34 = vpop.f32.mrf.mxu1  ;;  %v11521_v40 = vadd.f32 %v9446_v32, %v2220_v50 }
 0x1c7   : > { %14229 = vst [vmem:[#allocation85_spill] sm:$0xff] %v11519_v34  ;;  %v9399_v52 = vpop.f32.mrf.mxu0 }
 0x1c8   : > { %v9449_v47 = vpop.f32.mrf.mxu1  ;;  %v2222_v12 = vadd.f32 %v9399_v52, %v11416_v35 }
 0x1c9   : > { %v11524_v10 = vpop.f32.mrf.mxu0 }
 0x1ca   : > { %14230 = vst [vmem:[#allocation86_spill] sm:$0xff] %v11524_v10  ;;  %v11526_v6 = vpop.f32.mrf.mxu1  ;;  %v11528_v51 = vadd.f32 %v9449_v47, %v2222_v12 }
 0x1cb   : > { %14231 = vst [vmem:[#allocation87_spill] sm:$0xff] %v11526_v6  ;;  %v9454_v59 = vpop.f32.mrf.mxu0 }
 0x1cc   : > { %v11530_v31 = vpop.f32.mrf.mxu1  ;;  %v11533_v8 = vadd.f32 %v9454_v59, %v11423_v38 }
 0x1cd   : > { %v11535_v1 = vpop.f32.mrf.mxu0 }
 0x1ce   : > { %v11537_v32 = vpop.f32.mrf.mxu1 }
 0x1cf   : > { %v9457_v50 = vpop.f32.mrf.mxu0 }
 0x1d0   : > { %v11540_v34 = vadd.f32 %v9457_v50, %v11430_v54  ;;  %v11544_v52 = vpop.f32.mrf.mxu1 }
 0x1d1   : > { %v11542_v35 = vpop.f32.mrf.mxu0 }
 0x1d2   : > { %v11549_v6 = vpop.f32.mrf.mxu1 }
 0x1d3   : > { %v9460_v47 = vpop.f32.mrf.mxu0 }
 0x1d4   : > { %v11547_v12 = vadd.f32 %v9460_v47, %v11437_v30  ;;  %v11556_v18 = vpop.f32.mrf.mxu1 }
 0x1d5   : > { %v11551_v38 = vpop.f32.mrf.mxu0 }
 0x1d6   : > { %v11563_v19 = vpop.f32.mrf.mxu1 }
 0x1d7   : > { %v9463_v59 = vpop.f32.mrf.mxu0 }
 0x1d8   : > { %v11554_v10 = vadd.f32 %v9463_v59, %v11444_v48  ;;  %v11570_v37 = vpop.f32.mrf.mxu1 }
 0x1d9   : > { %v11558_v54 = vpop.f32.mrf.mxu0 }
 0x1da   : > { %v11577_v11 = vpop.f32.mrf.mxu1 }
 0x1db   : > { %v9466_v50 = vpop.f32.mrf.mxu0 }
 0x1dc   : > { %v11561_v43 = vadd.f32 %v9466_v50, %v11451_v4  ;;  %v11584_v14 = vpop.f32.mrf.mxu1 }
 0x1dd   : > { %v11565_v30 = vpop.f32.mrf.mxu0 }
 0x1de   : > { %14232 = vst [vmem:[#allocation88_spill] sm:$0xff] %v11561_v43 }
 0x1df   : > { %v9469_v47 = vpop.f32.mrf.mxu0 }
 0x1e0   : > { %v11568_v42 = vadd.f32 %v9469_v47, %v11458_v16 }
 0x1e1   : > { %v11572_v48 = vpop.f32.mrf.mxu0 }
 0x1e2   : > { %14233 = vst [vmem:[#allocation89_spill] sm:$0xff] %v11568_v42  ;;  %14234 = vst [vmem:[#allocation90_spill] sm:$0xff] %v11572_v48  ;;  %v11591_v48 = vpop.f32.mrf.mxu1 }
 0x1e3   : > { %v9472_v59 = vpop.f32.mrf.mxu0 }
 0x1e4   : > { %v11575_v57 = vadd.f32 %v9472_v59, %v11465_v2 }
 0x1e5   : > { %v11579_v4 = vpop.f32.mrf.mxu0 }
 0x1e6   : > { %14235 = vst [vmem:[#allocation91_spill] sm:$0xff] %v11575_v57  ;;  %14236 = vst [vmem:[#allocation92_spill] sm:$0xff] %v11579_v4  ;;  %v11598_v4 = vpop.f32.mrf.mxu1 }
 0x1e7   : > { %v9475_v50 = vpop.f32.mrf.mxu0 }
 0x1e8   : > { %v11582_v43 = vadd.f32 %v9475_v50, %v11472_v55 }
 0x1e9   : > { %v11586_v16 = vpop.f32.mrf.mxu0 }
 0x1ea   : > { %14237 = vst [vmem:[#allocation93_spill] sm:$0xff] %v11582_v43  ;;  %14238 = vst [vmem:[#allocation94_spill] sm:$0xff] %v11586_v16  ;;  %v11605_v16 = vpop.f32.mrf.mxu1 }
 0x1eb   : > { %v9478_v47 = vpop.f32.mrf.mxu0 }
 0x1ec   : > { %v11589_v42 = vadd.f32 %v9478_v47, %v11479_v21 }
 0x1ed   : > { %v11593_v2 = vpop.f32.mrf.mxu0 }
 0x1ee   : > { %14239 = vst [vmem:[#allocation95_spill] sm:$0xff] %v11589_v42  ;;  %14240 = vst [vmem:[#allocation96_spill] sm:$0xff] %v11593_v2  ;;  %v11612_v2 = vpop.f32.mrf.mxu1 }
 0x1ef   : > { %v9481_v59 = vpop.f32.mrf.mxu0 }
 0x1f0   : > { %v11596_v57 = vadd.f32 %v9481_v59, %v11486_v41 }
 0x1f1   : > { %v11600_v55 = vpop.f32.mrf.mxu0 }
 0x1f2   : > { %14241 = vst [vmem:[#allocation97_spill] sm:$0xff] %v11596_v57  ;;  %14242 = vst [vmem:[#allocation98_spill] sm:$0xff] %v11600_v55  ;;  %v11619_v55 = vpop.f32.mrf.mxu1 }
 0x1f3   : > { %v9484_v50 = vpop.f32.mrf.mxu0 }
 0x1f4   : > { %v11603_v43 = vadd.f32 %v9484_v50, %v11493_v25 }
 0x1f5   : > { %v11607_v21 = vpop.f32.mrf.mxu0 }
 0x1f6   : > { %14243 = vst [vmem:[#allocation99_spill] sm:$0xff] %v11603_v43  ;;  %14244 = vst [vmem:[#allocation100_spill] sm:$0xff] %v11607_v21  ;;  %v1801_v43 = vadd.f32 %v11256_v60, %v11259_v45 }
 0x1f7   : > { %v9487_v47 = vpop.f32.mrf.mxu0 }
 0x1f8   : > { %v11610_v42 = vadd.f32 %v9487_v47, %v11500_v3  ;;  %v11628_v3 = vpop.f32.mrf.mxu1 }
 0x1f9   : > { %v11614_v41 = vpop.f32.mrf.mxu0 }
 0x1fa   : > { %14245 = vst [vmem:[#allocation101_spill] sm:$0xff] %v11610_v42  ;;  %14246 = vst [vmem:[#allocation102_spill] sm:$0xff] %v11614_v41  ;;  %v2191_v42 = vadd.f32 %v11419_v13, %v1801_v43 }
 0x1fb   : > { %v9490_v59 = vpop.f32.mrf.mxu0 }
 0x1fc   : > { %v11617_v57 = vadd.f32 %v9490_v59, %v11507_v15  ;;  %v1803_v15 = vadd.f32 %v11268_v29, %v11271_v63  ;;  %v2581_v60 = vadd.f32 %v11421_v49, %v2191_v42  ;;  %v1807_v49 = vadd.f32 %v11292_v7, %v11295_v28 }
 0x1fd   : > { %v11621_v25 = vpop.f32.mrf.mxu0  ;;  %v1809_v7 = vadd.f32 %v11304_v0, %v11307_v53 }
 0x1fe   : > { %14247 = vst [vmem:[#allocation103_spill] sm:$0xff] %v11617_v57  ;;  %14248 = vst [vmem:[#allocation104_spill] sm:$0xff] %v11621_v25  ;;  %v11638_v57 = vpop.f32.mrf.mxu1  ;;  %v2193_v45 = vadd.f32 %v11426_v39, %v1803_v15  ;;  %v2971_v43 = vadd.f32 %v11535_v1, %v2581_v60 }
 0x1ff   : > { %v9493_v50 = vpop.f32.mrf.mxu0 }
 0x200   : > { %v11626_v21 = vadd.f32 %v9493_v50, %v11514_v33  ;;  %v1805_v50 = vadd.f32 %v11280_v46, %v11283_v24  ;;  %v11650_v29 = vpop.f32.mrf.mxu1  ;;  %v3362_v46 = vadd.f32 %v11530_v31, %v11533_v8  ;;  %v3361_v24 = vadd.f32 %v11537_v32, %v2971_v43 }
 0x201   : > { %v11630_v47 = vpop.f32.mrf.mxu0  ;;  %v3364_v31 = vadd.f32 %v11544_v52, %v11540_v34 }
 0x203   : > { %v9496_v41 = vpop.f32.mrf.mxu0 }
 0x204   : > { %v11636_v59 = vadd.f32 %v9496_v41, %v11521_v40  ;;  %v2583_v40 = vadd.f32 %v11428_v22, %v2193_v45  ;;  %v2195_v41 = vadd.f32 %v11433_v36, %v1805_v50  ;;  %v2197_v22 = vadd.f32 %v11440_v26, %v1807_v49 }
 0x205   : > { %v11640_v25 = vpop.f32.mrf.mxu0  ;;  %v2199_v26 = vadd.f32 %v11447_v20, %v1809_v7  ;;  %v3366_v20 = vadd.f32 %v11556_v18, %v11547_v12 }
 0x206   : > { %v2973_v39 = vadd.f32 %v11542_v35, %v2583_v40  ;;  %v2585_v15 = vadd.f32 %v11435_v17, %v2195_v41 }
 0x207   : > { %v9499_v33 = vpop.f32.mrf.mxu0  ;;  %v2589_v40 = vadd.f32 %v11449_v44, %v2199_v26  ;;  %v3368_v44 = vadd.f32 %v11570_v37, %v11554_v10 }
 0x208   : > { %v11648_v13 = vadd.f32 %v9499_v33, %v11528_v51  ;;  %v11662_v51 = vpop.f32.mrf.mxu1  ;;  %v3363_v8 = vadd.f32 %v11549_v6, %v2973_v39  ;;  %v2975_v32 = vadd.f32 %v11551_v38, %v2585_v15  ;;  %v2587_v33 = vadd.f32 %v11442_v5, %v2197_v22  ;;  %v14249_v15 = vld [vmem:[#allocation68_spill] sm:$0xff] }
 0x209   : > { %v11652_v63 = vpop.f32.mrf.mxu0  ;;  %v1811_v6 = vadd.f32 %v11316_v62, %v11319_v58  ;;  %v2979_v39 = vadd.f32 %v11565_v30, %v2589_v40  ;;  %v14251_v30 = vld [vmem:[#allocation50_spill] sm:$0xff] }
 0x20a   : > { %v11679_v35 = vpop.f32.mrf.mxu1  ;;  %v3365_v50 = vadd.f32 %v11563_v19, %v2975_v32  ;;  %v2977_v43 = vadd.f32 %v11558_v54, %v2587_v33  ;;  %v1813_v19 = vadd.f32 %v11326_v9, %v11329_v61 }
 0x20b   : > { %v9554_v42 = vpop.f32.mrf.mxu0  ;;  %v2201_v62 = vadd.f32 %v11454_v27, %v1811_v6  ;;  %v14255_v6 = vld [vmem:[#allocation90_spill] sm:$0xff] }
 0x20c   : > { %v11666_v60 = vadd.f32 %v9554_v42, %v3362_v46  ;;  %v11697_v41 = vpop.f32.mrf.mxu1  ;;  %v2203_v22 = vadd.f32 %v14249_v15, %v1813_v19  ;;  %v14262_v15 = vld [vmem:[#allocation89_spill] sm:$0xff] }
 0x20d   : > { %v3592_v1 = vpop.f32.mrf.mxu0 }
 0x20e   : > { %v11668_v36 = vadd.f32 %v3592_v1, %v3361_v24  ;;  %v3784_v0 = vsel %vm204_vm1, %v11666_v60, 0.0  ;;  %v3367_v24 = vadd.f32 %v11577_v11, %v2977_v43  ;;  %v975_v1 = vadd.f32 %v11161_v56, %v11159_v23  ;;  %v11717_v7 = vpop.f32.mrf.mxu1 }
 0x20f   : > { %v9557_v28 = vpop.f32.mrf.mxu0 }
 0x210   : > { %v3783_v17 = vsel %vm204_vm1, %v11668_v36, 0.0  ;;  %v11684_v53 = vadd.f32 %v9557_v28, %v3364_v31  ;;  %v14250_v28 = vld [vmem:[#allocation67_spill] sm:$0xff] }
 0x211   : > { %v3602_v45 = vpop.f32.mrf.mxu0  ;;  %v3785_v52 = vadd.f32 %v3784_v0, %v3783_v17  ;;  %v2591_v31 = vadd.f32 %v14250_v28, %v2201_v62  ;;  %v14253_v17 = vld [vmem:[#allocation51_spill] sm:$0xff]  ;;  %v3369_v0 = vadd.f32 %v11591_v48, %v2979_v39 }
 0x212   : > { %v11686_v34 = vadd.f32 %v3602_v45, %v3363_v8  ;;  %v3788_v58 = vsel %vm204_vm1, %v11684_v53, 0.0  ;;  %v14252_v8 = vld [vmem:[#allocation49_spill] sm:$0xff]  ;;  %v1427_v23 = vadd.f32 %v14253_v17, %v975_v1  ;;  %v14254_v45 = vld [vmem:[#allocation88_spill] sm:$0xff] }
 0x213   : > { %v9560_v38 = vpop.f32.mrf.mxu0  ;;  %v1815_v32 = vadd.f32 %v14252_v8, %v14251_v30  ;;  %v3370_v33 = vadd.f32 %v11584_v14, %v14254_v45  ;;  %v14265_v30 = vld [vmem:[#allocation33_spill] sm:$0xff]  ;;  %v14267_v45 = vld [vmem:[#allocation71_spill] sm:$0xff] }
 0x214   : > { %v3786_v5 = vsel %vm204_vm1, %v11686_v34, 0.0  ;;  %v11702_v46 = vadd.f32 %v9560_v38, %v3366_v20  ;;  %v14256_v20 = vld [vmem:[#allocation55_spill] sm:$0xff] }
 0x215   : > { %v3787_v42 = vadd.f32 %v3786_v5, %v3785_v52  ;;  %v3612_v49 = vpop.f32.mrf.mxu0  ;;  %v2981_v52 = vadd.f32 %v14255_v6, %v2591_v31  ;;  %v14258_v5 = vld [vmem:[#allocation69_spill] sm:$0xff]  ;;  %v14268_v6 = vld [vmem:[#allocation54_spill] sm:$0xff] }
 0x216   : > { %v11704_v18 = vadd.f32 %v3612_v49, %v3365_v50  ;;  %v3792_v37 = vsel %vm204_vm1, %v11702_v46, 0.0  ;;  %v14257_v50 = vld [vmem:[#allocation31_spill] sm:$0xff]  ;;  %v2593_v40 = vadd.f32 %v14258_v5, %v2203_v22  ;;  %v3372_v22 = vadd.f32 %v11598_v4, %v14262_v15 }
 0x217   : > { %v3789_v12 = vadd.f32 %v3788_v58, %v3787_v42  ;;  %v9563_v54 = vpop.f32.mrf.mxu0  ;;  %v985_v43 = vadd.f32 %v14257_v50, %v14256_v20  ;;  %v11738_v42 = vpop.f32.mrf.mxu1  ;;  %v14259_v58 = vld [vmem:[#allocation70_spill] sm:$0xff]  ;;  %v14270_v5 = vld [vmem:[#allocation91_spill] sm:$0xff] }
 0x218   : > { %v3790_v27 = vsel %vm204_vm1, %v11704_v18, 0.0  ;;  %v11722_v11 = vadd.f32 %v9563_v54, %v3368_v44  ;;  %v2205_v19 = vadd.f32 %v14259_v58, %v1815_v32  ;;  %v14260_v54 = vld [vmem:[#allocation52_spill] sm:$0xff] }
 0x219   : > { %v3791_v9 = vadd.f32 %v3790_v27, %v3789_v12  ;;  %v3622_v61 = vpop.f32.mrf.mxu0  ;;  %v1817_v44 = vadd.f32 %v14260_v54, %v1427_v23  ;;  %v14266_v32 = vld [vmem:[#allocation72_spill] sm:$0xff]  ;;  %v11758_v23 = vpop.f32.mrf.mxu1  ;;  %v14273_v54 = vld [vmem:[#allocation39_spill] sm:$0xff] }
 0x21a   : > { %v11724_v10 = vadd.f32 %v3622_v61, %v3367_v24  ;;  %v3796_v14 = vsel %vm204_vm1, %v11722_v11, 0.0  ;;  %v14261_v24 = vld [vmem:[#allocation53_spill] sm:$0xff]  ;;  %v14263_v61 = vld [vmem:[#allocation92_spill] sm:$0xff] }
 0x21b   : > { %v3793_v56 = vadd.f32 %v3792_v37, %v3791_v9  ;;  %v9566_v26 = vpop.f32.mrf.mxu0  ;;  %v1429_v39 = vadd.f32 %v14261_v24, %v985_v43  ;;  %v3371_v9 = vadd.f32 %v11605_v16, %v2981_v52  ;;  %v2983_v28 = vadd.f32 %v14263_v61, %v2593_v40  ;;  %v14264_v37 = vld [vmem:[#allocation32_spill] sm:$0xff]  ;;  %v14274_v24 = vld [vmem:[#allocation73_spill] sm:$0xff] }
 0x21c   : > { %v3794_v38 = vsel %vm204_vm1, %v11724_v10, 0.0  ;;  %v11743_v48 = vadd.f32 %v9566_v26, %v3370_v33  ;;  %v995_v8 = vadd.f32 %v14265_v30, %v14264_v37  ;;  %v2207_v17 = vadd.f32 %v14266_v32, %v1817_v44  ;;  %v14277_v37 = vld [vmem:[#allocation57_spill] sm:$0xff] }
 0x21d   : > { %v3795_v49 = vadd.f32 %v3794_v38, %v3793_v56  ;;  %v3632_v62 = vpop.f32.mrf.mxu0  ;;  %v2595_v33 = vadd.f32 %v14267_v45, %v2205_v19  ;;  %v1819_v52 = vadd.f32 %v14268_v6, %v1429_v39  ;;  %v14269_v38 = vld [vmem:[#allocation42_spill] sm:$0xff]  ;;  %v3374_v40 = vadd.f32 %v11612_v2, %v14270_v5  ;;  %v11778_v39 = vpop.f32.mrf.mxu1  ;;  %v14279_v45 = vld [vmem:[#allocation96_spill] sm:$0xff] }
 0x21e   : > { %v11745_v12 = vadd.f32 %v3632_v62, %v3369_v0  ;;  %v3800_v4 = vsel %vm204_vm1, %v11743_v48, 0.0  ;;  %v1431_v20 = vadd.f32 %v14269_v38, %v995_v8  ;;  %v14271_v62 = vld [vmem:[#allocation94_spill] sm:$0xff]  ;;  %v14280_v6 = vld [vmem:[#allocation40_spill] sm:$0xff] }
 0x21f   : > { %v3797_v27 = vadd.f32 %v3796_v14, %v3795_v49  ;;  %v9569_v1 = vpop.f32.mrf.mxu0  ;;  %v3373_v49 = vadd.f32 %v11619_v55, %v2983_v28  ;;  %v2985_v58 = vadd.f32 %v14271_v62, %v2595_v33  ;;  %v14272_v14 = vld [vmem:[#allocation37_spill] sm:$0xff]  ;;  %v14276_v28 = vld [vmem:[#allocation56_spill] sm:$0xff] }
 0x220   : > { %v3798_v31 = vsel %vm204_vm1, %v11745_v12, 0.0  ;;  %v11763_v16 = vadd.f32 %v9569_v1, %v3372_v22  ;;  %v1005_v44 = vadd.f32 %v14273_v54, %v14272_v14  ;;  %v14275_v22 = vld [vmem:[#allocation74_spill] sm:$0xff]  ;;  %v14285_v54 = vld [vmem:[#allocation59_spill] sm:$0xff] }
 0x221   : > { %v3799_v56 = vadd.f32 %v3798_v31, %v3797_v27  ;;  %v3642_v26 = vpop.f32.mrf.mxu0  ;;  %v2597_v27 = vadd.f32 %v14274_v24, %v2207_v17  ;;  %v1821_v31 = vadd.f32 %v14276_v28, %v1431_v20  ;;  %v14278_v17 = vld [vmem:[#allocation93_spill] sm:$0xff]  ;;  %v11798_v20 = vpop.f32.mrf.mxu1 }
 0x222   : > { %v11765_v0 = vadd.f32 %v3642_v26, %v3371_v9  ;;  %v2209_v9 = vadd.f32 %v14275_v22, %v1819_v52  ;;  %v3804_v2 = vsel %vm204_vm1, %v11763_v16, 0.0  ;;  %v1433_v30 = vadd.f32 %v14277_v37, %v1005_v44  ;;  %v14281_v52 = vld [vmem:[#allocation41_spill] sm:$0xff]  ;;  %v14289_v37 = vld [vmem:[#allocation44_spill] sm:$0xff] }
 0x223   : > { %v3801_v50 = vadd.f32 %v3800_v4, %v3799_v56  ;;  %v9572_v43 = vpop.f32.mrf.mxu0  ;;  %v3376_v56 = vadd.f32 %v11628_v3, %v14278_v17  ;;  %v3375_v26 = vadd.f32 %v11638_v57, %v2985_v58  ;;  %v2987_v33 = vadd.f32 %v14279_v45, %v2597_v27  ;;  %v14291_v45 = vld [vmem:[#allocation78_spill] sm:$0xff] }
 0x224   : > { %v3802_v19 = vsel %vm204_vm1, %v11765_v0, 0.0  ;;  %v11783_v55 = vadd.f32 %v9572_v43, %v3374_v40  ;;  %v1015_v38 = vadd.f32 %v14281_v52, %v14280_v6 }
 0x225   : > { %v3803_v1 = vadd.f32 %v3802_v19, %v3801_v50  ;;  %v3652_v15 = vpop.f32.mrf.mxu0  ;;  %v14282_v50 = vld [vmem:[#allocation76_spill] sm:$0xff]  ;;  %v14284_v19 = vld [vmem:[#allocation58_spill] sm:$0xff]  ;;  %v3377_v22 = vadd.f32 %v11662_v51, %v2987_v33 }
 0x226   : > { %v11785_v61 = vadd.f32 %v3652_v15, %v3373_v49  ;;  %v2211_v43 = vadd.f32 %v14282_v50, %v1821_v31  ;;  %v14283_v49 = vld [vmem:[#allocation75_spill] sm:$0xff]  ;;  %v3808_v3 = vsel %vm204_vm1, %v11783_v55, 0.0  ;;  %v1823_v14 = vadd.f32 %v14284_v19, %v1433_v30  ;;  %v3322_v30 = vpop.f32.mrf.mxu1  ;;  %v14292_v33 = vld [vmem:[#allocation60_spill] sm:$0xff] }
 0x227   : > { %v3805_v8 = vadd.f32 %v3804_v2, %v3803_v1  ;;  %v9575_v32 = vpop.f32.mrf.mxu0  ;;  %v2599_v62 = vadd.f32 %v14283_v49, %v2209_v9  ;;  %v1435_v44 = vadd.f32 %v14285_v54, %v1015_v38  ;;  %v14286_v1 = vld [vmem:[#allocation95_spill] sm:$0xff]  ;;  %v14287_v2 = vld [vmem:[#allocation98_spill] sm:$0xff]  ;;  %v14293_v38 = vld [vmem:[#allocation61_spill] sm:$0xff] }
 0x228   : > { %v3806_v4 = vsel %vm204_vm1, %v11785_v61, 0.0  ;;  %v11803_v57 = vadd.f32 %v9575_v32, %v3376_v56  ;;  %v3378_v15 = vadd.f32 %v11650_v29, %v14286_v1  ;;  %v14288_v31 = vld [vmem:[#allocation43_spill] sm:$0xff]  ;;  %v14290_v32 = vld [vmem:[#allocation77_spill] sm:$0xff]  ;;  %v14298_v1 = vld [vmem:[#allocation80_spill] sm:$0xff] }
 0x229   : > { %v3807_v5 = vadd.f32 %v3806_v4, %v3805_v8  ;;  %v3662_v40 = vpop.f32.mrf.mxu0  ;;  %v2989_v9 = vadd.f32 %v14287_v2, %v2599_v62  ;;  %v1025_v8 = vadd.f32 %v14289_v37, %v14288_v31  ;;  %v2601_v17 = vadd.f32 %v14290_v32, %v2211_v43  ;;  %v14294_v49 = vld [vmem:[#allocation97_spill] sm:$0xff]  ;;  %v14301_v32 = vld [vmem:[#allocation63_spill] sm:$0xff] }
 0x22a   : > { %v11805_v58 = vadd.f32 %v3662_v40, %v3375_v26  ;;  %v2213_v4 = vadd.f32 %v14291_v45, %v1823_v14  ;;  %v3812_v29 = vsel %vm204_vm1, %v11803_v57, 0.0  ;;  %v1825_v52 = vadd.f32 %v14292_v33, %v1435_v44  ;;  %v14296_v54 = vld [vmem:[#allocation45_spill] sm:$0xff]  ;;  %v9543_v44 = vpop.f32.mrf.mxu1  ;;  %v14302_v45 = vld [vmem:[#allocation99_spill] sm:$0xff] }
 0x22b   : > { %v3809_v24 = vadd.f32 %v3808_v3, %v3807_v5  ;;  %v9578_v27 = vpop.f32.mrf.mxu0  ;;  %v1437_v50 = vadd.f32 %v14293_v38, %v1025_v8  ;;  %v3380_v43 = vadd.f32 %v11679_v35, %v14294_v49  ;;  %v3379_v62 = vadd.f32 %v11697_v41, %v2989_v9  ;;  %v14295_v3 = vld [vmem:[#allocation100_spill] sm:$0xff]  ;;  %v14300_v9 = vld [vmem:[#allocation62_spill] sm:$0xff] }
 0x22c   : > { %v3810_v28 = vsel %vm204_vm1, %v11805_v58, 0.0  ;;  %v11821_v6 = vadd.f32 %v9578_v27, %v3378_v15  ;;  %v2991_v19 = vadd.f32 %v14295_v3, %v2601_v17  ;;  %v2215_v15 = vadd.f32 %v14298_v1, %v1825_v52  ;;  %v14303_v52 = vld [vmem:[#allocation102_spill] sm:$0xff] }
 0x22d   : > { %v3811_v56 = vadd.f32 %v3810_v28, %v3809_v24  ;;  %v3672_v26 = vpop.f32.mrf.mxu0  ;;  %v14297_v24 = vld [vmem:[#allocation46_spill] sm:$0xff]  ;;  %v14299_v28 = vld [vmem:[#allocation79_spill] sm:$0xff]  ;;  %v1827_v8 = vadd.f32 %v14300_v9, %v1437_v50  ;;  %v3332_v50 = vpop.f32.mrf.mxu1 }
 0x22e   : > { %v11823_v51 = vadd.f32 %v3672_v26, %v3377_v22  ;;  %v1035_v27 = vadd.f32 %v14297_v24, %v14296_v54  ;;  %v2603_v31 = vadd.f32 %v14299_v28, %v2213_v4  ;;  %v3816_v35 = vsel %vm204_vm1, %v11821_v6, 0.0  ;;  %v14307_v54 = vld [vmem:[#allocation82_spill] sm:$0xff] }
 0x22f   : > { %v3813_v5 = vadd.f32 %v3812_v29, %v3811_v56  ;;  %v9581_v40 = vpop.f32.mrf.mxu0  ;;  %v3382_v29 = vadd.f32 %v11717_v7, %v14302_v45  ;;  %v3381_v33 = vadd.f32 %v11738_v42, %v2991_v19  ;;  %v2217_v24 = vadd.f32 %v14307_v54, %v1827_v8  ;;  %v14308_v19 = vld [vmem:[#allocation64_spill] sm:$0xff] }
 0x230   : > { %v3814_v14 = vsel %vm204_vm1, %v11823_v51, 0.0  ;;  %v11839_v37 = vadd.f32 %v9581_v40, %v3380_v43  ;;  %v1439_v17 = vadd.f32 %v14301_v32, %v1035_v27  ;;  %v2993_v4 = vadd.f32 %v14303_v52, %v2603_v31  ;;  %v14305_v40 = vld [vmem:[#allocation48_spill] sm:$0xff]  ;;  %v14306_v43 = vld [vmem:[#allocation81_spill] sm:$0xff] }
 0x231   : > { %v3815_v22 = vadd.f32 %v3814_v14, %v3813_v5  ;;  %v3682_v2 = vpop.f32.mrf.mxu0  ;;  %v14304_v5 = vld [vmem:[#allocation47_spill] sm:$0xff]  ;;  %v14311_v32 = vld [vmem:[#allocation104_spill] sm:$0xff] }
 0x232   : > { %v11841_v41 = vadd.f32 %v3682_v2, %v3379_v62  ;;  %v1045_v49 = vadd.f32 %v14305_v40, %v14304_v5  ;;  %v2605_v62 = vadd.f32 %v14306_v43, %v2215_v15  ;;  %v3820_v7 = vsel %vm204_vm1, %v11839_v37, 0.0 }
 0x233   : > { %v3817_v56 = vadd.f32 %v3816_v35, %v3815_v22  ;;  %v9584_v26 = vpop.f32.mrf.mxu0  ;;  %v1829_v1 = vadd.f32 %v14308_v19, %v1439_v17  ;;  %v14309_v22 = vld [vmem:[#allocation65_spill] sm:$0xff]  ;;  %v3383_v9 = vadd.f32 %v11778_v39, %v2993_v4  ;;  %v14313_v17 = vld [vmem:[#allocation83_spill] sm:$0xff]  ;;  %v14314_v39 = vld [vmem:[#allocation66_spill] sm:$0xff] }
 0x234   : > { %v3818_v38 = vsel %vm204_vm1, %v11841_v41, 0.0  ;;  %v11857_v27 = vadd.f32 %v9584_v26, %v3382_v29  ;;  %v1441_v2 = vadd.f32 %v14309_v22, %v1045_v49  ;;  %v14310_v35 = vld [vmem:[#allocation101_spill] sm:$0xff]  ;;  %v2995_v8 = vadd.f32 %v14311_v32, %v2605_v62  ;;  %v14312_v26 = vld [vmem:[#allocation84_spill] sm:$0xff]  ;;  %v9546_v29 = vpop.f32.mrf.mxu1  ;;  %v14315_v62 = vld [vmem:[#allocation103_spill] sm:$0xff] }
 0x235   : > { %v3819_v3 = vadd.f32 %v3818_v38, %v3817_v56  ;;  %v3692_v14 = vpop.f32.mrf.mxu0  ;;  %v3384_v15 = vadd.f32 %v11758_v23, %v14310_v35  ;;  %v2219_v45 = vadd.f32 %v14312_v26, %v1829_v1  ;;  %v2607_v38 = vadd.f32 %v14313_v17, %v2217_v24 }
 0x236   : > { %v11859_v42 = vadd.f32 %v3692_v14, %v3381_v33  ;;  %v3824_v5 = vsel %vm204_vm1, %v11857_v27, 0.0  ;;  %v1831_v4 = vadd.f32 %v14314_v39, %v1441_v2  ;;  %v3385_v14 = vadd.f32 %v3322_v30, %v2995_v8  ;;  %v3342_v1 = vpop.f32.mrf.mxu1 }
 0x237   : > { %v3821_v28 = vadd.f32 %v3820_v7, %v3819_v3  ;;  %v9587_v31 = vpop.f32.mrf.mxu0  ;;  %v3386_v3 = vadd.f32 %v11798_v20, %v14315_v62  ;;  %v2997_v54 = vadd.f32 %v11630_v47, %v2607_v38  ;;  %v14316_v7 = vld [vmem:[#allocation85_spill] sm:$0xff]  ;;  %v3388_v47 = vadd.f32 %v9543_v44, %v11626_v21 }
 0x238   : > { %v3822_v56 = vsel %vm204_vm1, %v11859_v42, 0.0  ;;  %v11873_v40 = vadd.f32 %v9587_v31, %v3384_v15  ;;  %v2609_v19 = vadd.f32 %v14316_v7, %v2219_v45  ;;  %v14317_v31 = vld [vmem:[#allocation86_spill] sm:$0xff]  ;;  %v9549_v26 = vpop.f32.mrf.mxu1  ;;  %v3390_v21 = vadd.f32 %v9546_v29, %v11636_v59 }
 0x239   : > { %v3823_v33 = vadd.f32 %v3822_v56, %v3821_v28  ;;  %v3702_v52 = vpop.f32.mrf.mxu0  ;;  %v2221_v35 = vadd.f32 %v14317_v31, %v1831_v4  ;;  %v3387_v32 = vadd.f32 %v3332_v50, %v2997_v54 }
 0x23a   : > { %v11875_v23 = vadd.f32 %v3702_v52, %v3383_v9  ;;  %v3828_v2 = vsel %vm204_vm1, %v11873_v40, 0.0  ;;  %v2999_v8 = vadd.f32 %v11640_v25, %v2609_v19  ;;  %v14318_v52 = vld [vmem:[#allocation87_spill] sm:$0xff] }
 0x23b   : > { %v3825_v49 = vadd.f32 %v3824_v5, %v3823_v33  ;;  %v9590_v43 = vpop.f32.mrf.mxu0  ;;  %v2611_v17 = vadd.f32 %v14318_v52, %v2221_v35 }
 0x23c   : > { %v3826_v24 = vsel %vm204_vm1, %v11875_v23, 0.0  ;;  %v11887_v15 = vadd.f32 %v9590_v43, %v3386_v3  ;;  %v3389_v44 = vadd.f32 %v3342_v1, %v2999_v8  ;;  %v3352_v43 = vpop.f32.mrf.mxu1 }
 0x23d   : > { %v3827_v22 = vadd.f32 %v3826_v24, %v3825_v49  ;;  %v3712_v28 = vpop.f32.mrf.mxu0  ;;  %v3001_v25 = vadd.f32 %v11652_v63, %v2611_v17  ;;  %v8247_v17 = vld [vmem:[%s14018_s2 + $0x4] sm:$0xf] }
 0x23e   : > { %v11889_v9 = vadd.f32 %v3712_v28, %v3385_v14  ;;  %v3832_v38 = vsel %vm204_vm1, %v11887_v15, 0.0  ;;  %9600 = vmatprep.subr.msk.mxu1 %vm500_vm0, %v8247_v17 }
 0x23f   : > { %v3829_v20 = vadd.f32 %v3828_v2, %v3827_v22  ;;  %v9593_v30 = vpop.f32.mrf.mxu0  ;;  %v3392_v22 = vadd.f32 %v9549_v26, %v11648_v13  ;;  %v3391_v28 = vadd.f32 %v3352_v43, %v3001_v25  ;;  %9601 = vmatpush3.msk.msra.mxu1 %vm500_vm0, %v8247_v17 }
 0x240   : > { %v3830_v56 = vsel %vm204_vm1, %v11889_v9, 0.0  ;;  %v3778_v5 = vadd.f32 %v9593_v30, %v3388_v47 }
 0x241   : > { %v3831_v45 = vadd.f32 %v3830_v56, %v3829_v20  ;;  %v3722_v33 = vpop.f32.mrf.mxu0 }
 0x242   : > { %v3777_v39 = vadd.f32 %v3722_v33, %v3387_v32  ;;  %v3836_v14 = vsel %vm204_vm1, %v3778_v5, 0.0 }
 0x243   : > { %v3833_v4 = vadd.f32 %v3832_v38, %v3831_v45  ;;  %v9596_v49 = vpop.f32.mrf.mxu0  ;;  %v4163_v38 = vld [vmem:[%s14018_s2] sm:$0xf] }
 0x244   : > { %v3834_v50 = vsel %vm204_vm1, %v3777_v39, 0.0  ;;  %v3780_v54 = vadd.f32 %v9596_v49, %v3390_v21  ;;  %9650 = vmatprep.subr.msk.mxu0 %vm500_vm0, %v4163_v38 }
 0x245   : > { %v3835_v62 = vadd.f32 %v3834_v50, %v3833_v4  ;;  %v3732_v3 = vpop.f32.mrf.mxu0  ;;  %9651 = vmatpush3.msk.msra.mxu0 %vm500_vm0, %v4163_v38 }
 0x246   : > { %v3779_v24 = vadd.f32 %v3732_v3, %v3389_v44  ;;  %v3840_v63 = vsel %vm204_vm1, %v3780_v54, 0.0 }
 0x247   : > { %v3837_v7 = vadd.f32 %v3836_v14, %v3835_v62  ;;  %v9599_v19 = vpop.f32.mrf.mxu0 }
 0x248   : > { %v3838_v31 = vsel %vm204_vm1, %v3779_v24, 0.0  ;;  %v3782_v1 = vadd.f32 %v9599_v19, %v3392_v22 }
 0x249   : > { %v3839_v59 = vadd.f32 %v3838_v31, %v3837_v7  ;;  %v3742_v29 = vpop.f32.mrf.mxu0 }
 0x24a   : > { %v3781_v35 = vadd.f32 %v3742_v29, %v3391_v28  ;;  %v3844_v47 = vsel %vm204_vm1, %v3782_v1, 0.0 }
 0x24b   : > { %v3841_v2 = vadd.f32 %v3840_v63, %v3839_v59 }
 0x24c   : > { %v3842_v20 = vsel %vm204_vm1, %v3781_v35, 0.0 }
 0x24d   : > { %v3843_v30 = vadd.f32 %v3842_v20, %v3841_v2 }
 0x24f   : > { %v3845_v32 = vadd.f32 %v3844_v47, %v3843_v30 }
 0x251   : > { %v3846_v8 = vrot.slane %v3845_v32, 4 }
 0x253   : > { %v3847_v56 = vadd.f32 %v3846_v8, %v3845_v32 }
 0x255   : > { %v3848_v45 = vrot.slane %v3847_v56, 2 }
 0x257   : > { %v3849_v13 = vadd.f32 %v3848_v45, %v3847_v56 }
 0x259   : > { %v3850_v26 = vrot.slane %v3849_v13, 1 }
 0x25b   : > { %v3851_v33 = vadd.f32 %v3850_v26, %v3849_v13 }
 0x25d   : > { %v3852_v52 = vmul.f32 0.00390625, %v3851_v33 }
 0x25f   : > { %v11918_v4 = vsub.f32 %v11765_v0, %v3852_v52  ;;  %v11921_v49 = vsub.f32 %v11763_v16, %v3852_v52  ;;  %v11924_v21 = vsub.f32 %v11785_v61, %v3852_v52  ;;  %v11927_v44 = vsub.f32 %v11783_v55, %v3852_v52 }
 0x260   : > { %v11930_v25 = vsub.f32 %v11805_v58, %v3852_v52  ;;  %v11933_v50 = vsub.f32 %v11803_v57, %v3852_v52  ;;  %v11936_v43 = vsub.f32 %v11823_v51, %v3852_v52  ;;  %v11939_v0 = vsub.f32 %v11821_v6, %v3852_v52 }
 0x261   : > { %v11942_v16 = vsub.f32 %v11841_v41, %v3852_v52  ;;  %v11945_v61 = vsub.f32 %v11839_v37, %v3852_v52  ;;  %v11948_v55 = vsub.f32 %v11859_v42, %v3852_v52  ;;  %v11951_v58 = vsub.f32 %v11857_v27, %v3852_v52 }
 0x262   : > { %v11954_v57 = vsub.f32 %v11875_v23, %v3852_v52  ;;  %v11957_v51 = vsub.f32 %v11873_v40, %v3852_v52  ;;  %v11960_v6 = vsub.f32 %v11889_v9, %v3852_v52  ;;  %v11963_v41 = vsub.f32 %v11887_v15, %v3852_v52  ;;  %v11986_v15 = vld [vmem:[%s14018_s2 + $0x8] sm:$0xf] }
 0x263   : > { %v11965_v37 = vsub.f32 %v3777_v39, %v3852_v52  ;;  %v11967_v62 = vsub.f32 %v3778_v5, %v3852_v52  ;;  %v11969_v42 = vsub.f32 %v3779_v24, %v3852_v52  ;;  %v11971_v27 = vsub.f32 %v3780_v54, %v3852_v52  ;;  %9700 = vmatprep.subr.msk.mxu1 %vm500_vm0, %v11986_v15 }
 0x264   : > { %v11973_v3 = vsub.f32 %v3781_v35, %v3852_v52  ;;  %v11975_v23 = vsub.f32 %v3782_v1, %v3852_v52  ;;  %v11978_v40 = vsub.f32 %v11668_v36, %v3852_v52  ;;  %v11981_v9 = vsub.f32 %v11666_v60, %v3852_v52 }
 0x265   : > { %v11991_v5 = vsub.f32 %v11686_v34, %v3852_v52  ;;  %v11994_v39 = vsub.f32 %v11684_v53, %v3852_v52  ;;  %v12001_v14 = vsub.f32 %v11704_v18, %v3852_v52  ;;  %v12006_v24 = vsub.f32 %v11702_v46, %v3852_v52 }
 0x266   : > { %v3885_v36 = vmul.f32 %v11978_v40, %v11978_v40  ;;  %v3886_v60 = vmul.f32 %v11981_v9, %v11981_v9  ;;  %v12013_v22 = vsub.f32 %v11724_v10, %v3852_v52  ;;  %v12019_v46 = vsub.f32 %v11722_v11, %v3852_v52 }
 0x267   : > { %v3887_v54 = vmul.f32 %v11991_v5, %v11991_v5  ;;  %v3888_v34 = vmul.f32 %v11994_v39, %v11994_v39  ;;  %v3889_v18 = vmul.f32 %v12001_v14, %v12001_v14  ;;  %v3890_v59 = vmul.f32 %v12006_v24, %v12006_v24 }
 0x268   : > { %v3917_v53 = vsel %vm204_vm1, %v3885_v36, 0.0  ;;  %v3918_v7 = vsel %vm204_vm1, %v3886_v60, 0.0  ;;  %v12025_v1 = vsub.f32 %v11745_v12, %v3852_v52  ;;  %v3891_v10 = vmul.f32 %v12013_v22, %v12013_v22 }
 0x269   : > { %v3919_v19 = vadd.f32 %v3918_v7, %v3917_v53  ;;  %v3920_v28 = vsel %vm204_vm1, %v3887_v54, 0.0  ;;  %v3922_v29 = vsel %vm204_vm1, %v3888_v34, 0.0  ;;  %v3924_v35 = vsel %vm204_vm1, %v3889_v18, 0.0 }
 0x26a   : > { %v12031_v20 = vsub.f32 %v11743_v48, %v3852_v52  ;;  %v3892_v11 = vmul.f32 %v12019_v46, %v12019_v46  ;;  %v3926_v30 = vsel %vm204_vm1, %v3890_v59, 0.0  ;;  %v3893_v32 = vmul.f32 %v12025_v1, %v12025_v1 }
 0x26b   : > { %v3921_v31 = vadd.f32 %v3920_v28, %v3919_v19  ;;  %v3928_v12 = vsel %vm204_vm1, %v3891_v10, 0.0  ;;  %v3895_v48 = vmul.f32 %v11918_v4, %v11918_v4  ;;  %v3896_v52 = vmul.f32 %v11921_v49, %v11921_v49 }
 0x26c   : > { %v3894_v56 = vmul.f32 %v12031_v20, %v12031_v20  ;;  %v3930_v45 = vsel %vm204_vm1, %v3892_v11, 0.0  ;;  %v3932_v26 = vsel %vm204_vm1, %v3893_v32, 0.0  ;;  %v3897_v36 = vmul.f32 %v11924_v21, %v11924_v21 }
 0x26d   : > { %v3923_v63 = vadd.f32 %v3922_v29, %v3921_v31  ;;  %v3936_v60 = vsel %vm204_vm1, %v3895_v48, 0.0  ;;  %v3898_v34 = vmul.f32 %v11927_v44, %v11927_v44  ;;  %v3938_v53 = vsel %vm204_vm1, %v3896_v52, 0.0 }
 0x26e   : > { %v3934_v17 = vsel %vm204_vm1, %v3894_v56, 0.0  ;;  %v3899_v19 = vmul.f32 %v11930_v25, %v11930_v25  ;;  %v3940_v18 = vsel %vm204_vm1, %v3897_v36, 0.0  ;;  %v3900_v31 = vmul.f32 %v11933_v50, %v11933_v50 }
 0x26f   : > { %v3925_v2 = vadd.f32 %v3924_v35, %v3923_v63  ;;  %v3942_v59 = vsel %vm204_vm1, %v3898_v34, 0.0  ;;  %v3901_v63 = vmul.f32 %v11936_v43, %v11936_v43 }
 0x270   : > { %v3944_v10 = vsel %vm204_vm1, %v3899_v19, 0.0  ;;  %v3946_v11 = vsel %vm204_vm1, %v3900_v31, 0.0 }
 0x271   : > { %v3927_v47 = vadd.f32 %v3926_v30, %v3925_v2  ;;  %v3902_v2 = vmul.f32 %v11939_v0, %v11939_v0  ;;  %v3948_v32 = vsel %vm204_vm1, %v3901_v63, 0.0 }
 0x273   : > { %v3929_v8 = vadd.f32 %v3928_v12, %v3927_v47  ;;  %v3903_v47 = vmul.f32 %v11942_v16, %v11942_v16  ;;  %v3950_v56 = vsel %vm204_vm1, %v3902_v2, 0.0 }
 0x275   : > { %v3931_v13 = vadd.f32 %v3930_v45, %v3929_v8  ;;  %v3904_v8 = vmul.f32 %v11945_v61, %v11945_v61  ;;  %v3952_v48 = vsel %vm204_vm1, %v3903_v47, 0.0 }
 0x277   : > { %v3933_v33 = vadd.f32 %v3932_v26, %v3931_v13  ;;  %v3905_v13 = vmul.f32 %v11948_v55, %v11948_v55  ;;  %v3954_v52 = vsel %vm204_vm1, %v3904_v8, 0.0 }
 0x279   : > { %v3935_v38 = vadd.f32 %v3934_v17, %v3933_v33  ;;  %v3906_v33 = vmul.f32 %v11951_v58, %v11951_v58  ;;  %v3956_v36 = vsel %vm204_vm1, %v3905_v13, 0.0 }
 0x27b   : > { %v3937_v54 = vadd.f32 %v3936_v60, %v3935_v38  ;;  %v3907_v38 = vmul.f32 %v11954_v57, %v11954_v57  ;;  %v3958_v34 = vsel %vm204_vm1, %v3906_v33, 0.0  ;;  %v3916_v33 = vmul.f32 %v11975_v23, %v11975_v23 }
 0x27d   : > { %v3939_v7 = vadd.f32 %v3938_v53, %v3937_v54  ;;  %v3908_v54 = vmul.f32 %v11957_v51, %v11957_v51  ;;  %v3960_v19 = vsel %vm204_vm1, %v3907_v38, 0.0 }
 0x27f   : > { %v3941_v28 = vadd.f32 %v3940_v18, %v3939_v7  ;;  %v3909_v7 = vmul.f32 %v11960_v6, %v11960_v6  ;;  %v3962_v31 = vsel %vm204_vm1, %v3908_v54, 0.0 }
 0x281   : > { %v3943_v29 = vadd.f32 %v3942_v59, %v3941_v28  ;;  %v3910_v28 = vmul.f32 %v11963_v41, %v11963_v41  ;;  %v3964_v63 = vsel %vm204_vm1, %v3909_v7, 0.0 }
 0x283   : > { %v3945_v35 = vadd.f32 %v3944_v10, %v3943_v29  ;;  %v3911_v29 = vmul.f32 %v11965_v37, %v11965_v37  ;;  %v3966_v2 = vsel %vm204_vm1, %v3910_v28, 0.0 }
 0x285   : > { %v3947_v30 = vadd.f32 %v3946_v11, %v3945_v35  ;;  %v3912_v35 = vmul.f32 %v11967_v62, %v11967_v62  ;;  %v3968_v47 = vsel %vm204_vm1, %v3911_v29, 0.0 }
 0x287   : > { %v3949_v12 = vadd.f32 %v3948_v32, %v3947_v30  ;;  %v3913_v30 = vmul.f32 %v11969_v42, %v11969_v42  ;;  %v3970_v8 = vsel %vm204_vm1, %v3912_v35, 0.0 }
 0x289   : > { %v3951_v45 = vadd.f32 %v3950_v56, %v3949_v12  ;;  %v3914_v12 = vmul.f32 %v11971_v27, %v11971_v27  ;;  %v3972_v13 = vsel %vm204_vm1, %v3913_v30, 0.0 }
 0x28b   : > { %v3953_v26 = vadd.f32 %v3952_v48, %v3951_v45  ;;  %v3915_v45 = vmul.f32 %v11973_v3, %v11973_v3  ;;  %v12108_v48 = vld [vmem:[%s14018_s2 + $0xc] sm:$0xf] }
 0x28c   : > { %9750 = vmatprep.subr.msk.mxu0 %vm500_vm0, %v12108_v48 }
 0x28d   : > { %v3955_v17 = vadd.f32 %v3954_v52, %v3953_v26  ;;  %v3974_v52 = vsel %vm204_vm1, %v3914_v12, 0.0  ;;  %v3976_v38 = vsel %vm204_vm1, %v3915_v45, 0.0 }
 0x28f   : > { %v3957_v60 = vadd.f32 %v3956_v36, %v3955_v17 }
 0x291   : > { %v3959_v53 = vadd.f32 %v3958_v34, %v3957_v60  ;;  %v3978_v60 = vsel %vm204_vm1, %v3916_v33, 0.0 }
 0x293   : > { %v3961_v18 = vadd.f32 %v3960_v19, %v3959_v53 }
 0x295   : > { %v3963_v59 = vadd.f32 %v3962_v31, %v3961_v18 }
 0x297   : > { %v3965_v10 = vadd.f32 %v3964_v63, %v3963_v59 }
 0x299   : > { %v3967_v11 = vadd.f32 %v3966_v2, %v3965_v10 }
 0x29b   : > { %v3969_v32 = vadd.f32 %v3968_v47, %v3967_v11 }
 0x29d   : > { %v3971_v56 = vadd.f32 %v3970_v8, %v3969_v32 }
 0x29f   : > { %v3973_v26 = vadd.f32 %v3972_v13, %v3971_v56 }
 0x2a1   : > { %v3975_v17 = vadd.f32 %v3974_v52, %v3973_v26 }
 0x2a3   : > { %v3977_v36 = vadd.f32 %v3976_v38, %v3975_v17 }
 0x2a5   : > { %v3979_v54 = vadd.f32 %v3978_v60, %v3977_v36 }
 0x2a7   : > { %v3980_v34 = vrot.slane %v3979_v54, 4 }
 0x2a9   : > { %v3981_v53 = vadd.f32 %v3980_v34, %v3979_v54 }
 0x2ab   : > { %v3982_v7 = vrot.slane %v3981_v53, 2 }
 0x2ad   : > { %v3983_v19 = vadd.f32 %v3982_v7, %v3981_v53 }
 0x2af   : > { %v3984_v18 = vrot.slane %v3983_v19, 1 }
 0x2b1   : > { %v3985_v28 = vadd.f32 %v3984_v18, %v3983_v19 }
 0x2b3   : > { %v3986_v31 = vmul.f32 0.00390625, %v3985_v28 }
 0x2b5   : > { %v3987_v59 = vadd.f32 1e-05, %v3986_v31 }
 0x2b7   : > { %10058 = vrsqrt.f32 %v3987_v59 }
 0x2c4   : > { %v10059_v29 = vpop.eup %10058 }
 0x2c5   : > { %v4019_v63 = vmul.f32 %v10059_v29, %v11973_v3  ;;  %v3989_v10 = vmul.f32 %v10059_v29, %v11978_v40  ;;  %v3990_v35 = vmul.f32 %v10059_v29, %v11981_v9  ;;  %v3991_v2 = vmul.f32 %v10059_v29, %v11991_v5 }
 0x2c6   : > { %v3992_v11 = vmul.f32 %v10059_v29, %v11994_v39  ;;  %v3993_v30 = vmul.f32 %v10059_v29, %v12001_v14  ;;  %v3994_v47 = vmul.f32 %v10059_v29, %v12006_v24  ;;  %v3995_v32 = vmul.f32 %v10059_v29, %v12013_v22 }
 0x2c7   : > { %v4051_v12 = vmax.f32 %v4019_v63, 0.0  ;;  %v12126_v8 = vmul.f32 %v10059_v29, %v12019_v46  ;;  %v3997_v3 = vmul.f32 %v10059_v29, %v12025_v1  ;;  %v12130_v40 = vmul.f32 %v10059_v29, %v12031_v20 }
 0x2c8   : > { %v3999_v9 = vmul.f32 %v10059_v29, %v11918_v4  ;;  %v12134_v5 = vmul.f32 %v10059_v29, %v11921_v49  ;;  %v12137_v39 = vmul.f32 %v10059_v29, %v11924_v21  ;;  %v12140_v14 = vmul.f32 %v10059_v29, %v11927_v44 }
 0x2c9   : > { %4100 = vst.msk [vmem:[#allocation2 + $0x17f] sm:$0x2] %vm271_vm3, %v4051_v12  ;;  %v12144_v24 = vmul.f32 %v10059_v29, %v11930_v25  ;;  %v12147_v22 = vmul.f32 %v10059_v29, %v11933_v50  ;;  %v12150_v46 = vmul.f32 %v10059_v29, %v11936_v43  ;;  %v12153_v4 = vmul.f32 %v10059_v29, %v11939_v0 }
 0x2ca   : > { %4083 = vst.msk [vmem:[#allocation2 + $0x181] sm:$0xff] %vm204_vm1, %v4051_v12  ;;  %v12157_v49 = vmul.f32 %v10059_v29, %v11942_v16  ;;  %v12160_v21 = vmul.f32 %v10059_v29, %v11945_v61  ;;  %v12163_v44 = vmul.f32 %v10059_v29, %v11948_v55  ;;  %v12166_v25 = vmul.f32 %v10059_v29, %v11951_v58 }
 0x2cb   : > { %v12169_v50 = vmul.f32 %v10059_v29, %v11954_v57  ;;  %v12172_v43 = vmul.f32 %v10059_v29, %v11957_v51  ;;  %v12175_v0 = vmul.f32 %v10059_v29, %v11960_v6  ;;  %v12178_v16 = vmul.f32 %v10059_v29, %v11963_v41 }
 0x2cc   : > { %v12181_v61 = vmul.f32 %v10059_v29, %v11965_v37  ;;  %v12184_v55 = vmul.f32 %v10059_v29, %v11967_v62  ;;  %v12187_v58 = vmul.f32 %v10059_v29, %v11969_v42  ;;  %v12190_v57 = vmul.f32 %v10059_v29, %v11971_v27 }
 0x2cd   : > { %v12193_v51 = vmul.f32 %v10059_v29, %v11975_v23  ;;  %v4021_v6 = vmax.f32 %v3989_v10, 0.0  ;;  %v4022_v1 = vmax.f32 %v3990_v35, 0.0  ;;  %v4023_v20 = vmax.f32 %v3991_v2, 0.0 }
 0x2ce   : > { %v4024_v41 = vmax.f32 %v3992_v11, 0.0  ;;  %v4025_v56 = vmax.f32 %v3993_v30, 0.0  ;;  %v4026_v45 = vmax.f32 %v3994_v47, 0.0  ;;  %v4027_v37 = vmax.f32 %v3995_v32, 0.0 }
 0x2cf   : > { %v4028_v13 = vmax.f32 %v12126_v8, 0.0  ;;  %v4029_v62 = vmax.f32 %v3997_v3, 0.0  ;;  %v4030_v26 = vmax.f32 %v12130_v40, 0.0  ;;  %v4031_v42 = vmax.f32 %v3999_v9, 0.0  ;;  %4085 = vst.msk [vmem:[#allocation2 + $0x17] sm:$0x2] %vm271_vm3, %v4021_v6 }
 0x2d0   : > { %4086 = vst.msk [vmem:[#allocation2 + $0x2f] sm:$0x2] %vm271_vm3, %v4023_v20  ;;  %v4032_v27 = vmax.f32 %v12134_v5, 0.0  ;;  %v4033_v23 = vmax.f32 %v12137_v39, 0.0  ;;  %v4034_v33 = vmax.f32 %v12140_v14, 0.0  ;;  %v4035_v52 = vmax.f32 %v12144_v24, 0.0 }
 0x2d1   : > { %4101 = vst.msk [vmem:[#allocation2 + $0x23] sm:$0x40] %vm254_vm4, %v4022_v1  ;;  %4102 = vst.msk [vmem:[#allocation2 + $0x3b] sm:$0x40] %vm254_vm4, %v4024_v41  ;;  %v4036_v17 = vmax.f32 %v12147_v22, 0.0  ;;  %v4037_v38 = vmax.f32 %v12150_v46, 0.0 }
 0x2d2   : > { %4053 = vst.msk [vmem:[#allocation2 + $0x19] sm:$0xff] %vm204_vm1, %v4021_v6  ;;  %4054 = vst.msk [vmem:[#allocation2 + $0x21] sm:$0xff] %vm204_vm1, %v4022_v1  ;;  %v4038_v36 = vmax.f32 %v12153_v4, 0.0  ;;  %v4039_v60 = vmax.f32 %v12157_v49, 0.0  ;;  %v4040_v54 = vmax.f32 %v12160_v21, 0.0  ;;  %v4041_v34 = vmax.f32 %v12163_v44, 0.0 }
 0x2d3   : > { %4055 = vst.msk [vmem:[#allocation2 + $0x31] sm:$0xff] %vm204_vm1, %v4023_v20  ;;  %4056 = vst.msk [vmem:[#allocation2 + $0x39] sm:$0xff] %vm204_vm1, %v4024_v41  ;;  %v4042_v53 = vmax.f32 %v12166_v25, 0.0  ;;  %v4043_v7 = vmax.f32 %v12169_v50, 0.0  ;;  %v4044_v19 = vmax.f32 %v12172_v43, 0.0  ;;  %v4045_v18 = vmax.f32 %v12175_v0, 0.0 }
 0x2d4   : > { %4087 = vst.msk [vmem:[#allocation2 + $0x47] sm:$0x2] %vm271_vm3, %v4025_v56  ;;  %4088 = vst.msk [vmem:[#allocation2 + $0x5f] sm:$0x2] %vm271_vm3, %v4027_v37  ;;  %v4046_v28 = vmax.f32 %v12178_v16, 0.0  ;;  %v4047_v31 = vmax.f32 %v12181_v61, 0.0 }
 0x2d5   : > { %4103 = vst.msk [vmem:[#allocation2 + $0x53] sm:$0x40] %vm254_vm4, %v4026_v45  ;;  %4104 = vst.msk [vmem:[#allocation2 + $0x6b] sm:$0x40] %vm254_vm4, %v4028_v13  ;;  %v4048_v59 = vmax.f32 %v12184_v55, 0.0  ;;  %v4049_v29 = vmax.f32 %v12187_v58, 0.0 }
 0x2d6   : > { %4057 = vst.msk [vmem:[#allocation2 + $0x49] sm:$0xff] %vm204_vm1, %v4025_v56  ;;  %4058 = vst.msk [vmem:[#allocation2 + $0x51] sm:$0xff] %vm204_vm1, %v4026_v45  ;;  %v4050_v63 = vmax.f32 %v12190_v57, 0.0  ;;  %v4052_v10 = vmax.f32 %v12193_v51, 0.0  ;;  %v12296_v3 = vld [vmem:[%s14018_s2 + $0x10] sm:$0xf] }
 0x2d7   : > { %4059 = vst.msk [vmem:[#allocation2 + $0x61] sm:$0xff] %vm204_vm1, %v4027_v37  ;;  %4060 = vst.msk [vmem:[#allocation2 + $0x69] sm:$0xff] %vm204_vm1, %v4028_v13  ;;  %v12398_v58 = vld [vmem:[%s14018_s2 + $0x14] sm:$0xf] }
 0x2d8   : > { %4089 = vst.msk [vmem:[#allocation2 + $0x77] sm:$0x2] %vm271_vm3, %v4029_v62  ;;  %4090 = vst.msk [vmem:[#allocation2 + $0x8f] sm:$0x2] %vm271_vm3, %v4031_v42 }
 0x2d9   : > { %4061 = vst.msk [vmem:[#allocation2 + $0x79] sm:$0xff] %vm204_vm1, %v4029_v62  ;;  %4062 = vst.msk [vmem:[#allocation2 + $0x81] sm:$0xff] %vm204_vm1, %v4030_v26  ;;  %v12291_v8 = vld [vmem:[#allocation2 + $0x18] sm:$0xff]  ;;  %v12307_v9 = vld [vmem:[#allocation2 + $0x20] sm:$0xff] }
 0x2da   : > { %4063 = vst.msk [vmem:[#allocation2 + $0x91] sm:$0xff] %vm204_vm1, %v4031_v42  ;;  %4064 = vst.msk [vmem:[#allocation2 + $0x99] sm:$0xff] %vm204_vm1, %v4032_v27  ;;  %v12279_v35 = vld [vmem:[#allocation2 + $0x30] sm:$0xff]  ;;  %v12281_v2 = vld [vmem:[#allocation2 + $0x38] sm:$0xff] }
 0x2db   : > { %4105 = vst.msk [vmem:[#allocation2 + $0x83] sm:$0x40] %vm254_vm4, %v4030_v26  ;;  %4106 = vst.msk [vmem:[#allocation2 + $0x9b] sm:$0x40] %vm254_vm4, %v4032_v27  ;;  %v4119_v11 = vld [vmem:[#allocation2 + $0x40] sm:$0x3] }
 0x2dc   : > { %4091 = vst.msk [vmem:[#allocation2 + $0xa7] sm:$0x2] %vm271_vm3, %v4033_v23  ;;  %4092 = vst.msk [vmem:[#allocation2 + $0xbf] sm:$0x2] %vm271_vm3, %v4035_v52  ;;  %v12299_v40 = vld [vmem:[#allocation2 + $0x19] sm:$0xff]  ;;  %v12313_v5 = vld [vmem:[#allocation2 + $0x21] sm:$0xff] }
 0x2dd   : > { %4065 = vst.msk [vmem:[#allocation2 + $0xa9] sm:$0xff] %vm204_vm1, %v4033_v23  ;;  %4066 = vst.msk [vmem:[#allocation2 + $0xb1] sm:$0xff] %vm204_vm1, %v4034_v33  ;;  %v12329_v39 = vld [vmem:[#allocation2 + $0x48] sm:$0xff]  ;;  %v12341_v22 = vld [vmem:[#allocation2 + $0x50] sm:$0xff] }
 0x2de   : > { %4067 = vst.msk [vmem:[#allocation2 + $0xc1] sm:$0xff] %vm204_vm1, %v4035_v52  ;;  %4068 = vst.msk [vmem:[#allocation2 + $0xc9] sm:$0xff] %vm204_vm1, %v4036_v17  ;;  %v12333_v14 = vld [vmem:[#allocation2 + $0x49] sm:$0xff]  ;;  %v12347_v4 = vld [vmem:[#allocation2 + $0x51] sm:$0xff] }
 0x2df   : > { %4107 = vst.msk [vmem:[#allocation2 + $0xb3] sm:$0x40] %vm254_vm4, %v4034_v33  ;;  %4108 = vst.msk [vmem:[#allocation2 + $0xcb] sm:$0x40] %vm254_vm4, %v4036_v17  ;;  %v12351_v49 = vld [vmem:[#allocation2 + $0x60] sm:$0xff]  ;;  %v12363_v44 = vld [vmem:[#allocation2 + $0x68] sm:$0xff] }
 0x2e0   : > { %4093 = vst.msk [vmem:[#allocation2 + $0xd7] sm:$0x2] %vm271_vm3, %v4037_v38  ;;  %4094 = vst.msk [vmem:[#allocation2 + $0xef] sm:$0x2] %vm271_vm3, %v4039_v60  ;;  %v12357_v21 = vld [vmem:[#allocation2 + $0x61] sm:$0xff]  ;;  %v12365_v25 = vld [vmem:[#allocation2 + $0x69] sm:$0xff] }
 0x2e1   : > { %4069 = vst.msk [vmem:[#allocation2 + $0xd9] sm:$0xff] %vm204_vm1, %v4037_v38  ;;  %4070 = vst.msk [vmem:[#allocation2 + $0xe1] sm:$0xff] %vm204_vm1, %v4038_v36  ;;  %v12369_v50 = vld [vmem:[#allocation2 + $0x78] sm:$0xff]  ;;  %v12379_v0 = vld [vmem:[#allocation2 + $0x80] sm:$0xff] }
 0x2e2   : > { %4071 = vst.msk [vmem:[#allocation2 + $0xf1] sm:$0xff] %vm204_vm1, %v4039_v60  ;;  %4072 = vst.msk [vmem:[#allocation2 + $0xf9] sm:$0xff] %vm204_vm1, %v4040_v54  ;;  %v12373_v43 = vld [vmem:[#allocation2 + $0x79] sm:$0xff]  ;;  %v12381_v16 = vld [vmem:[#allocation2 + $0x81] sm:$0xff] }
 0x2e3   : > { %4109 = vst.msk [vmem:[#allocation2 + $0xe3] sm:$0x40] %vm254_vm4, %v4038_v36  ;;  %4110 = vst.msk [vmem:[#allocation2 + $0xfb] sm:$0x40] %vm254_vm4, %v4040_v54  ;;  %v12385_v61 = vld [vmem:[#allocation2 + $0x90] sm:$0xff]  ;;  %v12400_v57 = vld [vmem:[#allocation2 + $0x98] sm:$0xff] }
 0x2e4   : > { %4095 = vst.msk [vmem:[#allocation2 + $0x107] sm:$0x2] %vm271_vm3, %v4041_v34  ;;  %4096 = vst.msk [vmem:[#allocation2 + $0x11f] sm:$0x2] %vm271_vm3, %v4043_v7  ;;  %v12389_v55 = vld [vmem:[#allocation2 + $0x91] sm:$0xff]  ;;  %v12404_v51 = vld [vmem:[#allocation2 + $0x99] sm:$0xff] }
 0x2e5   : > { %4073 = vst.msk [vmem:[#allocation2 + $0x109] sm:$0xff] %vm204_vm1, %v4041_v34  ;;  %4074 = vst.msk [vmem:[#allocation2 + $0x111] sm:$0xff] %vm204_vm1, %v4042_v53  ;;  %v12408_v6 = vld [vmem:[#allocation2 + $0xa8] sm:$0xff]  ;;  %v12419_v41 = vld [vmem:[#allocation2 + $0xb0] sm:$0xff] }
 0x2e6   : > { %4075 = vst.msk [vmem:[#allocation2 + $0x121] sm:$0xff] %vm204_vm1, %v4043_v7  ;;  %4076 = vst.msk [vmem:[#allocation2 + $0x129] sm:$0xff] %vm204_vm1, %v4044_v19  ;;  %v12412_v1 = vld [vmem:[#allocation2 + $0xa9] sm:$0xff]  ;;  %v12421_v56 = vld [vmem:[#allocation2 + $0xb1] sm:$0xff] }
 0x2e7   : > { %4111 = vst.msk [vmem:[#allocation2 + $0x113] sm:$0x40] %vm254_vm4, %v4042_v53  ;;  %4112 = vst.msk [vmem:[#allocation2 + $0x12b] sm:$0x40] %vm254_vm4, %v4044_v19  ;;  %v12425_v45 = vld [vmem:[#allocation2 + $0xc0] sm:$0xff]  ;;  %v12435_v13 = vld [vmem:[#allocation2 + $0xc8] sm:$0xff] }
 0x2e8   : > { %4097 = vst.msk [vmem:[#allocation2 + $0x137] sm:$0x2] %vm271_vm3, %v4045_v18  ;;  %4098 = vst.msk [vmem:[#allocation2 + $0x14f] sm:$0x2] %vm271_vm3, %v4047_v31  ;;  %v12429_v37 = vld [vmem:[#allocation2 + $0xc1] sm:$0xff]  ;;  %v12437_v62 = vld [vmem:[#allocation2 + $0xc9] sm:$0xff] }
 0x2e9   : > { %4077 = vst.msk [vmem:[#allocation2 + $0x139] sm:$0xff] %vm204_vm1, %v4045_v18  ;;  %4078 = vst.msk [vmem:[#allocation2 + $0x141] sm:$0xff] %vm204_vm1, %v4046_v28  ;;  %v12441_v26 = vld [vmem:[#allocation2 + $0xd8] sm:$0xff]  ;;  %v12451_v27 = vld [vmem:[#allocation2 + $0xe0] sm:$0xff] }
 0x2ea   : > { %4079 = vst.msk [vmem:[#allocation2 + $0x151] sm:$0xff] %vm204_vm1, %v4047_v31  ;;  %4080 = vst.msk [vmem:[#allocation2 + $0x159] sm:$0xff] %vm204_vm1, %v4048_v59  ;;  %v12445_v42 = vld [vmem:[#allocation2 + $0xd9] sm:$0xff]  ;;  %v12453_v23 = vld [vmem:[#allocation2 + $0xe1] sm:$0xff] }
 0x2eb   : > { %4113 = vst.msk [vmem:[#allocation2 + $0x143] sm:$0x40] %vm254_vm4, %v4046_v28  ;;  %4116 = vst.msk [vmem:[#allocation2 + $0x18b] sm:$0x40] %vm254_vm4, %v4052_v10  ;;  %v12457_v33 = vld [vmem:[#allocation2 + $0xf0] sm:$0xff]  ;;  %v12467_v17 = vld [vmem:[#allocation2 + $0xf8] sm:$0xff] }
 0x2ec   : > { %4099 = vst.msk [vmem:[#allocation2 + $0x167] sm:$0x2] %vm271_vm3, %v4049_v29  ;;  %14319 = vst [vmem:[#allocation68_spill] sm:$0xff] %v12281_v2  ;;  %v12461_v52 = vld [vmem:[#allocation2 + $0xf1] sm:$0xff]  ;;  %v12469_v38 = vld [vmem:[#allocation2 + $0xf9] sm:$0xff] }
 0x2ed   : > { %4081 = vst.msk [vmem:[#allocation2 + $0x169] sm:$0xff] %vm204_vm1, %v4049_v29  ;;  %4082 = vst.msk [vmem:[#allocation2 + $0x171] sm:$0xff] %vm204_vm1, %v4050_v63  ;;  %v12473_v36 = vld [vmem:[#allocation2 + $0x108] sm:$0xff]  ;;  %v12483_v54 = vld [vmem:[#allocation2 + $0x110] sm:$0xff] }
 0x2ee   : > { %4084 = vst.msk [vmem:[#allocation2 + $0x189] sm:$0xff] %vm204_vm1, %v4052_v10  ;;  %4120 = vst.msk [vmem:[#allocation2] sm:$0xff] %vm204_vm1, %v12279_v35  ;;  %v12477_v60 = vld [vmem:[#allocation2 + $0x109] sm:$0xff]  ;;  %v12485_v34 = vld [vmem:[#allocation2 + $0x111] sm:$0xff] }
 0x2ef   : > { %4114 = vst.msk [vmem:[#allocation2 + $0x15b] sm:$0x40] %vm254_vm4, %v4048_v59  ;;  %4115 = vst.msk [vmem:[#allocation2 + $0x173] sm:$0x40] %vm254_vm4, %v4050_v63  ;;  %v12489_v53 = vld [vmem:[#allocation2 + $0x120] sm:$0xff]  ;;  %v12499_v19 = vld [vmem:[#allocation2 + $0x128] sm:$0xff] }
 0x2f0   : > { %4121 = vst.msk [vmem:[#allocation2 + $0x8] sm:$0xff] %vm204_vm1, %v12281_v2  ;;  %14320 = vst [vmem:[#allocation67_spill] sm:$0xff] %v12329_v39  ;;  %v12493_v7 = vld [vmem:[#allocation2 + $0x121] sm:$0xff]  ;;  %v12501_v18 = vld [vmem:[#allocation2 + $0x129] sm:$0xff] }
 0x2f1   : > { %4123 = vst.msk [vmem:[#allocation2 + $0x10] sm:$0x3] %vm4122_vm7, %v4119_v11  ;;  %14321 = vst [vmem:[#allocation50_spill] sm:$0xff] %v12341_v22  ;;  %v12505_v28 = vld [vmem:[#allocation2 + $0x138] sm:$0xff]  ;;  %v12515_v59 = vld [vmem:[#allocation2 + $0x140] sm:$0xff] }
 0x2f2   : > { %14323 = vst [vmem:[#allocation51_spill] sm:$0xff] %v12351_v49  ;;  %14324 = vst [vmem:[#allocation88_spill] sm:$0xff] %v12363_v44  ;;  %v12509_v31 = vld [vmem:[#allocation2 + $0x139] sm:$0xff]  ;;  %v12517_v29 = vld [vmem:[#allocation2 + $0x141] sm:$0xff] }
 0x2f3   : > { %14325 = vst [vmem:[#allocation90_spill] sm:$0xff] %v12369_v50  ;;  %14326 = vst [vmem:[#allocation55_spill] sm:$0xff] %v12379_v0  ;;  %v12521_v63 = vld [vmem:[#allocation2 + $0x150] sm:$0xff]  ;;  %v12531_v11 = vld [vmem:[#allocation2 + $0x158] sm:$0xff] }
 0x2f4   : > { %v12339_v24 = vld [vmem:[#allocation2 + $0x170] sm:$0xff]  ;;  %v12345_v46 = vld [vmem:[#allocation2 + $0x168] sm:$0xff]  ;;  %14327 = vst [vmem:[#allocation31_spill] sm:$0xff] %v12385_v61  ;;  %14328 = vst [vmem:[#allocation69_spill] sm:$0xff] %v12400_v57 }
 0x2f5   : > { %v4131_v30 = vld [vmem:[#allocation2] sm:$0xff]  ;;  %4129 = vst.msk [vmem:[#allocation2 + $0x1a0] sm:$0xff] %vm204_vm1, %v12339_v24  ;;  %14322 = vst [vmem:[#allocation49_spill] sm:$0xff] %v12345_v46  ;;  %v12525_v10 = vld [vmem:[#allocation2 + $0x151] sm:$0xff] }
 0x2f6   : > { %9652 = vmatprep.mubr.msk.f32.mxu0 %vm204_vm1, %v4131_v30  ;;  %4128 = vst.msk [vmem:[#allocation2 + $0x198] sm:$0xff] %vm204_vm1, %v12345_v46  ;;  %14329 = vst [vmem:[#allocation70_spill] sm:$0xff] %v12408_v6  ;;  %v4126_v20 = vld [vmem:[#allocation2 + $0x178] sm:$0x3] }
 0x2f7   : > { %v4164_v47 = vld [vmem:[#allocation2 + $0x1] sm:$0xff]  ;;  %4130 = vst.msk [vmem:[#allocation2 + $0x1a8] sm:$0x3] %vm4122_vm7, %v4126_v20  ;;  %14330 = vst [vmem:[#allocation52_spill] sm:$0xff] %v12419_v41  ;;  %v12533_v30 = vld [vmem:[#allocation2 + $0x159] sm:$0xff] }
 0x2f8   : > { %v4165_v32 = vld [vmem:[#allocation2 + $0x9] sm:$0xff]  ;;  %9602 = vmatprep.mubr.msk.f32.mxu1 %vm204_vm1, %v4164_v47  ;;  %14331 = vst [vmem:[#allocation53_spill] sm:$0xff] %v12425_v45  ;;  %14332 = vst [vmem:[#allocation89_spill] sm:$0xff] %v12435_v13 }
 0x2f9   : > { %v4132_v12 = vld [vmem:[#allocation2 + $0x8] sm:$0xff]  ;;  %9603 = vmatmul.mubr.msk.f32.vlgmr.msra.gmra.mxu1 %vm204_vm1, %v4165_v32  ;;  %14333 = vst [vmem:[#allocation92_spill] sm:$0xff] %v12441_v26  ;;  %14334 = vst [vmem:[#allocation32_spill] sm:$0xff] %v12451_v27  ;;  %v12545_v32 = vld [vmem:[#allocation2 + $0x171] sm:$0xff] }
 0x2fa   : > { %9653 = vmatmul.mubr.msk.f32.vlgmr.msra.gmra.mxu0 %vm204_vm1, %v4132_v12  ;;  %9701 = vmatpush3.msk.msra.mxu1 %vm500_vm0, %v11986_v15  ;;  %v12319_v15 = vld [vmem:[#allocation2 + $0x31] sm:$0xff]  ;;  %14335 = vst [vmem:[#allocation33_spill] sm:$0xff] %v12457_v33  ;;  %14336 = vst [vmem:[#allocation72_spill] sm:$0xff] %v12467_v17  ;;  %v12539_v47 = vld [vmem:[#allocation2 + $0x169] sm:$0xff] }
 0x2fb   : > { %9655 = vmatprep.mubr.msk.f32.mxu0 %vm204_vm1, %v12291_v8  ;;  %9605 = vmatprep.mubr.msk.f32.mxu1 %vm204_vm1, %v12299_v40  ;;  %14337 = vst [vmem:[#allocation71_spill] sm:$0xff] %v12473_v36  ;;  %14338 = vst [vmem:[#allocation54_spill] sm:$0xff] %v12483_v54  ;;  %v4846_v12 = vld [vmem:[#allocation2 + $0x2] sm:$0xff]  ;;  %v4847_v20 = vld [vmem:[#allocation2 + $0xa] sm:$0xff] }
 0x2fc   : > { %9751 = vmatpush3.msk.msra.mxu0 %vm500_vm0, %v12108_v48  ;;  %9800 = vmatprep.subr.msk.mxu1 %vm500_vm0, %v12296_v3  ;;  %v12325_v48 = vld [vmem:[#allocation2 + $0x39] sm:$0xff]  ;;  %14339 = vst [vmem:[#allocation42_spill] sm:$0xff] %v12489_v53  ;;  %14340 = vst [vmem:[#allocation91_spill] sm:$0xff] %v12499_v19 }
 0x2fd   : > { %9606 = vmatmul.mubr.msk.f32.gmra.mxu1 %vm204_vm1, %v12313_v5  ;;  %9850 = vmatprep.subr.msk.mxu0 %vm500_vm0, %v12398_v58  ;;  %14341 = vst [vmem:[#allocation94_spill] sm:$0xff] %v12505_v28  ;;  %14342 = vst [vmem:[#allocation37_spill] sm:$0xff] %v12515_v59 }
 0x2fe   : > { %9656 = vmatmul.mubr.msk.f32.gmra.mxu0 %vm204_vm1, %v12307_v9  ;;  %9608 = vmatprep.mubr.msk.f32.mxu1 %vm204_vm1, %v12319_v15  ;;  %14343 = vst [vmem:[#allocation39_spill] sm:$0xff] %v12521_v63  ;;  %14344 = vst [vmem:[#allocation73_spill] sm:$0xff] %v12531_v11 }
 0x2ff   : > { %9658 = vmatprep.mubr.msk.f32.mxu0 %vm204_vm1, %v12279_v35  ;;  %14345 = vst [vmem:[#allocation74_spill] sm:$0xff] %v12533_v30  ;;  %14346 = vst [vmem:[#allocation56_spill] sm:$0xff] %v12539_v47 }
 0x301   : > { %9609 = vmatmul.mubr.msk.f32.gmra.mxu1 %vm204_vm1, %v12325_v48 }
 0x302   : > { %9659 = vmatmul.mubr.msk.f32.gmra.mxu0 %vm204_vm1, %v12281_v2  ;;  %9611 = vmatprep.mubr.msk.f32.mxu1 %vm204_vm1, %v12333_v14 }
 0x303   : > { %9661 = vmatprep.mubr.msk.f32.mxu0 %vm204_vm1, %v12329_v39 }
 0x305   : > { %9612 = vmatmul.mubr.msk.f32.gmra.mxu1 %vm204_vm1, %v12347_v4 }
 0x306   : > { %9662 = vmatmul.mubr.msk.f32.gmra.mxu0 %vm204_vm1, %v12341_v22  ;;  %9614 = vmatprep.mubr.msk.f32.mxu1 %vm204_vm1, %v12357_v21 }
 0x307   : > { %9664 = vmatprep.mubr.msk.f32.mxu0 %vm204_vm1, %v12351_v49 }
 0x309   : > { %9615 = vmatmul.mubr.msk.f32.gmra.mxu1 %vm204_vm1, %v12365_v25 }
 0x30a   : > { %9665 = vmatmul.mubr.msk.f32.gmra.mxu0 %vm204_vm1, %v12363_v44  ;;  %9617 = vmatprep.mubr.msk.f32.mxu1 %vm204_vm1, %v12373_v43 }
 0x30b   : > { %9667 = vmatprep.mubr.msk.f32.mxu0 %vm204_vm1, %v12369_v50 }
 0x30d   : > { %9618 = vmatmul.mubr.msk.f32.gmra.mxu1 %vm204_vm1, %v12381_v16 }
 0x30e   : > { %9668 = vmatmul.mubr.msk.f32.gmra.mxu0 %vm204_vm1, %v12379_v0  ;;  %9620 = vmatprep.mubr.msk.f32.mxu1 %vm204_vm1, %v12389_v55 }
 0x30f   : > { %9670 = vmatprep.mubr.msk.f32.mxu0 %vm204_vm1, %v12385_v61 }
 0x311   : > { %9621 = vmatmul.mubr.msk.f32.gmra.mxu1 %vm204_vm1, %v12404_v51 }
 0x312   : > { %9671 = vmatmul.mubr.msk.f32.gmra.mxu0 %vm204_vm1, %v12400_v57  ;;  %9623 = vmatprep.mubr.msk.f32.mxu1 %vm204_vm1, %v12412_v1 }
 0x313   : > { %9673 = vmatprep.mubr.msk.f32.mxu0 %vm204_vm1, %v12408_v6 }
 0x315   : > { %9624 = vmatmul.mubr.msk.f32.gmra.mxu1 %vm204_vm1, %v12421_v56 }
 0x316   : > { %9674 = vmatmul.mubr.msk.f32.gmra.mxu0 %vm204_vm1, %v12419_v41  ;;  %9626 = vmatprep.mubr.msk.f32.mxu1 %vm204_vm1, %v12429_v37 }
 0x317   : > { %9676 = vmatprep.mubr.msk.f32.mxu0 %vm204_vm1, %v12425_v45 }
 0x319   : > { %9627 = vmatmul.mubr.msk.f32.gmra.mxu1 %vm204_vm1, %v12437_v62 }
 0x31a   : > { %9677 = vmatmul.mubr.msk.f32.gmra.mxu0 %vm204_vm1, %v12435_v13  ;;  %9629 = vmatprep.mubr.msk.f32.mxu1 %vm204_vm1, %v12445_v42 }
 0x31b   : > { %9679 = vmatprep.mubr.msk.f32.mxu0 %vm204_vm1, %v12441_v26 }
 0x31d   : > { %9630 = vmatmul.mubr.msk.f32.gmra.mxu1 %vm204_vm1, %v12453_v23 }
 0x31e   : > { %9680 = vmatmul.mubr.msk.f32.gmra.mxu0 %vm204_vm1, %v12451_v27  ;;  %9632 = vmatprep.mubr.msk.f32.mxu1 %vm204_vm1, %v12461_v52 }
 0x31f   : > { %9682 = vmatprep.mubr.msk.f32.mxu0 %vm204_vm1, %v12457_v33 }
 0x321   : > { %9633 = vmatmul.mubr.msk.f32.gmra.mxu1 %vm204_vm1, %v12469_v38 }
 0x322   : > { %9683 = vmatmul.mubr.msk.f32.gmra.mxu0 %vm204_vm1, %v12467_v17  ;;  %9635 = vmatprep.mubr.msk.f32.mxu1 %vm204_vm1, %v12477_v60 }
 0x323   : > { %9685 = vmatprep.mubr.msk.f32.mxu0 %vm204_vm1, %v12473_v36 }
 0x325   : > { %9636 = vmatmul.mubr.msk.f32.gmra.mxu1 %vm204_vm1, %v12485_v34 }
 0x326   : > { %9686 = vmatmul.mubr.msk.f32.gmra.mxu0 %vm204_vm1, %v12483_v54  ;;  %9638 = vmatprep.mubr.msk.f32.mxu1 %vm204_vm1, %v12493_v7 }
 0x327   : > { %9688 = vmatprep.mubr.msk.f32.mxu0 %vm204_vm1, %v12489_v53 }
 0x329   : > { %9639 = vmatmul.mubr.msk.f32.gmra.mxu1 %vm204_vm1, %v12501_v18 }
 0x32a   : > { %9689 = vmatmul.mubr.msk.f32.gmra.mxu0 %vm204_vm1, %v12499_v19  ;;  %9641 = vmatprep.mubr.msk.f32.mxu1 %vm204_vm1, %v12509_v31 }
 0x32b   : > { %9691 = vmatprep.mubr.msk.f32.mxu0 %vm204_vm1, %v12505_v28 }
 0x32d   : > { %9642 = vmatmul.mubr.msk.f32.gmra.mxu1 %vm204_vm1, %v12517_v29 }
 0x32e   : > { %9692 = vmatmul.mubr.msk.f32.gmra.mxu0 %vm204_vm1, %v12515_v59  ;;  %9644 = vmatprep.mubr.msk.f32.mxu1 %vm204_vm1, %v12525_v10 }
 0x32f   : > { %9694 = vmatprep.mubr.msk.f32.mxu0 %vm204_vm1, %v12521_v63 }
 0x331   : > { %9645 = vmatmul.mubr.msk.f32.gmra.mxu1 %vm204_vm1, %v12533_v30  ;;  %v12562_v30 = vld [vmem:[#allocation2 + $0x1a] sm:$0xff] }
 0x332   : > { %9695 = vmatmul.mubr.msk.f32.gmra.mxu0 %vm204_vm1, %v12531_v11  ;;  %9647 = vmatprep.mubr.msk.f32.mxu1 %vm204_vm1, %v12539_v47  ;;  %v12559_v47 = vld [vmem:[%s14018_s2 + $0x18] sm:$0xf] }
 0x333   : > { %9697 = vmatprep.mubr.msk.f32.mxu0 %vm204_vm1, %v12345_v46 }
 0x335   : > { %9648 = vmatmul.mubr.msk.f32.gmra.mxu1 %vm204_vm1, %v12545_v32 }
 0x336   : > { %9698 = vmatmul.mubr.msk.f32.gmra.mxu0 %vm204_vm1, %v12339_v24  ;;  %9702 = vmatprep.mubr.msk.f32.mxu1 %vm204_vm1, %v4846_v12  ;;  %v12599_v12 = vld [vmem:[#allocation2 + $0x4a] sm:$0xff] }
 0x337   : > { %9752 = vmatprep.mubr.msk.f32.mxu0 %vm204_vm1, %v12291_v8  ;;  %v12569_v8 = vld [vmem:[%s14018_s2 + $0x1c] sm:$0xf] }
 0x339   : > { %9703 = vmatmul.mubr.msk.f32.vlgmr.msra.gmra.mxu1 %vm204_vm1, %v4847_v20  ;;  %v12605_v20 = vld [vmem:[#allocation2 + $0x52] sm:$0xff] }
 0x33a   : > { %9753 = vmatmul.mubr.msk.f32.vlgmr.msra.gmra.mxu0 %vm204_vm1, %v12307_v9  ;;  %9801 = vmatpush3.msk.msra.mxu1 %vm500_vm0, %v12296_v3  ;;  %v12579_v9 = vld [vmem:[#allocation2 + $0x22] sm:$0xff]  ;;  %v12587_v3 = vld [vmem:[#allocation2 + $0x32] sm:$0xff] }
 0x33b   : > { %9755 = vmatprep.mubr.msk.f32.mxu0 %vm204_vm1, %v12279_v35  ;;  %9705 = vmatprep.mubr.msk.f32.mxu1 %vm204_vm1, %v12562_v30 }
 0x33c   : > { %9851 = vmatpush3.msk.msra.mxu0 %vm500_vm0, %v12398_v58  ;;  %9900 = vmatprep.subr.msk.mxu1 %vm500_vm0, %v12559_v47  ;;  %v12593_v58 = vld [vmem:[#allocation2 + $0x3a] sm:$0xff] }
 0x33d   : > { %9950 = vmatprep.subr.msk.mxu0 %vm500_vm0, %v12569_v8  ;;  %9706 = vmatmul.mubr.msk.f32.gmra.mxu1 %vm204_vm1, %v12579_v9 }
 0x33e   : > { %9756 = vmatmul.mubr.msk.f32.gmra.mxu0 %vm204_vm1, %v12281_v2  ;;  %9708 = vmatprep.mubr.msk.f32.mxu1 %vm204_vm1, %v12587_v3  ;;  %v12753_v2 = vld [vmem:[#allocation2 + $0x172] sm:$0xff] }
 0x33f   : > { %9758 = vmatprep.mubr.msk.f32.mxu0 %vm204_vm1, %v12329_v39  ;;  %v12741_v39 = vld [vmem:[#allocation2 + $0x180] sm:$0xff] }
 0x340   : > { %14347 = vst [vmem:[#allocation57_spill] sm:$0xff] %v12741_v39 }
 0x341   : > { %9709 = vmatmul.mubr.msk.f32.gmra.mxu1 %vm204_vm1, %v12593_v58 }
 0x342   : > { %9759 = vmatmul.mubr.msk.f32.gmra.mxu0 %vm204_vm1, %v12341_v22  ;;  %9711 = vmatprep.mubr.msk.f32.mxu1 %vm204_vm1, %v12599_v12  ;;  %v12611_v22 = vld [vmem:[#allocation2 + $0x62] sm:$0xff] }
 0x343   : > { %9761 = vmatprep.mubr.msk.f32.mxu0 %vm204_vm1, %v12351_v49  ;;  %v12617_v49 = vld [vmem:[#allocation2 + $0x6a] sm:$0xff] }
 0x345   : > { %9712 = vmatmul.mubr.msk.f32.gmra.mxu1 %vm204_vm1, %v12605_v20 }
 0x346   : > { %9762 = vmatmul.mubr.msk.f32.gmra.mxu0 %vm204_vm1, %v12363_v44  ;;  %9714 = vmatprep.mubr.msk.f32.mxu1 %vm204_vm1, %v12611_v22  ;;  %v12623_v44 = vld [vmem:[#allocation2 + $0x7a] sm:$0xff] }
 0x347   : > { %9764 = vmatprep.mubr.msk.f32.mxu0 %vm204_vm1, %v12369_v50  ;;  %v12629_v50 = vld [vmem:[#allocation2 + $0x82] sm:$0xff] }
 0x349   : > { %9715 = vmatmul.mubr.msk.f32.gmra.mxu1 %vm204_vm1, %v12617_v49 }
 0x34a   : > { %9765 = vmatmul.mubr.msk.f32.gmra.mxu0 %vm204_vm1, %v12379_v0  ;;  %9717 = vmatprep.mubr.msk.f32.mxu1 %vm204_vm1, %v12623_v44  ;;  %v12635_v0 = vld [vmem:[#allocation2 + $0x92] sm:$0xff] }
 0x34b   : > { %9767 = vmatprep.mubr.msk.f32.mxu0 %vm204_vm1, %v12385_v61  ;;  %v12641_v61 = vld [vmem:[#allocation2 + $0x9a] sm:$0xff] }
 0x34d   : > { %9718 = vmatmul.mubr.msk.f32.gmra.mxu1 %vm204_vm1, %v12629_v50 }
 0x34e   : > { %9768 = vmatmul.mubr.msk.f32.gmra.mxu0 %vm204_vm1, %v12400_v57  ;;  %9720 = vmatprep.mubr.msk.f32.mxu1 %vm204_vm1, %v12635_v0  ;;  %v12647_v57 = vld [vmem:[#allocation2 + $0xaa] sm:$0xff] }
 0x34f   : > { %9770 = vmatprep.mubr.msk.f32.mxu0 %vm204_vm1, %v12408_v6  ;;  %v12653_v6 = vld [vmem:[#allocation2 + $0xb2] sm:$0xff] }
 0x351   : > { %9721 = vmatmul.mubr.msk.f32.gmra.mxu1 %vm204_vm1, %v12641_v61 }
 0x352   : > { %9771 = vmatmul.mubr.msk.f32.gmra.mxu0 %vm204_vm1, %v12419_v41  ;;  %9723 = vmatprep.mubr.msk.f32.mxu1 %vm204_vm1, %v12647_v57  ;;  %v12659_v41 = vld [vmem:[#allocation2 + $0xc2] sm:$0xff] }
 0x353   : > { %9773 = vmatprep.mubr.msk.f32.mxu0 %vm204_vm1, %v12425_v45  ;;  %v12665_v45 = vld [vmem:[#allocation2 + $0xca] sm:$0xff] }
 0x355   : > { %9724 = vmatmul.mubr.msk.f32.gmra.mxu1 %vm204_vm1, %v12653_v6 }
 0x356   : > { %9774 = vmatmul.mubr.msk.f32.gmra.mxu0 %vm204_vm1, %v12435_v13  ;;  %9726 = vmatprep.mubr.msk.f32.mxu1 %vm204_vm1, %v12659_v41  ;;  %v12671_v13 = vld [vmem:[#allocation2 + $0xda] sm:$0xff] }
 0x357   : > { %9776 = vmatprep.mubr.msk.f32.mxu0 %vm204_vm1, %v12441_v26  ;;  %v12677_v26 = vld [vmem:[#allocation2 + $0xe2] sm:$0xff] }
 0x359   : > { %9727 = vmatmul.mubr.msk.f32.gmra.mxu1 %vm204_vm1, %v12665_v45 }
 0x35a   : > { %9777 = vmatmul.mubr.msk.f32.gmra.mxu0 %vm204_vm1, %v12451_v27  ;;  %9729 = vmatprep.mubr.msk.f32.mxu1 %vm204_vm1, %v12671_v13  ;;  %v12683_v27 = vld [vmem:[#allocation2 + $0xf2] sm:$0xff] }
 0x35b   : > { %9779 = vmatprep.mubr.msk.f32.mxu0 %vm204_vm1, %v12457_v33  ;;  %v12689_v33 = vld [vmem:[#allocation2 + $0xfa] sm:$0xff] }
 0x35d   : > { %9730 = vmatmul.mubr.msk.f32.gmra.mxu1 %vm204_vm1, %v12677_v26 }
 0x35e   : > { %9780 = vmatmul.mubr.msk.f32.gmra.mxu0 %vm204_vm1, %v12467_v17  ;;  %9732 = vmatprep.mubr.msk.f32.mxu1 %vm204_vm1, %v12683_v27  ;;  %v12695_v17 = vld [vmem:[#allocation2 + $0x10a] sm:$0xff] }
 0x35f   : > { %9782 = vmatprep.mubr.msk.f32.mxu0 %vm204_vm1, %v12473_v36  ;;  %v12701_v36 = vld [vmem:[#allocation2 + $0x112] sm:$0xff] }
 0x361   : > { %9733 = vmatmul.mubr.msk.f32.gmra.mxu1 %vm204_vm1, %v12689_v33 }
 0x362   : > { %9783 = vmatmul.mubr.msk.f32.gmra.mxu0 %vm204_vm1, %v12483_v54  ;;  %9735 = vmatprep.mubr.msk.f32.mxu1 %vm204_vm1, %v12695_v17  ;;  %v12707_v54 = vld [vmem:[#allocation2 + $0x122] sm:$0xff] }
 0x363   : > { %9785 = vmatprep.mubr.msk.f32.mxu0 %vm204_vm1, %v12489_v53  ;;  %v12713_v53 = vld [vmem:[#allocation2 + $0x12a] sm:$0xff] }
 0x365   : > { %9736 = vmatmul.mubr.msk.f32.gmra.mxu1 %vm204_vm1, %v12701_v36 }
 0x366   : > { %9786 = vmatmul.mubr.msk.f32.gmra.mxu0 %vm204_vm1, %v12499_v19  ;;  %9738 = vmatprep.mubr.msk.f32.mxu1 %vm204_vm1, %v12707_v54  ;;  %v12719_v19 = vld [vmem:[#allocation2 + $0x13a] sm:$0xff] }
 0x367   : > { %9788 = vmatprep.mubr.msk.f32.mxu0 %vm204_vm1, %v12505_v28  ;;  %v12725_v28 = vld [vmem:[#allocation2 + $0x142] sm:$0xff] }
 0x369   : > { %9739 = vmatmul.mubr.msk.f32.gmra.mxu1 %vm204_vm1, %v12713_v53 }
 0x36a   : > { %9789 = vmatmul.mubr.msk.f32.gmra.mxu0 %vm204_vm1, %v12515_v59  ;;  %9741 = vmatprep.mubr.msk.f32.mxu1 %vm204_vm1, %v12719_v19  ;;  %v12731_v59 = vld [vmem:[#allocation2 + $0x152] sm:$0xff] }
 0x36b   : > { %9791 = vmatprep.mubr.msk.f32.mxu0 %vm204_vm1, %v12521_v63  ;;  %v12737_v63 = vld [vmem:[#allocation2 + $0x15a] sm:$0xff] }
 0x36d   : > { %9742 = vmatmul.mubr.msk.f32.gmra.mxu1 %vm204_vm1, %v12725_v28 }
 0x36e   : > { %9792 = vmatmul.mubr.msk.f32.gmra.mxu0 %vm204_vm1, %v12531_v11  ;;  %9744 = vmatprep.mubr.msk.f32.mxu1 %vm204_vm1, %v12731_v59  ;;  %v12745_v11 = vld [vmem:[#allocation2 + $0x16a] sm:$0xff] }
 0x36f   : > { %9794 = vmatprep.mubr.msk.f32.mxu0 %vm204_vm1, %v12345_v46  ;;  %v12751_v46 = vld [vmem:[#allocation2 + $0x188] sm:$0xff] }
 0x371   : > { %9745 = vmatmul.mubr.msk.f32.gmra.mxu1 %vm204_vm1, %v12737_v63 }
 0x372   : > { %9795 = vmatmul.mubr.msk.f32.gmra.mxu0 %vm204_vm1, %v12339_v24  ;;  %9747 = vmatprep.mubr.msk.f32.mxu1 %vm204_vm1, %v12745_v11 }
 0x373   : > { %9797 = vmatprep.mubr.msk.f32.mxu0 %vm204_vm1, %v12741_v39  ;;  %v12768_v39 = vld [vmem:[%s14018_s2 + $0x20] sm:$0xf] }
 0x375   : > { %9748 = vmatmul.mubr.msk.f32.gmra.mxu1 %vm204_vm1, %v12753_v2 }
 0x376   : > { %9798 = vmatmul.mubr.msk.f32.gmra.mxu0 %vm204_vm1, %v12751_v46  ;;  %9802 = vmatprep.mubr.msk.f32.mxu1 %vm204_vm1, %v12299_v40  ;;  %v14348_v40 = vld [vmem:[#allocation74_spill] sm:$0xff] }
 0x377   : > { %9852 = vmatprep.mubr.msk.f32.mxu0 %vm204_vm1, %v12562_v30 }
 0x379   : > { %9803 = vmatmul.mubr.msk.f32.vlgmr.msra.gmra.mxu1 %vm204_vm1, %v12313_v5  ;;  %v14349_v5 = vld [vmem:[#allocation56_spill] sm:$0xff] }
 0x37a   : > { %9853 = vmatmul.mubr.msk.f32.vlgmr.msra.gmra.mxu0 %vm204_vm1, %v12579_v9  ;;  %9901 = vmatpush3.msk.msra.mxu1 %vm500_vm0, %v12559_v47  ;;  %v14352_v47 = vld [vmem:[#allocation50_spill] sm:$0xff] }
 0x37b   : > { %9855 = vmatprep.mubr.msk.f32.mxu0 %vm204_vm1, %v12587_v3  ;;  %9805 = vmatprep.mubr.msk.f32.mxu1 %vm204_vm1, %v12319_v15 }
 0x37c   : > { %9951 = vmatpush3.msk.msra.mxu0 %vm500_vm0, %v12569_v8  ;;  %10000 = vmatprep.subr.msk.mxu1 %vm500_vm0, %v12768_v39 }
 0x37d   : > { %9806 = vmatmul.mubr.msk.f32.gmra.mxu1 %vm204_vm1, %v12325_v48 }
 0x37e   : > { %9856 = vmatmul.mubr.msk.f32.gmra.mxu0 %vm204_vm1, %v12593_v58  ;;  %9808 = vmatprep.mubr.msk.f32.mxu1 %vm204_vm1, %v12333_v14 }
 0x37f   : > { %9858 = vmatprep.mubr.msk.f32.mxu0 %vm204_vm1, %v12599_v12 }
 0x381   : > { %9809 = vmatmul.mubr.msk.f32.gmra.mxu1 %vm204_vm1, %v12347_v4 }
 0x382   : > { %9859 = vmatmul.mubr.msk.f32.gmra.mxu0 %vm204_vm1, %v12605_v20  ;;  %9811 = vmatprep.mubr.msk.f32.mxu1 %vm204_vm1, %v12357_v21 }
 0x383   : > { %9861 = vmatprep.mubr.msk.f32.mxu0 %vm204_vm1, %v12611_v22 }
 0x385   : > { %9812 = vmatmul.mubr.msk.f32.gmra.mxu1 %vm204_vm1, %v12365_v25 }
 0x386   : > { %9862 = vmatmul.mubr.msk.f32.gmra.mxu0 %vm204_vm1, %v12617_v49  ;;  %9814 = vmatprep.mubr.msk.f32.mxu1 %vm204_vm1, %v12373_v43 }
 0x387   : > { %9864 = vmatprep.mubr.msk.f32.mxu0 %vm204_vm1, %v12623_v44 }
 0x389   : > { %9815 = vmatmul.mubr.msk.f32.gmra.mxu1 %vm204_vm1, %v12381_v16 }
 0x38a   : > { %9865 = vmatmul.mubr.msk.f32.gmra.mxu0 %vm204_vm1, %v12629_v50  ;;  %9817 = vmatprep.mubr.msk.f32.mxu1 %vm204_vm1, %v12389_v55 }
 0x38b   : > { %9867 = vmatprep.mubr.msk.f32.mxu0 %vm204_vm1, %v12635_v0 }
 0x38d   : > { %9818 = vmatmul.mubr.msk.f32.gmra.mxu1 %vm204_vm1, %v12404_v51 }
 0x38e   : > { %9868 = vmatmul.mubr.msk.f32.gmra.mxu0 %vm204_vm1, %v12641_v61  ;;  %9820 = vmatprep.mubr.msk.f32.mxu1 %vm204_vm1, %v12412_v1 }
 0x38f   : > { %9870 = vmatprep.mubr.msk.f32.mxu0 %vm204_vm1, %v12647_v57 }
 0x391   : > { %9821 = vmatmul.mubr.msk.f32.gmra.mxu1 %vm204_vm1, %v12421_v56 }
 0x392   : > { %9871 = vmatmul.mubr.msk.f32.gmra.mxu0 %vm204_vm1, %v12653_v6  ;;  %9823 = vmatprep.mubr.msk.f32.mxu1 %vm204_vm1, %v12429_v37 }
 0x393   : > { %9873 = vmatprep.mubr.msk.f32.mxu0 %vm204_vm1, %v12659_v41 }
 0x395   : > { %9824 = vmatmul.mubr.msk.f32.gmra.mxu1 %vm204_vm1, %v12437_v62 }
 0x396   : > { %9874 = vmatmul.mubr.msk.f32.gmra.mxu0 %vm204_vm1, %v12665_v45  ;;  %9826 = vmatprep.mubr.msk.f32.mxu1 %vm204_vm1, %v12445_v42 }
 0x397   : > { %9876 = vmatprep.mubr.msk.f32.mxu0 %vm204_vm1, %v12671_v13 }
 0x399   : > { %9827 = vmatmul.mubr.msk.f32.gmra.mxu1 %vm204_vm1, %v12453_v23 }
 0x39a   : > { %9877 = vmatmul.mubr.msk.f32.gmra.mxu0 %vm204_vm1, %v12677_v26  ;;  %9829 = vmatprep.mubr.msk.f32.mxu1 %vm204_vm1, %v12461_v52 }
 0x39b   : > { %9879 = vmatprep.mubr.msk.f32.mxu0 %vm204_vm1, %v12683_v27 }
 0x39d   : > { %9830 = vmatmul.mubr.msk.f32.gmra.mxu1 %vm204_vm1, %v12469_v38 }
 0x39e   : > { %9880 = vmatmul.mubr.msk.f32.gmra.mxu0 %vm204_vm1, %v12689_v33  ;;  %9832 = vmatprep.mubr.msk.f32.mxu1 %vm204_vm1, %v12477_v60  ;;  %v12888_v33 = vld [vmem:[#allocation2 + $0x182] sm:$0xff] }
 0x39f   : > { %9882 = vmatprep.mubr.msk.f32.mxu0 %vm204_vm1, %v12695_v17 }
 0x3a1   : > { %9833 = vmatmul.mubr.msk.f32.gmra.mxu1 %vm204_vm1, %v12485_v34 }
 0x3a2   : > { %9883 = vmatmul.mubr.msk.f32.gmra.mxu0 %vm204_vm1, %v12701_v36  ;;  %9835 = vmatprep.mubr.msk.f32.mxu1 %vm204_vm1, %v12493_v7  ;;  %v12892_v36 = vld [vmem:[#allocation2 + $0x181] sm:$0xff] }
 0x3a3   : > { %9885 = vmatprep.mubr.msk.f32.mxu0 %vm204_vm1, %v12707_v54  ;;  %v12898_v54 = vld [vmem:[#allocation2 + $0x18a] sm:$0xff] }
 0x3a5   : > { %9836 = vmatmul.mubr.msk.f32.gmra.mxu1 %vm204_vm1, %v12501_v18 }
 0x3a6   : > { %9886 = vmatmul.mubr.msk.f32.gmra.mxu0 %vm204_vm1, %v12713_v53  ;;  %9838 = vmatprep.mubr.msk.f32.mxu1 %vm204_vm1, %v12509_v31  ;;  %v12900_v53 = vld [vmem:[#allocation2 + $0x189] sm:$0xff] }
 0x3a7   : > { %9888 = vmatprep.mubr.msk.f32.mxu0 %vm204_vm1, %v12719_v19 }
 0x3a9   : > { %9839 = vmatmul.mubr.msk.f32.gmra.mxu1 %vm204_vm1, %v12517_v29 }
 0x3aa   : > { %9889 = vmatmul.mubr.msk.f32.gmra.mxu0 %vm204_vm1, %v12725_v28  ;;  %9841 = vmatprep.mubr.msk.f32.mxu1 %vm204_vm1, %v12525_v10  ;;  %v14350_v28 = vld [vmem:[#allocation68_spill] sm:$0xff] }
 0x3ab   : > { %9891 = vmatprep.mubr.msk.f32.mxu0 %vm204_vm1, %v12731_v59 }
 0x3ad   : > { %9842 = vmatmul.mubr.msk.f32.gmra.mxu1 %vm204_vm1, %v14348_v40 }
 0x3ae   : > { %9892 = vmatmul.mubr.msk.f32.gmra.mxu0 %vm204_vm1, %v12737_v63  ;;  %9844 = vmatprep.mubr.msk.f32.mxu1 %vm204_vm1, %v14349_v5 }
 0x3af   : > { %9894 = vmatprep.mubr.msk.f32.mxu0 %vm204_vm1, %v12745_v11 }
 0x3b1   : > { %9845 = vmatmul.mubr.msk.f32.gmra.mxu1 %vm204_vm1, %v12545_v32 }
 0x3b2   : > { %9895 = vmatmul.mubr.msk.f32.gmra.mxu0 %vm204_vm1, %v12753_v2  ;;  %9847 = vmatprep.mubr.msk.f32.mxu1 %vm204_vm1, %v12892_v36 }
 0x3b3   : > { %9897 = vmatprep.mubr.msk.f32.mxu0 %vm204_vm1, %v12888_v33 }
 0x3b5   : > { %9848 = vmatmul.mubr.msk.f32.gmra.mxu1 %vm204_vm1, %v12900_v53 }
 0x3b6   : > { %9898 = vmatmul.mubr.msk.f32.gmra.mxu0 %vm204_vm1, %v12898_v54  ;;  %9902 = vmatprep.mubr.msk.f32.mxu1 %vm204_vm1, %v12279_v35 }
 0x3b7   : > { %9952 = vmatprep.mubr.msk.f32.mxu0 %vm204_vm1, %v12319_v15  ;;  %v14351_v15 = vld [vmem:[#allocation67_spill] sm:$0xff] }
 0x3b9   : > { %v9604_v19 = vpop.f32.mrf.mxu1  ;;  %9903 = vmatmul.mubr.msk.f32.vlgmr.msra.gmra.mxu1 %vm204_vm1, %v14350_v28  ;;  %v14354_v28 = vld [vmem:[#allocation88_spill] sm:$0xff] }
 0x3ba   : > { %v9654_v2 = vpop.f32.mrf.mxu0  ;;  %9953 = vmatmul.mubr.msk.f32.vlgmr.msra.gmra.mxu0 %vm204_vm1, %v12325_v48  ;;  %10001 = vmatpush3.msk.msra.mxu1 %vm500_vm0, %v12768_v39  ;;  %v14353_v39 = vld [vmem:[#allocation51_spill] sm:$0xff] }
 0x3bb   : > { %9955 = vmatprep.mubr.msk.f32.mxu0 %vm204_vm1, %v12333_v14  ;;  %v12916_v59 = vadd.f32 %v9654_v2, %v9604_v19  ;;  %9905 = vmatprep.mubr.msk.f32.mxu1 %vm204_vm1, %v14351_v15  ;;  %v4363_v63 = vpop.f32.mrf.mxu1  ;;  %v14355_v15 = vld [vmem:[#allocation90_spill] sm:$0xff] }
 0x3bc   : > { %v4687_v35 = vpop.f32.mrf.mxu0 }
 0x3bd   : > { %v12922_v11 = vadd.f32 %v4687_v35, %v4363_v63  ;;  %v9607_v30 = vpop.f32.mrf.mxu1  ;;  %9906 = vmatmul.mubr.msk.f32.gmra.mxu1 %vm204_vm1, %v14352_v47  ;;  %v14356_v47 = vld [vmem:[#allocation55_spill] sm:$0xff] }
 0x3be   : > { %v9657_v48 = vpop.f32.mrf.mxu0  ;;  %9956 = vmatmul.mubr.msk.f32.gmra.mxu0 %vm204_vm1, %v12347_v4  ;;  %9908 = vmatprep.mubr.msk.f32.mxu1 %vm204_vm1, %v14353_v39  ;;  %v14357_v39 = vld [vmem:[#allocation31_spill] sm:$0xff] }
 0x3bf   : > { %9958 = vmatprep.mubr.msk.f32.mxu0 %vm204_vm1, %v12357_v21  ;;  %v12930_v14 = vadd.f32 %v9657_v48, %v9607_v30  ;;  %v4373_v9 = vpop.f32.mrf.mxu1 }
 0x3c0   : > { %v4697_v8 = vpop.f32.mrf.mxu0 }
 0x3c1   : > { %v12934_v2 = vadd.f32 %v4697_v8, %v4373_v9  ;;  %v9610_v4 = vpop.f32.mrf.mxu1  ;;  %9909 = vmatmul.mubr.msk.f32.gmra.mxu1 %vm204_vm1, %v14354_v28  ;;  %v14358_v28 = vld [vmem:[#allocation69_spill] sm:$0xff] }
 0x3c2   : > { %v9660_v19 = vpop.f32.mrf.mxu0  ;;  %9959 = vmatmul.mubr.msk.f32.gmra.mxu0 %vm204_vm1, %v12365_v25  ;;  %9911 = vmatprep.mubr.msk.f32.mxu1 %vm204_vm1, %v14355_v15  ;;  %v14359_v15 = vld [vmem:[#allocation70_spill] sm:$0xff] }
 0x3c3   : > { %9961 = vmatprep.mubr.msk.f32.mxu0 %vm204_vm1, %v12373_v43  ;;  %v12942_v21 = vadd.f32 %v9660_v19, %v9610_v4  ;;  %v4383_v63 = vpop.f32.mrf.mxu1 }
 0x3c4   : > { %v4707_v35 = vpop.f32.mrf.mxu0 }
 0x3c5   : > { %v12946_v48 = vadd.f32 %v4707_v35, %v4383_v63  ;;  %v9613_v25 = vpop.f32.mrf.mxu1  ;;  %9912 = vmatmul.mubr.msk.f32.gmra.mxu1 %vm204_vm1, %v14356_v47  ;;  %v14360_v47 = vld [vmem:[#allocation52_spill] sm:$0xff] }
 0x3c6   : > { %v9663_v30 = vpop.f32.mrf.mxu0  ;;  %9962 = vmatmul.mubr.msk.f32.gmra.mxu0 %vm204_vm1, %v12381_v16  ;;  %9914 = vmatprep.mubr.msk.f32.mxu1 %vm204_vm1, %v14357_v39  ;;  %v14361_v39 = vld [vmem:[#allocation53_spill] sm:$0xff] }
 0x3c7   : > { %9964 = vmatprep.mubr.msk.f32.mxu0 %vm204_vm1, %v12389_v55  ;;  %v12954_v43 = vadd.f32 %v9663_v30, %v9613_v25  ;;  %v4393_v9 = vpop.f32.mrf.mxu1 }
 0x3c8   : > { %v4717_v8 = vpop.f32.mrf.mxu0 }
 0x3c9   : > { %v12958_v19 = vadd.f32 %v4717_v8, %v4393_v9  ;;  %v9616_v16 = vpop.f32.mrf.mxu1  ;;  %9915 = vmatmul.mubr.msk.f32.gmra.mxu1 %vm204_vm1, %v14358_v28  ;;  %v14362_v28 = vld [vmem:[#allocation89_spill] sm:$0xff] }
 0x3ca   : > { %v9666_v4 = vpop.f32.mrf.mxu0  ;;  %9965 = vmatmul.mubr.msk.f32.gmra.mxu0 %vm204_vm1, %v12404_v51  ;;  %9917 = vmatprep.mubr.msk.f32.mxu1 %vm204_vm1, %v14359_v15  ;;  %v14363_v15 = vld [vmem:[#allocation92_spill] sm:$0xff] }
 0x3cb   : > { %9967 = vmatprep.mubr.msk.f32.mxu0 %vm204_vm1, %v12412_v1  ;;  %v12966_v55 = vadd.f32 %v9666_v4, %v9616_v16  ;;  %v4403_v63 = vpop.f32.mrf.mxu1 }
 0x3cc   : > { %v4727_v35 = vpop.f32.mrf.mxu0 }
 0x3cd   : > { %v12970_v30 = vadd.f32 %v4727_v35, %v4403_v63  ;;  %v9619_v51 = vpop.f32.mrf.mxu1  ;;  %9918 = vmatmul.mubr.msk.f32.gmra.mxu1 %vm204_vm1, %v14360_v47  ;;  %v14364_v47 = vld [vmem:[#allocation32_spill] sm:$0xff] }
 0x3ce   : > { %v9669_v25 = vpop.f32.mrf.mxu0  ;;  %9968 = vmatmul.mubr.msk.f32.gmra.mxu0 %vm204_vm1, %v12421_v56  ;;  %9920 = vmatprep.mubr.msk.f32.mxu1 %vm204_vm1, %v14361_v39  ;;  %v14365_v39 = vld [vmem:[#allocation33_spill] sm:$0xff] }
 0x3cf   : > { %9970 = vmatprep.mubr.msk.f32.mxu0 %vm204_vm1, %v12429_v37  ;;  %v12978_v1 = vadd.f32 %v9669_v25, %v9619_v51  ;;  %v4413_v9 = vpop.f32.mrf.mxu1 }
 0x3d0   : > { %v4737_v8 = vpop.f32.mrf.mxu0 }
 0x3d1   : > { %v12982_v4 = vadd.f32 %v4737_v8, %v4413_v9  ;;  %v9622_v56 = vpop.f32.mrf.mxu1  ;;  %9921 = vmatmul.mubr.msk.f32.gmra.mxu1 %vm204_vm1, %v14362_v28  ;;  %v14366_v28 = vld [vmem:[#allocation72_spill] sm:$0xff] }
 0x3d2   : > { %v9672_v16 = vpop.f32.mrf.mxu0  ;;  %9971 = vmatmul.mubr.msk.f32.gmra.mxu0 %vm204_vm1, %v12437_v62  ;;  %9923 = vmatprep.mubr.msk.f32.mxu1 %vm204_vm1, %v14363_v15  ;;  %v14367_v15 = vld [vmem:[#allocation71_spill] sm:$0xff] }
 0x3d3   : > { %9973 = vmatprep.mubr.msk.f32.mxu0 %vm204_vm1, %v12445_v42  ;;  %v12990_v37 = vadd.f32 %v9672_v16, %v9622_v56  ;;  %v4423_v63 = vpop.f32.mrf.mxu1 }
 0x3d4   : > { %v4747_v35 = vpop.f32.mrf.mxu0 }
 0x3d5   : > { %v12994_v25 = vadd.f32 %v4747_v35, %v4423_v63  ;;  %v9625_v62 = vpop.f32.mrf.mxu1  ;;  %9924 = vmatmul.mubr.msk.f32.gmra.mxu1 %vm204_vm1, %v14364_v47  ;;  %v14368_v47 = vld [vmem:[#allocation54_spill] sm:$0xff] }
 0x3d6   : > { %v9675_v51 = vpop.f32.mrf.mxu0  ;;  %9974 = vmatmul.mubr.msk.f32.gmra.mxu0 %vm204_vm1, %v12453_v23  ;;  %9926 = vmatprep.mubr.msk.f32.mxu1 %vm204_vm1, %v14365_v39  ;;  %v14369_v39 = vld [vmem:[#allocation42_spill] sm:$0xff] }
 0x3d7   : > { %9976 = vmatprep.mubr.msk.f32.mxu0 %vm204_vm1, %v12461_v52  ;;  %v13002_v42 = vadd.f32 %v9675_v51, %v9625_v62  ;;  %v4433_v9 = vpop.f32.mrf.mxu1 }
 0x3d8   : > { %v4757_v8 = vpop.f32.mrf.mxu0 }
 0x3d9   : > { %v13006_v16 = vadd.f32 %v4757_v8, %v4433_v9  ;;  %v9628_v23 = vpop.f32.mrf.mxu1  ;;  %9927 = vmatmul.mubr.msk.f32.gmra.mxu1 %vm204_vm1, %v14366_v28  ;;  %v14370_v28 = vld [vmem:[#allocation91_spill] sm:$0xff] }
 0x3da   : > { %v9678_v56 = vpop.f32.mrf.mxu0  ;;  %9977 = vmatmul.mubr.msk.f32.gmra.mxu0 %vm204_vm1, %v12469_v38  ;;  %9929 = vmatprep.mubr.msk.f32.mxu1 %vm204_vm1, %v14367_v15  ;;  %v14371_v15 = vld [vmem:[#allocation94_spill] sm:$0xff] }
 0x3db   : > { %9979 = vmatprep.mubr.msk.f32.mxu0 %vm204_vm1, %v12477_v60  ;;  %v13014_v52 = vadd.f32 %v9678_v56, %v9628_v23  ;;  %v4443_v63 = vpop.f32.mrf.mxu1 }
 0x3dc   : > { %v4767_v35 = vpop.f32.mrf.mxu0 }
 0x3dd   : > { %v13018_v51 = vadd.f32 %v4767_v35, %v4443_v63  ;;  %v9631_v38 = vpop.f32.mrf.mxu1  ;;  %9930 = vmatmul.mubr.msk.f32.gmra.mxu1 %vm204_vm1, %v14368_v47  ;;  %v14372_v47 = vld [vmem:[#allocation37_spill] sm:$0xff] }
 0x3de   : > { %v9681_v62 = vpop.f32.mrf.mxu0  ;;  %9980 = vmatmul.mubr.msk.f32.gmra.mxu0 %vm204_vm1, %v12485_v34  ;;  %9932 = vmatprep.mubr.msk.f32.mxu1 %vm204_vm1, %v14369_v39  ;;  %v14373_v39 = vld [vmem:[#allocation39_spill] sm:$0xff] }
 0x3df   : > { %9982 = vmatprep.mubr.msk.f32.mxu0 %vm204_vm1, %v12493_v7  ;;  %v13026_v60 = vadd.f32 %v9681_v62, %v9631_v38  ;;  %v4453_v9 = vpop.f32.mrf.mxu1 }
 0x3e0   : > { %v4777_v8 = vpop.f32.mrf.mxu0 }
 0x3e1   : > { %v13030_v56 = vadd.f32 %v4777_v8, %v4453_v9  ;;  %v9634_v34 = vpop.f32.mrf.mxu1  ;;  %9933 = vmatmul.mubr.msk.f32.gmra.mxu1 %vm204_vm1, %v14370_v28  ;;  %v14374_v28 = vld [vmem:[#allocation73_spill] sm:$0xff] }
 0x3e2   : > { %v9684_v23 = vpop.f32.mrf.mxu0  ;;  %9983 = vmatmul.mubr.msk.f32.gmra.mxu0 %vm204_vm1, %v12501_v18  ;;  %9935 = vmatprep.mubr.msk.f32.mxu1 %vm204_vm1, %v14371_v15  ;;  %v14375_v15 = vld [vmem:[#allocation49_spill] sm:$0xff] }
 0x3e3   : > { %9985 = vmatprep.mubr.msk.f32.mxu0 %vm204_vm1, %v12509_v31  ;;  %v13038_v7 = vadd.f32 %v9684_v23, %v9634_v34  ;;  %v4463_v63 = vpop.f32.mrf.mxu1 }
 0x3e4   : > { %v4787_v35 = vpop.f32.mrf.mxu0 }
 0x3e5   : > { %v13042_v62 = vadd.f32 %v4787_v35, %v4463_v63  ;;  %v9637_v18 = vpop.f32.mrf.mxu1  ;;  %9936 = vmatmul.mubr.msk.f32.gmra.mxu1 %vm204_vm1, %v14372_v47  ;;  %v14376_v47 = vld [vmem:[#allocation57_spill] sm:$0xff] }
 0x3e6   : > { %v9687_v38 = vpop.f32.mrf.mxu0  ;;  %9986 = vmatmul.mubr.msk.f32.gmra.mxu0 %vm204_vm1, %v12517_v29  ;;  %9938 = vmatprep.mubr.msk.f32.mxu1 %vm204_vm1, %v14373_v39 }
 0x3e7   : > { %9988 = vmatprep.mubr.msk.f32.mxu0 %vm204_vm1, %v12525_v10  ;;  %v13050_v31 = vadd.f32 %v9687_v38, %v9637_v18  ;;  %v4473_v9 = vpop.f32.mrf.mxu1 }
 0x3e8   : > { %v4797_v8 = vpop.f32.mrf.mxu0 }
 0x3e9   : > { %v13054_v23 = vadd.f32 %v4797_v8, %v4473_v9  ;;  %v9640_v29 = vpop.f32.mrf.mxu1  ;;  %9939 = vmatmul.mubr.msk.f32.gmra.mxu1 %vm204_vm1, %v14374_v28 }
 0x3ea   : > { %v9690_v34 = vpop.f32.mrf.mxu0  ;;  %9989 = vmatmul.mubr.msk.f32.gmra.mxu0 %vm204_vm1, %v14348_v40  ;;  %9941 = vmatprep.mubr.msk.f32.mxu1 %vm204_vm1, %v14375_v15 }
 0x3eb   : > { %9991 = vmatprep.mubr.msk.f32.mxu0 %vm204_vm1, %v14349_v5  ;;  %v13062_v10 = vadd.f32 %v9690_v34, %v9640_v29  ;;  %v4483_v63 = vpop.f32.mrf.mxu1 }
 0x3ec   : > { %v4807_v35 = vpop.f32.mrf.mxu0 }
 0x3ed   : > { %v13066_v38 = vadd.f32 %v4807_v35, %v4483_v63  ;;  %v9643_v40 = vpop.f32.mrf.mxu1  ;;  %9942 = vmatmul.mubr.msk.f32.gmra.mxu1 %vm204_vm1, %v12339_v24  ;;  %v6436_v24 = vld [vmem:[#allocation2 + $0x198] sm:$0xff]  ;;  %v6827_v35 = vld [vmem:[#allocation2 + $0x1a1] sm:$0xff] }
 0x3ee   : > { %v9693_v18 = vpop.f32.mrf.mxu0  ;;  %9992 = vmatmul.mubr.msk.f32.gmra.mxu0 %vm204_vm1, %v12545_v32  ;;  %9944 = vmatprep.mubr.msk.f32.mxu1 %vm204_vm1, %v14376_v47  ;;  %v6826_v32 = vld [vmem:[#allocation2 + $0x199] sm:$0xff] }
 0x3ef   : > { %9994 = vmatprep.mubr.msk.f32.mxu0 %vm204_vm1, %v12892_v36  ;;  %v13074_v5 = vadd.f32 %v9693_v18, %v9643_v40  ;;  %v4493_v8 = vpop.f32.mrf.mxu1  ;;  %v6437_v40 = vld [vmem:[#allocation2 + $0x1a0] sm:$0xff] }
 0x3f0   : > { %v4817_v39 = vpop.f32.mrf.mxu0 }
 0x3f1   : > { %v13078_v9 = vadd.f32 %v4817_v39, %v4493_v8  ;;  %v9646_v29 = vpop.f32.mrf.mxu1  ;;  %9945 = vmatmul.mubr.msk.f32.gmra.mxu1 %vm204_vm1, %v12751_v46 }
 0x3f2   : > { %v9696_v34 = vpop.f32.mrf.mxu0  ;;  %9995 = vmatmul.mubr.msk.f32.gmra.mxu0 %vm204_vm1, %v12900_v53  ;;  %9947 = vmatprep.mubr.msk.f32.mxu1 %vm204_vm1, %v6436_v24 }
 0x3f3   : > { %9997 = vmatprep.mubr.msk.f32.mxu0 %vm204_vm1, %v6826_v32  ;;  %v13085_v36 = vadd.f32 %v9696_v34, %v9646_v29  ;;  %v4503_v15 = vpop.f32.mrf.mxu1 }
 0x3f4   : > { %v4827_v28 = vpop.f32.mrf.mxu0 }
 0x3f5   : > { %v13088_v63 = vadd.f32 %v4827_v28, %v4503_v15  ;;  %v9649_v53 = vpop.f32.mrf.mxu1  ;;  %9948 = vmatmul.mubr.msk.f32.gmra.mxu1 %vm204_vm1, %v6437_v40 }
 0x3f6   : > { %v9699_v18 = vpop.f32.mrf.mxu0  ;;  %9998 = vmatmul.mubr.msk.f32.gmra.mxu0 %vm204_vm1, %v6827_v35  ;;  %10002 = vmatprep.mubr.msk.f32.mxu1 %vm204_vm1, %v12587_v3 }
 0x3f7   : > { %v13092_v46 = vadd.f32 %v9699_v18, %v9649_v53  ;;  %v4513_v39 = vpop.f32.mrf.mxu1 }
 0x3f8   : > { %v4837_v47 = vpop.f32.mrf.mxu0 }
 0x3f9   : > { %v13096_v8 = vadd.f32 %v4837_v47, %v4513_v39  ;;  %v9704_v32 = vpop.f32.mrf.mxu1  ;;  %10003 = vmatmul.mubr.msk.f32.vlgmr.msra.gmra.mxu1 %vm204_vm1, %v12593_v58 }
 0x3fa   : > { %v9754_v34 = vpop.f32.mrf.mxu0  ;;  %v5205_v29 = vadd.f32 %v9704_v32, %v12916_v59  ;;  %10005 = vmatprep.mubr.msk.f32.mxu1 %vm204_vm1, %v12599_v12 }
 0x3fb   : > { %v5045_v28 = vpop.f32.mrf.mxu1 }
 0x3fc   : > { %v5435_v24 = vpop.f32.mrf.mxu0  ;;  %v13103_v15 = vadd.f32 %v9754_v34, %v5205_v29  ;;  %v5204_v3 = vadd.f32 %v5045_v28, %v12922_v11 }
 0x3fd   : > { %v9707_v18 = vpop.f32.mrf.mxu1  ;;  %10006 = vmatmul.mubr.msk.f32.gmra.mxu1 %vm204_vm1, %v12605_v20 }
 0x3fe   : > { %v9757_v35 = vpop.f32.mrf.mxu0  ;;  %v13108_v40 = vadd.f32 %v5435_v24, %v5204_v3  ;;  %v5207_v58 = vadd.f32 %v9707_v18, %v12930_v14  ;;  %10008 = vmatprep.mubr.msk.f32.mxu1 %vm204_vm1, %v12611_v22 }
 0x3ff   : > { %v5055_v12 = vpop.f32.mrf.mxu1 }
 0x400   : > { %v5445_v59 = vpop.f32.mrf.mxu0  ;;  %v13113_v53 = vadd.f32 %v9757_v35, %v5207_v58  ;;  %v5206_v47 = vadd.f32 %v5055_v12, %v12934_v2 }
 0x401   : > { %v9710_v11 = vpop.f32.mrf.mxu1  ;;  %10009 = vmatmul.mubr.msk.f32.gmra.mxu1 %vm204_vm1, %v12617_v49 }
 0x402   : > { %v9760_v39 = vpop.f32.mrf.mxu0  ;;  %v13118_v34 = vadd.f32 %v5445_v59, %v5206_v47  ;;  %v5209_v20 = vadd.f32 %v9710_v11, %v12942_v21  ;;  %10011 = vmatprep.mubr.msk.f32.mxu1 %vm204_vm1, %v12623_v44 }
 0x403   : > { %v5065_v22 = vpop.f32.mrf.mxu1 }
 0x404   : > { %v5455_v14 = vpop.f32.mrf.mxu0  ;;  %v13123_v32 = vadd.f32 %v9760_v39, %v5209_v20  ;;  %v5208_v29 = vadd.f32 %v5065_v22, %v12946_v48 }
 0x405   : > { %v9713_v2 = vpop.f32.mrf.mxu1  ;;  %10012 = vmatmul.mubr.msk.f32.gmra.mxu1 %vm204_vm1, %v12629_v50 }
 0x406   : > { %v9763_v24 = vpop.f32.mrf.mxu0  ;;  %v13128_v28 = vadd.f32 %v5455_v14, %v5208_v29  ;;  %v5211_v49 = vadd.f32 %v9713_v2, %v12954_v43  ;;  %10014 = vmatprep.mubr.msk.f32.mxu1 %vm204_vm1, %v12635_v0 }
 0x407   : > { %v5075_v44 = vpop.f32.mrf.mxu1 }
 0x408   : > { %v5465_v21 = vpop.f32.mrf.mxu0  ;;  %v13133_v3 = vadd.f32 %v9763_v24, %v5211_v49  ;;  %v5210_v35 = vadd.f32 %v5075_v44, %v12958_v19 }
 0x409   : > { %v9716_v48 = vpop.f32.mrf.mxu1  ;;  %10015 = vmatmul.mubr.msk.f32.gmra.mxu1 %vm204_vm1, %v12641_v61 }
 0x40a   : > { %v9766_v18 = vpop.f32.mrf.mxu0  ;;  %v13138_v58 = vadd.f32 %v5465_v21, %v5210_v35  ;;  %v5213_v50 = vadd.f32 %v9716_v48, %v12966_v55  ;;  %10017 = vmatprep.mubr.msk.f32.mxu1 %vm204_vm1, %v12647_v57 }
 0x40b   : > { %v5085_v0 = vpop.f32.mrf.mxu1 }
 0x40c   : > { %v5475_v43 = vpop.f32.mrf.mxu0  ;;  %v13143_v59 = vadd.f32 %v9766_v18, %v5213_v50  ;;  %v5212_v12 = vadd.f32 %v5085_v0, %v12970_v30 }
 0x40d   : > { %v9719_v19 = vpop.f32.mrf.mxu1  ;;  %10018 = vmatmul.mubr.msk.f32.gmra.mxu1 %vm204_vm1, %v12653_v6 }
 0x40e   : > { %v9769_v47 = vpop.f32.mrf.mxu0  ;;  %v13148_v39 = vadd.f32 %v5475_v43, %v5212_v12  ;;  %v5215_v61 = vadd.f32 %v9719_v19, %v12978_v1  ;;  %10020 = vmatprep.mubr.msk.f32.mxu1 %vm204_vm1, %v12659_v41 }
 0x40f   : > { %v5095_v57 = vpop.f32.mrf.mxu1 }
 0x410   : > { %v5485_v55 = vpop.f32.mrf.mxu0  ;;  %v13153_v11 = vadd.f32 %v9769_v47, %v5215_v61  ;;  %v5214_v20 = vadd.f32 %v5095_v57, %v12982_v4  ;;  %v7206_v47 = vld [vmem:[#allocation2 + $0x122] sm:$0xff] }
 0x411   : > { %v9722_v30 = vpop.f32.mrf.mxu1  ;;  %10021 = vmatmul.mubr.msk.f32.gmra.mxu1 %vm204_vm1, %v12665_v45 }
 0x412   : > { %v9772_v14 = vpop.f32.mrf.mxu0  ;;  %v13158_v22 = vadd.f32 %v5485_v55, %v5214_v20  ;;  %v5217_v6 = vadd.f32 %v9722_v30, %v12990_v37  ;;  %10023 = vmatprep.mubr.msk.f32.mxu1 %vm204_vm1, %v12671_v13  ;;  %v7208_v30 = vld [vmem:[#allocation2 + $0x13a] sm:$0xff] }
 0x413   : > { %v5105_v41 = vpop.f32.mrf.mxu1 }
 0x414   : > { %v5495_v1 = vpop.f32.mrf.mxu0  ;;  %v13163_v29 = vadd.f32 %v9772_v14, %v5217_v6  ;;  %v5216_v24 = vadd.f32 %v5105_v41, %v12994_v25  ;;  %v7203_v25 = vld [vmem:[#allocation2 + $0xfa] sm:$0xff] }
 0x415   : > { %v9725_v4 = vpop.f32.mrf.mxu1  ;;  %10024 = vmatmul.mubr.msk.f32.gmra.mxu1 %vm204_vm1, %v12677_v26 }
 0x416   : > { %v9775_v2 = vpop.f32.mrf.mxu0  ;;  %v13168_v49 = vadd.f32 %v5495_v1, %v5216_v24  ;;  %v5219_v45 = vadd.f32 %v9725_v4, %v13002_v42  ;;  %10026 = vmatprep.mubr.msk.f32.mxu1 %vm204_vm1, %v12683_v27 }
 0x417   : > { %v5115_v13 = vpop.f32.mrf.mxu1 }
 0x418   : > { %v5505_v37 = vpop.f32.mrf.mxu0  ;;  %v13173_v21 = vadd.f32 %v9775_v2, %v5219_v45  ;;  %v5218_v44 = vadd.f32 %v5115_v13, %v13006_v16  ;;  %v7205_v16 = vld [vmem:[#allocation2 + $0x112] sm:$0xff] }
 0x419   : > { %v9728_v18 = vpop.f32.mrf.mxu1  ;;  %10027 = vmatmul.mubr.msk.f32.gmra.mxu1 %vm204_vm1, %v7203_v25 }
 0x41a   : > { %v9778_v35 = vpop.f32.mrf.mxu0  ;;  %v13177_v48 = vadd.f32 %v5505_v37, %v5218_v44  ;;  %v5221_v26 = vadd.f32 %v9728_v18, %v13014_v52  ;;  %10029 = vmatprep.mubr.msk.f32.mxu1 %vm204_vm1, %v12695_v17  ;;  %v7210_v37 = vld [vmem:[#allocation2 + $0x152] sm:$0xff] }
 0x41b   : > { %v5125_v27 = vpop.f32.mrf.mxu1 }
 0x41c   : > { %v5515_v42 = vpop.f32.mrf.mxu0  ;;  %v13182_v50 = vadd.f32 %v9778_v35, %v5221_v26  ;;  %v5220_v43 = vadd.f32 %v5125_v27, %v13018_v51  ;;  %v7207_v51 = vld [vmem:[#allocation2 + $0x12a] sm:$0xff] }
 0x41d   : > { %v9731_v12 = vpop.f32.mrf.mxu1  ;;  %10030 = vmatmul.mubr.msk.f32.gmra.mxu1 %vm204_vm1, %v7205_v16  ;;  %v7212_v27 = vld [vmem:[#allocation2 + $0x16a] sm:$0xff] }
 0x41e   : > { %v9781_v0 = vpop.f32.mrf.mxu0  ;;  %v13186_v19 = vadd.f32 %v5515_v42, %v5220_v43  ;;  %v5223_v61 = vadd.f32 %v9731_v12, %v13026_v60  ;;  %10032 = vmatprep.mubr.msk.f32.mxu1 %vm204_vm1, %v7206_v47 }
 0x41f   : > { %v5135_v17 = vpop.f32.mrf.mxu1 }
 0x420   : > { %v5525_v52 = vpop.f32.mrf.mxu0  ;;  %v13190_v55 = vadd.f32 %v9781_v0, %v5223_v61  ;;  %v5222_v57 = vadd.f32 %v5135_v17, %v13030_v56  ;;  %v7209_v56 = vld [vmem:[#allocation2 + $0x142] sm:$0xff] }
 0x421   : > { %v9734_v14 = vpop.f32.mrf.mxu1  ;;  %10033 = vmatmul.mubr.msk.f32.gmra.mxu1 %vm204_vm1, %v7207_v51 }
 0x422   : > { %v9784_v20 = vpop.f32.mrf.mxu0  ;;  %v13194_v6 = vadd.f32 %v5525_v52, %v5222_v57  ;;  %v5225_v1 = vadd.f32 %v9734_v14, %v13038_v7  ;;  %10035 = vmatprep.mubr.msk.f32.mxu1 %vm204_vm1, %v7208_v30 }
 0x423   : > { %v5145_v41 = vpop.f32.mrf.mxu1 }
 0x424   : > { %v5535_v60 = vpop.f32.mrf.mxu0  ;;  %v13198_v24 = vadd.f32 %v9784_v20, %v5225_v1  ;;  %v5224_v2 = vadd.f32 %v5145_v41, %v13042_v62  ;;  %v7211_v62 = vld [vmem:[#allocation2 + $0x15a] sm:$0xff] }
 0x425   : > { %v9737_v45 = vpop.f32.mrf.mxu1  ;;  %10036 = vmatmul.mubr.msk.f32.gmra.mxu1 %vm204_vm1, %v7209_v56  ;;  %v7216_v1 = vld [vmem:[#allocation2 + $0x19a] sm:$0xff] }
 0x426   : > { %v9787_v4 = vpop.f32.mrf.mxu0  ;;  %v13202_v13 = vadd.f32 %v5535_v60, %v5224_v2  ;;  %v5227_v44 = vadd.f32 %v9737_v45, %v13050_v31  ;;  %10038 = vmatprep.mubr.msk.f32.mxu1 %vm204_vm1, %v7210_v37 }
 0x427   : > { %v5155_v35 = vpop.f32.mrf.mxu1 }
 0x428   : > { %v5545_v7 = vpop.f32.mrf.mxu0  ;;  %v13206_v25 = vadd.f32 %v9787_v4, %v5227_v44  ;;  %v5226_v18 = vadd.f32 %v5155_v35, %v13054_v23  ;;  %v7213_v23 = vld [vmem:[#allocation2 + $0x172] sm:$0xff] }
 0x429   : > { %v9740_v42 = vpop.f32.mrf.mxu1  ;;  %10039 = vmatmul.mubr.msk.f32.gmra.mxu1 %vm204_vm1, %v7211_v62 }
 0x42a   : > { %v9790_v26 = vpop.f32.mrf.mxu0  ;;  %v13210_v43 = vadd.f32 %v5545_v7, %v5226_v18  ;;  %v5229_v0 = vadd.f32 %v9740_v42, %v13062_v10  ;;  %10041 = vmatprep.mubr.msk.f32.mxu1 %vm204_vm1, %v7212_v27 }
 0x42b   : > { %v5165_v16 = vpop.f32.mrf.mxu1 }
 0x42c   : > { %v5555_v31 = vpop.f32.mrf.mxu0  ;;  %v13214_v12 = vadd.f32 %v9790_v26, %v5229_v0  ;;  %v5228_v47 = vadd.f32 %v5165_v16, %v13066_v38 }
 0x42d   : > { %v9743_v52 = vpop.f32.mrf.mxu1  ;;  %10042 = vmatmul.mubr.msk.f32.gmra.mxu1 %vm204_vm1, %v7213_v23 }
 0x42e   : > { %v9793_v61 = vpop.f32.mrf.mxu0  ;;  %v13218_v17 = vadd.f32 %v5555_v31, %v5228_v47  ;;  %v5231_v57 = vadd.f32 %v9743_v52, %v13074_v5  ;;  %10044 = vmatprep.mubr.msk.f32.mxu1 %vm204_vm1, %v12888_v33 }
 0x42f   : > { %v5175_v20 = vpop.f32.mrf.mxu1 }
 0x430   : > { %v5565_v10 = vpop.f32.mrf.mxu0  ;;  %v13223_v51 = vadd.f32 %v9793_v61, %v5231_v57  ;;  %v5230_v14 = vadd.f32 %v5175_v20, %v13078_v9  ;;  %v7217_v9 = vld [vmem:[#allocation2 + $0x1a2] sm:$0xff] }
 0x431   : > { %v9746_v38 = vpop.f32.mrf.mxu1  ;;  %10045 = vmatmul.mubr.msk.f32.gmra.mxu1 %vm204_vm1, %v12898_v54 }
 0x432   : > { %v9796_v30 = vpop.f32.mrf.mxu0  ;;  %v13228_v60 = vadd.f32 %v5565_v10, %v5230_v14  ;;  %v5233_v41 = vadd.f32 %v9746_v38, %v13085_v36  ;;  %10047 = vmatprep.mubr.msk.f32.mxu1 %vm204_vm1, %v7216_v1 }
 0x433   : > { %v5185_v33 = vpop.f32.mrf.mxu1 }
 0x434   : > { %v5575_v5 = vpop.f32.mrf.mxu0  ;;  %v13232_v2 = vadd.f32 %v9796_v30, %v5233_v41  ;;  %v5232_v4 = vadd.f32 %v5185_v33, %v13088_v63 }
 0x435   : > { %v9749_v45 = vpop.f32.mrf.mxu1  ;;  %10048 = vmatmul.mubr.msk.f32.gmra.mxu1 %vm204_vm1, %v7217_v9 }
 0x436   : > { %v9799_v56 = vpop.f32.mrf.mxu0  ;;  %v13236_v37 = vadd.f32 %v5575_v5, %v5232_v4  ;;  %v5235_v54 = vadd.f32 %v9749_v45, %v13092_v46 }
 0x437   : > { %v5195_v7 = vpop.f32.mrf.mxu1 }
 0x438   : > { %v5585_v44 = vpop.f32.mrf.mxu0  ;;  %v13239_v36 = vadd.f32 %v9799_v56, %v5235_v54  ;;  %v5234_v35 = vadd.f32 %v5195_v7, %v13096_v8 }
 0x439   : > { %v9804_v26 = vpop.f32.mrf.mxu1 }
 0x43a   : > { %v9854_v18 = vpop.f32.mrf.mxu0  ;;  %v13242_v62 = vadd.f32 %v5585_v44, %v5234_v35  ;;  %v5985_v63 = vadd.f32 %v9804_v26, %v13103_v15 }
 0x43b   : > { %v5825_v27 = vpop.f32.mrf.mxu1 }
 0x43c   : > { %v13245_v42 = vpop.f32.mrf.mxu0  ;;  %v13247_v0 = vadd.f32 %v9854_v18, %v5985_v63  ;;  %v13250_v31 = vadd.f32 %v5825_v27, %v13108_v40 }
 0x43d   : > { %v9807_v16 = vpop.f32.mrf.mxu1 }
 0x43e   : > { %v9857_v46 = vpop.f32.mrf.mxu0  ;;  %v5987_v47 = vadd.f32 %v9807_v16, %v13113_v53 }
 0x43f   : > { %v5835_v8 = vpop.f32.mrf.mxu1 }
 0x440   : > { %v13253_v61 = vpop.f32.mrf.mxu0  ;;  %v13255_v23 = vadd.f32 %v9857_v46, %v5987_v47  ;;  %v13258_v52 = vadd.f32 %v5835_v8, %v13118_v34 }
 0x441   : > { %v9810_v57 = vpop.f32.mrf.mxu1 }
 0x442   : > { %v9860_v15 = vpop.f32.mrf.mxu0  ;;  %v5989_v10 = vadd.f32 %v9810_v57, %v13123_v32 }
 0x443   : > { %v5845_v40 = vpop.f32.mrf.mxu1 }
 0x444   : > { %v13261_v20 = vpop.f32.mrf.mxu0  ;;  %v13263_v14 = vadd.f32 %v9860_v15, %v5989_v10  ;;  %v13266_v30 = vadd.f32 %v5845_v40, %v13128_v28 }
 0x445   : > { %v9813_v38 = vpop.f32.mrf.mxu1 }
 0x446   : > { %v9863_v53 = vpop.f32.mrf.mxu0  ;;  %v5991_v1 = vadd.f32 %v9813_v38, %v13133_v3 }
 0x447   : > { %v5855_v34 = vpop.f32.mrf.mxu1 }
 0x448   : > { %v13269_v41 = vpop.f32.mrf.mxu0  ;;  %v13271_v5 = vadd.f32 %v9863_v53, %v5991_v1  ;;  %v13274_v33 = vadd.f32 %v5855_v34, %v13138_v58 }
 0x449   : > { %v9816_v4 = vpop.f32.mrf.mxu1 }
 0x44a   : > { %v9866_v32 = vpop.f32.mrf.mxu0  ;;  %v5993_v56 = vadd.f32 %v9816_v4, %v13143_v59 }
 0x44b   : > { %v5865_v28 = vpop.f32.mrf.mxu1 }
 0x44c   : > { %v13277_v9 = vpop.f32.mrf.mxu0  ;;  %v13279_v45 = vadd.f32 %v9866_v32, %v5993_v56  ;;  %v13282_v54 = vadd.f32 %v5865_v28, %v13148_v39 }
 0x44d   : > { %v9819_v44 = vpop.f32.mrf.mxu1 }
 0x44e   : > { %v9869_v3 = vpop.f32.mrf.mxu0  ;;  %v5995_v7 = vadd.f32 %v9819_v44, %v13153_v11 }
 0x44f   : > { %v5875_v58 = vpop.f32.mrf.mxu1 }
 0x450   : > { %v13285_v35 = vpop.f32.mrf.mxu0  ;;  %v13287_v18 = vadd.f32 %v9869_v3, %v5995_v7  ;;  %v13290_v26 = vadd.f32 %v5875_v58, %v13158_v22 }
 0x451   : > { %v9822_v63 = vpop.f32.mrf.mxu1 }
 0x452   : > { %v9872_v59 = vpop.f32.mrf.mxu0  ;;  %v5997_v27 = vadd.f32 %v9822_v63, %v13163_v29 }
 0x453   : > { %v5885_v39 = vpop.f32.mrf.mxu1 }
 0x454   : > { %v13293_v46 = vpop.f32.mrf.mxu0  ;;  %v13295_v16 = vadd.f32 %v9872_v59, %v5997_v27  ;;  %v13298_v47 = vadd.f32 %v5885_v39, %v13168_v49 }
 0x455   : > { %v9825_v8 = vpop.f32.mrf.mxu1 }
 0x456   : > { %v9875_v11 = vpop.f32.mrf.mxu0  ;;  %v5999_v15 = vadd.f32 %v9825_v8, %v13173_v21 }
 0x457   : > { %v5895_v22 = vpop.f32.mrf.mxu1 }
 0x458   : > { %v13301_v57 = vpop.f32.mrf.mxu0  ;;  %v13303_v10 = vadd.f32 %v9875_v11, %v5999_v15  ;;  %v13306_v40 = vadd.f32 %v5895_v22, %v13177_v48 }
 0x459   : > { %v9828_v53 = vpop.f32.mrf.mxu1 }
 0x45a   : > { %v9878_v29 = vpop.f32.mrf.mxu0  ;;  %v6001_v38 = vadd.f32 %v9828_v53, %v13182_v50 }
 0x45b   : > { %v5905_v49 = vpop.f32.mrf.mxu1 }
 0x45c   : > { %v13309_v1 = vpop.f32.mrf.mxu0  ;;  %v13311_v34 = vadd.f32 %v9878_v29, %v6001_v38  ;;  %v13314_v32 = vadd.f32 %v5905_v49, %v13186_v19 }
 0x45d   : > { %v9831_v4 = vpop.f32.mrf.mxu1 }
 0x45e   : > { %v9881_v21 = vpop.f32.mrf.mxu0  ;;  %v6003_v56 = vadd.f32 %v9831_v4, %v13190_v55 }
 0x45f   : > { %v5915_v48 = vpop.f32.mrf.mxu1 }
 0x460   : > { %v13317_v28 = vpop.f32.mrf.mxu0  ;;  %v13319_v3 = vadd.f32 %v9881_v21, %v6003_v56  ;;  %v13322_v44 = vadd.f32 %v5915_v48, %v13194_v6 }
 0x461   : > { %14377 = vst [vmem:[#allocation93_spill] sm:$0xff] %v13317_v28  ;;  %v9834_v7 = vpop.f32.mrf.mxu1 }
 0x462   : > { %v9884_v50 = vpop.f32.mrf.mxu0  ;;  %v6005_v58 = vadd.f32 %v9834_v7, %v13198_v24 }
 0x463   : > { %v5925_v19 = vpop.f32.mrf.mxu1 }
 0x464   : > { %v13325_v59 = vpop.f32.mrf.mxu0  ;;  %v13327_v63 = vadd.f32 %v9884_v50, %v6005_v58  ;;  %v13330_v27 = vadd.f32 %v5925_v19, %v13202_v13 }
 0x465   : > { %14378 = vst [vmem:[#allocation96_spill] sm:$0xff] %v13325_v59  ;;  %v9837_v39 = vpop.f32.mrf.mxu1 }
 0x466   : > { %14379 = vst [vmem:[#allocation40_spill] sm:$0xff] %v13330_v27  ;;  %v9887_v55 = vpop.f32.mrf.mxu0  ;;  %v6007_v11 = vadd.f32 %v9837_v39, %v13206_v25 }
 0x467   : > { %v5935_v6 = vpop.f32.mrf.mxu1 }
 0x468   : > { %v13333_v8 = vpop.f32.mrf.mxu0  ;;  %v13335_v15 = vadd.f32 %v9887_v55, %v6007_v11  ;;  %v13338_v22 = vadd.f32 %v5935_v6, %v13210_v43 }
 0x469   : > { %14380 = vst [vmem:[#allocation41_spill] sm:$0xff] %v13333_v8  ;;  %v9840_v29 = vpop.f32.mrf.mxu1 }
 0x46a   : > { %14381 = vst [vmem:[#allocation76_spill] sm:$0xff] %v13338_v22  ;;  %v9890_v24 = vpop.f32.mrf.mxu0  ;;  %v6009_v53 = vadd.f32 %v9840_v29, %v13214_v12 }
 0x46b   : > { %v5945_v13 = vpop.f32.mrf.mxu1 }
 0x46c   : > { %v13341_v38 = vpop.f32.mrf.mxu0  ;;  %v13343_v49 = vadd.f32 %v9890_v24, %v6009_v53  ;;  %v13346_v21 = vadd.f32 %v5945_v13, %v13218_v17 }
 0x46d   : > { %14382 = vst [vmem:[#allocation75_spill] sm:$0xff] %v13341_v38  ;;  %v9843_v4 = vpop.f32.mrf.mxu1 }
 0x46e   : > { %14383 = vst [vmem:[#allocation58_spill] sm:$0xff] %v13346_v21  ;;  %v9893_v25 = vpop.f32.mrf.mxu0  ;;  %v6011_v56 = vadd.f32 %v9843_v4, %v13223_v51 }
 0x46f   : > { %v5955_v43 = vpop.f32.mrf.mxu1 }
 0x470   : > { %v13349_v48 = vpop.f32.mrf.mxu0  ;;  %v13351_v50 = vadd.f32 %v9893_v25, %v6011_v56  ;;  %v13354_v7 = vadd.f32 %v5955_v43, %v13228_v60 }
 0x471   : > { %14384 = vst [vmem:[#allocation59_spill] sm:$0xff] %v13349_v48  ;;  %v9846_v58 = vpop.f32.mrf.mxu1 }
 0x472   : > { %14385 = vst [vmem:[#allocation95_spill] sm:$0xff] %v13354_v7  ;;  %v9896_v12 = vpop.f32.mrf.mxu0  ;;  %v6013_v19 = vadd.f32 %v9846_v58, %v13232_v2 }
 0x473   : > { %v5965_v17 = vpop.f32.mrf.mxu1 }
 0x474   : > { %v13357_v55 = vpop.f32.mrf.mxu0  ;;  %v13359_v39 = vadd.f32 %v9896_v12, %v6013_v19  ;;  %v13362_v11 = vadd.f32 %v5965_v17, %v13236_v37 }
 0x475   : > { %14386 = vst [vmem:[#allocation98_spill] sm:$0xff] %v13357_v55  ;;  %v9849_v6 = vpop.f32.mrf.mxu1 }
 0x476   : > { %14387 = vst [vmem:[#allocation43_spill] sm:$0xff] %v13362_v11  ;;  %v9899_v51 = vpop.f32.mrf.mxu0  ;;  %v6015_v24 = vadd.f32 %v9849_v6, %v13239_v36 }
 0x477   : > { %v5975_v60 = vpop.f32.mrf.mxu1 }
 0x478   : > { %v13365_v29 = vpop.f32.mrf.mxu0  ;;  %v13367_v53 = vadd.f32 %v9899_v51, %v6015_v24  ;;  %v13370_v13 = vadd.f32 %v5975_v60, %v13242_v62 }
 0x479   : > { %14388 = vst [vmem:[#allocation44_spill] sm:$0xff] %v13365_v29  ;;  %v9904_v2 = vpop.f32.mrf.mxu1 }
 0x47a   : > { %14389 = vst [vmem:[#allocation77_spill] sm:$0xff] %v13370_v13  ;;  %v13372_v25 = vpop.f32.mrf.mxu0  ;;  %v13375_v4 = vadd.f32 %v9904_v2, %v13247_v0 }
 0x47b   : > { %v6605_v37 = vpop.f32.mrf.mxu1 }
 0x47c   : > { %v13377_v56 = vpop.f32.mrf.mxu0 }
 0x47d   : > { %v9907_v43 = vpop.f32.mrf.mxu1 }
 0x47e   : > { %v13380_v36 = vadd.f32 %v9907_v43, %v13255_v23  ;;  %v13384_v58 = vpop.f32.mrf.mxu0 }
 0x47f   : > { %v13382_v12 = vpop.f32.mrf.mxu1 }
 0x480   : > { %v13391_v51 = vpop.f32.mrf.mxu0 }
 0x481   : > { %v9910_v19 = vpop.f32.mrf.mxu1 }
 0x482   : > { %v13387_v62 = vadd.f32 %v9910_v19, %v13263_v14  ;;  %v13398_v23 = vpop.f32.mrf.mxu0 }
 0x483   : > { %v13389_v17 = vpop.f32.mrf.mxu1 }
 0x484   : > { %v13405_v14 = vpop.f32.mrf.mxu0 }
 0x485   : > { %v9913_v0 = vpop.f32.mrf.mxu1 }
 0x486   : > { %v13394_v6 = vadd.f32 %v9913_v0, %v13271_v5  ;;  %v13412_v5 = vpop.f32.mrf.mxu0 }
 0x487   : > { %v13396_v24 = vpop.f32.mrf.mxu1 }
 0x489   : > { %v9916_v60 = vpop.f32.mrf.mxu1 }
 0x48a   : > { %v13401_v2 = vadd.f32 %v9916_v60, %v13279_v45  ;;  %v13419_v45 = vpop.f32.mrf.mxu0 }
 0x48b   : > { %v13403_v43 = vpop.f32.mrf.mxu1 }
 0x48d   : > { %v9919_v19 = vpop.f32.mrf.mxu1 }
 0x48e   : > { %v13408_v29 = vadd.f32 %v9919_v19, %v13287_v18  ;;  %v13426_v18 = vpop.f32.mrf.mxu0 }
 0x48f   : > { %v13410_v13 = vpop.f32.mrf.mxu1 }
 0x491   : > { %v9922_v0 = vpop.f32.mrf.mxu1 }
 0x492   : > { %v13415_v55 = vadd.f32 %v9922_v0, %v13295_v16  ;;  %v13433_v16 = vpop.f32.mrf.mxu0 }
 0x493   : > { %v13417_v11 = vpop.f32.mrf.mxu1 }
 0x495   : > { %v9925_v60 = vpop.f32.mrf.mxu1 }
 0x496   : > { %v13422_v48 = vadd.f32 %v9925_v60, %v13303_v10  ;;  %v13440_v10 = vpop.f32.mrf.mxu0 }
 0x497   : > { %v13424_v7 = vpop.f32.mrf.mxu1 }
 0x499   : > { %v9928_v19 = vpop.f32.mrf.mxu1 }
 0x49a   : > { %v13429_v38 = vadd.f32 %v9928_v19, %v13311_v34  ;;  %v13447_v34 = vpop.f32.mrf.mxu0 }
 0x49b   : > { %v13431_v21 = vpop.f32.mrf.mxu1 }
 0x49c   : > { %14390 = vst [vmem:[#allocation78_spill] sm:$0xff] %v13429_v38 }
 0x49d   : > { %v9931_v0 = vpop.f32.mrf.mxu1 }
 0x49e   : > { %v13436_v8 = vadd.f32 %v9931_v0, %v13319_v3  ;;  %v13454_v3 = vpop.f32.mrf.mxu0 }
 0x49f   : > { %v13438_v22 = vpop.f32.mrf.mxu1 }
 0x4a0   : > { %14391 = vst [vmem:[#allocation60_spill] sm:$0xff] %v13436_v8  ;;  %14392 = vst [vmem:[#allocation61_spill] sm:$0xff] %v13438_v22 }
 0x4a1   : > { %v9934_v60 = vpop.f32.mrf.mxu1 }
 0x4a2   : > { %v13443_v59 = vadd.f32 %v9934_v60, %v13327_v63  ;;  %v13461_v63 = vpop.f32.mrf.mxu0 }
 0x4a3   : > { %v13445_v27 = vpop.f32.mrf.mxu1 }
 0x4a4   : > { %14393 = vst [vmem:[#allocation97_spill] sm:$0xff] %v13443_v59  ;;  %14394 = vst [vmem:[#allocation100_spill] sm:$0xff] %v13445_v27 }
 0x4a5   : > { %v9937_v19 = vpop.f32.mrf.mxu1 }
 0x4a6   : > { %v13450_v38 = vadd.f32 %v9937_v19, %v13335_v15  ;;  %v13468_v15 = vpop.f32.mrf.mxu0 }
 0x4a7   : > { %v13452_v28 = vpop.f32.mrf.mxu1 }
 0x4a8   : > { %14395 = vst [vmem:[#allocation45_spill] sm:$0xff] %v13450_v38  ;;  %14396 = vst [vmem:[#allocation46_spill] sm:$0xff] %v13452_v28 }
 0x4a9   : > { %v9940_v0 = vpop.f32.mrf.mxu1 }
 0x4aa   : > { %v13457_v8 = vadd.f32 %v9940_v0, %v13343_v49  ;;  %v6374_v49 = vadd.f32 %v13245_v42, %v13250_v31  ;;  %v13477_v0 = vpop.f32.mrf.mxu0 }
 0x4ab   : > { %v13459_v22 = vpop.f32.mrf.mxu1 }
 0x4ac   : > { %14397 = vst [vmem:[#allocation80_spill] sm:$0xff] %v13457_v8  ;;  %14398 = vst [vmem:[#allocation79_spill] sm:$0xff] %v13459_v22  ;;  %v6764_v22 = vadd.f32 %v6605_v37, %v6374_v49 }
 0x4ad   : > { %v9943_v60 = vpop.f32.mrf.mxu1 }
 0x4ae   : > { %v13464_v59 = vadd.f32 %v9943_v60, %v13351_v50  ;;  %v7154_v42 = vadd.f32 %v13377_v56, %v6764_v22 }
 0x4af   : > { %v13466_v27 = vpop.f32.mrf.mxu1 }
 0x4b0   : > { %14399 = vst [vmem:[#allocation62_spill] sm:$0xff] %v13464_v59  ;;  %14400 = vst [vmem:[#allocation63_spill] sm:$0xff] %v13466_v27  ;;  %v6376_v59 = vadd.f32 %v13253_v61, %v13258_v52  ;;  %v13486_v27 = vpop.f32.mrf.mxu0  ;;  %v7157_v52 = vadd.f32 %v13384_v58, %v13380_v36 }
 0x4b1   : > { %v9946_v19 = vpop.f32.mrf.mxu1 }
 0x4b2   : > { %v13471_v38 = vadd.f32 %v9946_v19, %v13359_v39  ;;  %v7155_v19 = vadd.f32 %v13372_v25, %v13375_v4  ;;  %v6766_v31 = vadd.f32 %v13382_v12, %v6376_v59  ;;  %v13498_v49 = vpop.f32.mrf.mxu0 }
 0x4b3   : > { %v13473_v28 = vpop.f32.mrf.mxu1 }
 0x4b4   : > { %14401 = vst [vmem:[#allocation99_spill] sm:$0xff] %v13471_v38  ;;  %v7156_v25 = vadd.f32 %v13391_v51, %v6766_v31  ;;  %v13514_v12 = vpop.f32.mrf.mxu0 }
 0x4b5   : > { %v9949_v8 = vpop.f32.mrf.mxu1 }
 0x4b6   : > { %v13480_v50 = vadd.f32 %v9949_v8, %v13367_v53  ;;  %v6378_v8 = vadd.f32 %v13261_v20, %v13266_v30  ;;  %v6380_v20 = vadd.f32 %v13269_v41, %v13274_v33 }
 0x4b7   : > { %v13482_v60 = vpop.f32.mrf.mxu1 }
 0x4b8   : > { %v6768_v22 = vadd.f32 %v13389_v17, %v6378_v8  ;;  %v7159_v17 = vadd.f32 %v13398_v23, %v13387_v62  ;;  %v13530_v62 = vpop.f32.mrf.mxu0 }
 0x4b9   : > { %v10004_v39 = vpop.f32.mrf.mxu1 }
 0x4ba   : > { %v13494_v53 = vadd.f32 %v10004_v39, %v7155_v19  ;;  %v7158_v51 = vadd.f32 %v13405_v14, %v6768_v22  ;;  %v6770_v39 = vadd.f32 %v13396_v24, %v6380_v20  ;;  %v7161_v24 = vadd.f32 %v13412_v5, %v13394_v6  ;;  %v13546_v6 = vpop.f32.mrf.mxu0 }
 0x4bb   : > { %v7385_v38 = vpop.f32.mrf.mxu1 }
 0x4bc   : > { %v13496_v37 = vadd.f32 %v7385_v38, %v7154_v42  ;;  %v7577_v30 = vsel %vm204_vm1, %v13494_v53, 0.0  ;;  %v6382_v42 = vadd.f32 %v13277_v9, %v13282_v54 }
 0x4bd   : > { %v10007_v61 = vpop.f32.mrf.mxu1 }
 0x4be   : > { %v7576_v59 = vsel %vm204_vm1, %v13496_v37, 0.0  ;;  %v13510_v38 = vadd.f32 %v10007_v61, %v7157_v52  ;;  %v7160_v52 = vadd.f32 %v13419_v45, %v6770_v39 }
 0x4bf   : > { %v7395_v4 = vpop.f32.mrf.mxu1  ;;  %v7578_v36 = vadd.f32 %v7577_v30, %v7576_v59  ;;  %v6384_v59 = vadd.f32 %v13285_v35, %v13290_v26 }
 0x4c0   : > { %v13512_v56 = vadd.f32 %v7395_v4, %v7156_v25  ;;  %v7581_v31 = vsel %vm204_vm1, %v13510_v38, 0.0  ;;  %v6772_v25 = vadd.f32 %v13403_v43, %v6382_v42  ;;  %v7163_v43 = vadd.f32 %v13426_v18, %v13401_v2  ;;  %v13562_v2 = vpop.f32.mrf.mxu0 }
 0x4c1   : > { %v10010_v58 = vpop.f32.mrf.mxu1 }
 0x4c2   : > { %v7579_v41 = vsel %vm204_vm1, %v13512_v56, 0.0  ;;  %v13526_v8 = vadd.f32 %v10010_v58, %v7159_v17  ;;  %v6774_v58 = vadd.f32 %v13410_v13, %v6384_v59  ;;  %v7165_v13 = vadd.f32 %v13440_v10, %v13408_v29  ;;  %v13578_v29 = vpop.f32.mrf.mxu0 }
 0x4c3   : > { %v7580_v33 = vadd.f32 %v7579_v41, %v7578_v36  ;;  %v7405_v19 = vpop.f32.mrf.mxu1  ;;  %v7162_v36 = vadd.f32 %v13433_v16, %v6772_v25 }
 0x4c4   : > { %v13528_v61 = vadd.f32 %v7405_v19, %v7158_v51  ;;  %v7585_v4 = vsel %vm204_vm1, %v13526_v8, 0.0  ;;  %v6386_v51 = vadd.f32 %v13293_v46, %v13298_v47  ;;  %v7164_v19 = vadd.f32 %v13447_v34, %v6774_v58  ;;  %v14402_v58 = vld [vmem:[#allocation93_spill] sm:$0xff] }
 0x4c5   : > { %v7582_v23 = vadd.f32 %v7581_v31, %v7580_v33  ;;  %v10013_v14 = vpop.f32.mrf.mxu1 }
 0x4c6   : > { %v7583_v9 = vsel %vm204_vm1, %v13528_v61, 0.0  ;;  %v13542_v20 = vadd.f32 %v10013_v14, %v7161_v24  ;;  %v6776_v42 = vadd.f32 %v13417_v11, %v6386_v51  ;;  %v7167_v11 = vadd.f32 %v13454_v3, %v13415_v55  ;;  %v7105_v55 = vpop.f32.mrf.mxu0 }
 0x4c7   : > { %v7584_v54 = vadd.f32 %v7583_v9, %v7582_v23  ;;  %v7415_v22 = vpop.f32.mrf.mxu1  ;;  %v6388_v23 = vadd.f32 %v13301_v57, %v13306_v40 }
 0x4c8   : > { %v13544_v30 = vadd.f32 %v7415_v22, %v7160_v52  ;;  %v7589_v39 = vsel %vm204_vm1, %v13542_v20, 0.0  ;;  %v7166_v25 = vadd.f32 %v13461_v63, %v6776_v42  ;;  %v6390_v22 = vadd.f32 %v13309_v1, %v13314_v32 }
 0x4c9   : > { %v7586_v5 = vadd.f32 %v7585_v4, %v7584_v54  ;;  %v10016_v45 = vpop.f32.mrf.mxu1  ;;  %v6778_v9 = vadd.f32 %v13424_v7, %v6388_v23  ;;  %v7169_v7 = vadd.f32 %v13468_v15, %v13422_v48  ;;  %v9990_v48 = vpop.f32.mrf.mxu0 }
 0x4ca   : > { %v7587_v35 = vsel %vm204_vm1, %v13544_v30, 0.0  ;;  %v13558_v41 = vadd.f32 %v10016_v45, %v7163_v43  ;;  %v6780_v43 = vadd.f32 %v13431_v21, %v6390_v22 }
 0x4cb   : > { %v7588_v26 = vadd.f32 %v7587_v35, %v7586_v5  ;;  %v7425_v17 = vpop.f32.mrf.mxu1  ;;  %v7168_v45 = vadd.f32 %v13477_v0, %v6778_v9  ;;  %v6392_v35 = vadd.f32 %v14402_v58, %v13322_v44 }
 0x4cc   : > { %v13560_v33 = vadd.f32 %v7425_v17, %v7162_v36  ;;  %v7593_v14 = vsel %vm204_vm1, %v13558_v41, 0.0 }
 0x4cd   : > { %v7590_v18 = vadd.f32 %v7589_v39, %v7588_v26  ;;  %v10019_v16 = vpop.f32.mrf.mxu1  ;;  %v14403_v39 = vld [vmem:[#allocation78_spill] sm:$0xff] }
 0x4ce   : > { %v7591_v46 = vsel %vm204_vm1, %v13560_v33, 0.0  ;;  %v13574_v24 = vadd.f32 %v10019_v16, %v7165_v13  ;;  %v7171_v21 = vadd.f32 %v13486_v27, %v14403_v39  ;;  %v14404_v16 = vld [vmem:[#allocation61_spill] sm:$0xff]  ;;  %v7115_v27 = vpop.f32.mrf.mxu0 }
 0x4cf   : > { %v7592_v47 = vadd.f32 %v7591_v46, %v7590_v18  ;;  %v7435_v31 = vpop.f32.mrf.mxu1  ;;  %v7170_v18 = vadd.f32 %v13498_v49, %v6780_v43  ;;  %v6782_v13 = vadd.f32 %v14404_v16, %v6392_v35  ;;  %v14405_v46 = vld [vmem:[#allocation40_spill] sm:$0xff]  ;;  %v14414_v16 = vld [vmem:[#allocation75_spill] sm:$0xff] }
 0x4d0   : > { %v13576_v52 = vadd.f32 %v7435_v31, %v7164_v19  ;;  %v7597_v59 = vsel %vm204_vm1, %v13574_v24, 0.0 }
 0x4d1   : > { %v7594_v10 = vadd.f32 %v7593_v14, %v7592_v47  ;;  %v10022_v34 = vpop.f32.mrf.mxu1  ;;  %v14406_v47 = vld [vmem:[#allocation96_spill] sm:$0xff]  ;;  %v7172_v9 = vadd.f32 %v13530_v62, %v6782_v13 }
 0x4d2   : > { %v7595_v57 = vsel %vm204_vm1, %v13576_v52, 0.0  ;;  %v13590_v4 = vadd.f32 %v10022_v34, %v7167_v11  ;;  %v6394_v31 = vadd.f32 %v14406_v47, %v14405_v46  ;;  %v14407_v11 = vld [vmem:[#allocation60_spill] sm:$0xff]  ;;  %v14415_v47 = vld [vmem:[#allocation45_spill] sm:$0xff] }
 0x4d3   : > { %v7596_v40 = vadd.f32 %v7595_v57, %v7594_v10  ;;  %v7445_v54 = vpop.f32.mrf.mxu1  ;;  %v14408_v57 = vld [vmem:[#allocation100_spill] sm:$0xff] }
 0x4d4   : > { %v13592_v5 = vadd.f32 %v7445_v54, %v7166_v25  ;;  %v7601_v26 = vsel %vm204_vm1, %v13590_v4, 0.0  ;;  %v7173_v25 = vadd.f32 %v13514_v12, %v14407_v11  ;;  %v9993_v12 = vpop.f32.mrf.mxu0 }
 0x4d5   : > { %v7598_v3 = vadd.f32 %v7597_v59, %v7596_v40  ;;  %v10025_v63 = vpop.f32.mrf.mxu1  ;;  %v6784_v40 = vadd.f32 %v14408_v57, %v6394_v31  ;;  %v7177_v31 = vadd.f32 %v13578_v29, %v14415_v47  ;;  %v14417_v57 = vld [vmem:[#allocation95_spill] sm:$0xff] }
 0x4d6   : > { %v7599_v1 = vsel %vm204_vm1, %v13592_v5, 0.0  ;;  %v13604_v17 = vadd.f32 %v10025_v63, %v7169_v7  ;;  %v14410_v63 = vld [vmem:[#allocation41_spill] sm:$0xff] }
 0x4d7   : > { %v7600_v32 = vadd.f32 %v7599_v1, %v7598_v3  ;;  %v7455_v36 = vpop.f32.mrf.mxu1  ;;  %v14409_v3 = vld [vmem:[#allocation76_spill] sm:$0xff]  ;;  %v7174_v35 = vadd.f32 %v13562_v2, %v6784_v40  ;;  %v14418_v40 = vld [vmem:[#allocation59_spill] sm:$0xff] }
 0x4d8   : > { %v13606_v51 = vadd.f32 %v7455_v36, %v7168_v45  ;;  %v7605_v23 = vsel %vm204_vm1, %v13604_v17, 0.0  ;;  %v6396_v7 = vadd.f32 %v14410_v63, %v14409_v3  ;;  %v14411_v36 = vld [vmem:[#allocation97_spill] sm:$0xff] }
 0x4d9   : > { %v7602_v15 = vadd.f32 %v7601_v26, %v7600_v32  ;;  %v10028_v0 = vpop.f32.mrf.mxu1  ;;  %v7175_v58 = vadd.f32 %v13546_v6, %v14411_v36  ;;  %v14412_v26 = vld [vmem:[#allocation46_spill] sm:$0xff]  ;;  %v7125_v6 = vpop.f32.mrf.mxu0 }
 0x4da   : > { %v7603_v44 = vsel %vm204_vm1, %v13606_v51, 0.0  ;;  %v13618_v14 = vadd.f32 %v10028_v0, %v7171_v21 }
 0x4db   : > { %v7604_v19 = vadd.f32 %v7603_v44, %v7602_v15  ;;  %v7465_v42 = vpop.f32.mrf.mxu1  ;;  %v6786_v15 = vadd.f32 %v14412_v26, %v6396_v7  ;;  %v9996_v63 = vpop.f32.mrf.mxu0  ;;  %v14419_v7 = vld [vmem:[#allocation80_spill] sm:$0xff] }
 0x4dc   : > { %v13620_v10 = vadd.f32 %v7465_v42, %v7170_v18  ;;  %v7609_v45 = vsel %vm204_vm1, %v13618_v14, 0.0  ;;  %v14413_v18 = vld [vmem:[#allocation58_spill] sm:$0xff] }
 0x4dd   : > { %v7606_v34 = vadd.f32 %v7605_v23, %v7604_v19  ;;  %v10031_v49 = vpop.f32.mrf.mxu1  ;;  %v6398_v13 = vadd.f32 %v14414_v16, %v14413_v18  ;;  %v7176_v23 = vadd.f32 %v7105_v55, %v6786_v15  ;;  %v14421_v15 = vld [vmem:[#allocation43_spill] sm:$0xff] }
 0x4de   : > { %v7607_v54 = vsel %vm204_vm1, %v13620_v10, 0.0  ;;  %v13632_v43 = vadd.f32 %v10031_v49, %v7173_v25 }
 0x4df   : > { %v7608_v22 = vadd.f32 %v7607_v54, %v7606_v34  ;;  %v7475_v59 = vpop.f32.mrf.mxu1  ;;  %v14416_v34 = vld [vmem:[#allocation79_spill] sm:$0xff]  ;;  %v6400_v54 = vadd.f32 %v14418_v40, %v14417_v57 }
 0x4e0   : > { %v13634_v1 = vadd.f32 %v7475_v59, %v7172_v9  ;;  %v7613_v44 = vsel %vm204_vm1, %v13632_v43, 0.0  ;;  %v6788_v49 = vadd.f32 %v14416_v34, %v6398_v13  ;;  %v7135_v13 = vpop.f32.mrf.mxu0 }
 0x4e1   : > { %v7610_v32 = vadd.f32 %v7609_v45, %v7608_v22  ;;  %v10034_v62 = vpop.f32.mrf.mxu1  ;;  %v7179_v45 = vadd.f32 %v9990_v48, %v14419_v7 }
 0x4e2   : > { %v7611_v0 = vsel %vm204_vm1, %v13634_v1, 0.0  ;;  %v13646_v19 = vadd.f32 %v10034_v62, %v7175_v58  ;;  %v14420_v62 = vld [vmem:[#allocation63_spill] sm:$0xff] }
 0x4e3   : > { %v7612_v39 = vadd.f32 %v7611_v0, %v7610_v32  ;;  %v7485_v21 = vpop.f32.mrf.mxu1  ;;  %v7178_v32 = vadd.f32 %v7115_v27, %v6788_v49  ;;  %v6790_v36 = vadd.f32 %v14420_v62, %v6400_v54  ;;  %v14422_v0 = vld [vmem:[#allocation98_spill] sm:$0xff]  ;;  %v14424_v49 = vld [vmem:[#allocation77_spill] sm:$0xff]  ;;  %v9999_v54 = vpop.f32.mrf.mxu0 }
 0x4e4   : > { %v13648_v42 = vadd.f32 %v7485_v21, %v7174_v35  ;;  %v7617_v22 = vsel %vm204_vm1, %v13646_v19, 0.0 }
 0x4e5   : > { %v7614_v46 = vadd.f32 %v7613_v44, %v7612_v39  ;;  %v10037_v2 = vpop.f32.mrf.mxu1  ;;  %v6402_v39 = vadd.f32 %v14422_v0, %v14421_v15  ;;  %v14423_v44 = vld [vmem:[#allocation62_spill] sm:$0xff]  ;;  %v7185_v0 = vadd.f32 %v9999_v54, %v13480_v50 }
 0x4e6   : > { %v7615_v11 = vsel %vm204_vm1, %v13648_v42, 0.0  ;;  %v13659_v59 = vadd.f32 %v10037_v2, %v7177_v31  ;;  %v7180_v2 = vadd.f32 %v7125_v6, %v6790_v36 }
 0x4e7   : > { %v7616_v25 = vadd.f32 %v7615_v11, %v7614_v46  ;;  %v7495_v9 = vpop.f32.mrf.mxu1  ;;  %v7181_v46 = vadd.f32 %v9993_v12, %v14423_v44  ;;  %v6792_v47 = vadd.f32 %v13473_v28, %v6402_v39  ;;  %v14425_v11 = vld [vmem:[#allocation44_spill] sm:$0xff]  ;;  %v14426_v12 = vld [vmem:[#allocation99_spill] sm:$0xff] }
 0x4e8   : > { %v13661_v3 = vadd.f32 %v7495_v9, %v7176_v23  ;;  %v7621_v21 = vsel %vm204_vm1, %v13659_v59, 0.0  ;;  %v7183_v6 = vadd.f32 %v9996_v63, %v14426_v12 }
 0x4e9   : > { %v7618_v29 = vadd.f32 %v7617_v22, %v7616_v25  ;;  %v10040_v55 = vpop.f32.mrf.mxu1  ;;  %v6404_v25 = vadd.f32 %v14425_v11, %v14424_v49 }
 0x4ea   : > { %v7619_v58 = vsel %vm204_vm1, %v13661_v3, 0.0  ;;  %v13671_v18 = vadd.f32 %v10040_v55, %v7179_v45  ;;  %v7182_v55 = vadd.f32 %v7135_v13, %v6792_v47 }
 0x4eb   : > { %v7620_v35 = vadd.f32 %v7619_v58, %v7618_v29  ;;  %v7505_v26 = vpop.f32.mrf.mxu1  ;;  %v6794_v28 = vadd.f32 %v13482_v60, %v6404_v25 }
 0x4ec   : > { %v13673_v16 = vadd.f32 %v7505_v26, %v7178_v32  ;;  %v7625_v9 = vsel %vm204_vm1, %v13671_v18, 0.0 }
 0x4ed   : > { %v7622_v48 = vadd.f32 %v7621_v21, %v7620_v35  ;;  %v10043_v27 = vpop.f32.mrf.mxu1  ;;  %v7145_v35 = vpop.f32.mrf.mxu0 }
 0x4ee   : > { %v7623_v31 = vsel %vm204_vm1, %v13673_v16, 0.0  ;;  %v7571_v57 = vadd.f32 %v10043_v27, %v7181_v46  ;;  %v7184_v39 = vadd.f32 %v7145_v35, %v6794_v28 }
 0x4ef   : > { %v7624_v23 = vadd.f32 %v7623_v31, %v7622_v48  ;;  %v7515_v34 = vpop.f32.mrf.mxu1 }
 0x4f0   : > { %v7570_v40 = vadd.f32 %v7515_v34, %v7180_v2  ;;  %v7629_v62 = vsel %vm204_vm1, %v7571_v57, 0.0 }
 0x4f1   : > { %v7626_v22 = vadd.f32 %v7625_v9, %v7624_v23  ;;  %v10046_v29 = vpop.f32.mrf.mxu1 }
 0x4f2   : > { %v7627_v7 = vsel %vm204_vm1, %v7570_v40, 0.0  ;;  %v7573_v36 = vadd.f32 %v10046_v29, %v7183_v6 }
 0x4f3   : > { %v7628_v45 = vadd.f32 %v7627_v7, %v7626_v22  ;;  %v7525_v32 = vpop.f32.mrf.mxu1 }
 0x4f4   : > { %v7572_v58 = vadd.f32 %v7525_v32, %v7182_v55  ;;  %v7633_v60 = vsel %vm204_vm1, %v7573_v36, 0.0 }
 0x4f5   : > { %v7630_v26 = vadd.f32 %v7629_v62, %v7628_v45  ;;  %v10049_v15 = vpop.f32.mrf.mxu1 }
 0x4f6   : > { %v7631_v21 = vsel %vm204_vm1, %v7572_v58, 0.0  ;;  %v7575_v48 = vadd.f32 %v10049_v15, %v7185_v0 }
 0x4f7   : > { %v7632_v63 = vadd.f32 %v7631_v21, %v7630_v26  ;;  %v7535_v13 = vpop.f32.mrf.mxu1 }
 0x4f8   : > { %v7574_v27 = vadd.f32 %v7535_v13, %v7184_v39  ;;  %v7637_v47 = vsel %vm204_vm1, %v7575_v48, 0.0 }
 0x4f9   : > { %v7634_v44 = vadd.f32 %v7633_v60, %v7632_v63 }
 0x4fa   : > { %v7635_v46 = vsel %vm204_vm1, %v7574_v27, 0.0 }
 0x4fb   : > { %v7636_v2 = vadd.f32 %v7635_v46, %v7634_v44 }
 0x4fd   : > { %v7638_v31 = vadd.f32 %v7637_v47, %v7636_v2 }
 0x4ff   : > { %v7639_v23 = vrot.slane %v7638_v31, 4 }
 0x501   : > { %v7640_v34 = vadd.f32 %v7639_v23, %v7638_v31 }
 0x503   : > { %v7641_v49 = vrot.slane %v7640_v34, 2 }
 0x505   : > { %v7642_v50 = vadd.f32 %v7641_v49, %v7640_v34 }
 0x507   : > { %v7643_v11 = vrot.slane %v7642_v50, 1 }
 0x509   : > { %v7644_v25 = vadd.f32 %v7643_v11, %v7642_v50 }
 0x50b   : > { %v7645_v9 = vmul.f32 0.00390625, %v7644_v25 }
 0x50d   : > { %v13693_v54 = vsub.f32 %v13576_v52, %v7645_v9  ;;  %v13696_v22 = vsub.f32 %v13574_v24, %v7645_v9  ;;  %v13699_v29 = vsub.f32 %v13592_v5, %v7645_v9  ;;  %v13702_v12 = vsub.f32 %v13590_v4, %v7645_v9 }
 0x50e   : > { %v13705_v6 = vsub.f32 %v13606_v51, %v7645_v9  ;;  %v13708_v55 = vsub.f32 %v13604_v17, %v7645_v9  ;;  %v13711_v28 = vsub.f32 %v13620_v10, %v7645_v9  ;;  %v13714_v52 = vsub.f32 %v13618_v14, %v7645_v9 }
 0x50f   : > { %v13717_v24 = vsub.f32 %v13634_v1, %v7645_v9  ;;  %v13720_v5 = vsub.f32 %v13632_v43, %v7645_v9  ;;  %v13723_v4 = vsub.f32 %v13648_v42, %v7645_v9  ;;  %v13726_v51 = vsub.f32 %v13646_v19, %v7645_v9 }
 0x510   : > { %v13729_v17 = vsub.f32 %v13661_v3, %v7645_v9  ;;  %v13732_v10 = vsub.f32 %v13659_v59, %v7645_v9  ;;  %v13735_v14 = vsub.f32 %v13673_v16, %v7645_v9  ;;  %v13738_v1 = vsub.f32 %v13671_v18, %v7645_v9 }
 0x511   : > { %v13740_v43 = vsub.f32 %v7570_v40, %v7645_v9  ;;  %v13742_v7 = vsub.f32 %v7571_v57, %v7645_v9  ;;  %v13744_v42 = vsub.f32 %v7572_v58, %v7645_v9  ;;  %v13746_v19 = vsub.f32 %v7573_v36, %v7645_v9 }
 0x512   : > { %v13748_v45 = vsub.f32 %v7574_v27, %v7645_v9  ;;  %v13750_v3 = vsub.f32 %v7575_v48, %v7645_v9  ;;  %v13753_v59 = vsub.f32 %v13496_v37, %v7645_v9  ;;  %v13756_v16 = vsub.f32 %v13494_v53, %v7645_v9 }
 0x513   : > { %v13759_v18 = vsub.f32 %v13512_v56, %v7645_v9  ;;  %v13762_v57 = vsub.f32 %v13510_v38, %v7645_v9  ;;  %v13769_v62 = vsub.f32 %v13528_v61, %v7645_v9  ;;  %v13774_v53 = vsub.f32 %v13526_v8, %v7645_v9 }
 0x514   : > { %v7678_v40 = vmul.f32 %v13753_v59, %v13753_v59  ;;  %v7679_v32 = vmul.f32 %v13756_v16, %v13756_v16  ;;  %v13781_v35 = vsub.f32 %v13544_v30, %v7645_v9  ;;  %v13787_v8 = vsub.f32 %v13542_v20, %v7645_v9 }
 0x515   : > { %v7680_v37 = vmul.f32 %v13759_v18, %v13759_v18  ;;  %v7681_v56 = vmul.f32 %v13762_v57, %v13762_v57  ;;  %v7682_v61 = vmul.f32 %v13769_v62, %v13769_v62  ;;  %v7683_v0 = vmul.f32 %v13774_v53, %v13774_v53 }
 0x516   : > { %v7710_v38 = vsel %vm204_vm1, %v7678_v40, 0.0  ;;  %v7711_v36 = vsel %vm204_vm1, %v7679_v32, 0.0  ;;  %v13793_v63 = vsub.f32 %v13560_v33, %v7645_v9  ;;  %v7684_v30 = vmul.f32 %v13781_v35, %v13781_v35 }
 0x517   : > { %v7712_v58 = vadd.f32 %v7711_v36, %v7710_v38  ;;  %v7713_v26 = vsel %vm204_vm1, %v7680_v37, 0.0  ;;  %v7715_v39 = vsel %vm204_vm1, %v7681_v56, 0.0  ;;  %v7717_v13 = vsel %vm204_vm1, %v7682_v61, 0.0 }
 0x518   : > { %v13799_v48 = vsub.f32 %v13558_v41, %v7645_v9  ;;  %v7685_v20 = vmul.f32 %v13787_v8, %v13787_v8  ;;  %v7719_v27 = vsel %vm204_vm1, %v7683_v0, 0.0  ;;  %v7686_v46 = vmul.f32 %v13793_v63, %v13793_v63 }
 0x519   : > { %v7714_v15 = vadd.f32 %v7713_v26, %v7712_v58  ;;  %v7721_v33 = vsel %vm204_vm1, %v7684_v30, 0.0  ;;  %v7688_v41 = vmul.f32 %v13693_v54, %v13693_v54  ;;  %v7689_v50 = vmul.f32 %v13696_v22, %v13696_v22 }
 0x51a   : > { %v7687_v47 = vmul.f32 %v13799_v48, %v13799_v48  ;;  %v7723_v31 = vsel %vm204_vm1, %v7685_v20, 0.0  ;;  %v7725_v34 = vsel %vm204_vm1, %v7686_v46, 0.0  ;;  %v7690_v9 = vmul.f32 %v13699_v29, %v13699_v29 }
 0x51b   : > { %v7716_v21 = vadd.f32 %v7715_v39, %v7714_v15  ;;  %v7729_v40 = vsel %vm204_vm1, %v7688_v41, 0.0  ;;  %v7691_v37 = vmul.f32 %v13702_v12, %v13702_v12  ;;  %v7731_v56 = vsel %vm204_vm1, %v7689_v50, 0.0 }
 0x51c   : > { %v7727_v11 = vsel %vm204_vm1, %v7687_v47, 0.0  ;;  %v7692_v36 = vmul.f32 %v13705_v6, %v13705_v6  ;;  %v7733_v58 = vsel %vm204_vm1, %v7690_v9, 0.0  ;;  %v7693_v26 = vmul.f32 %v13708_v55, %v13708_v55 }
 0x51d   : > { %v7718_v60 = vadd.f32 %v7717_v13, %v7716_v21  ;;  %v7735_v15 = vsel %vm204_vm1, %v7691_v37, 0.0  ;;  %v7694_v39 = vmul.f32 %v13711_v28, %v13711_v28  ;;  %v7695_v13 = vmul.f32 %v13714_v52, %v13714_v52 }
 0x51e   : > { %v7737_v21 = vsel %vm204_vm1, %v7692_v36, 0.0 }
 0x51f   : > { %v7720_v44 = vadd.f32 %v7719_v27, %v7718_v60  ;;  %v7739_v60 = vsel %vm204_vm1, %v7693_v26, 0.0  ;;  %v7696_v27 = vmul.f32 %v13717_v24, %v13717_v24 }
 0x521   : > { %v7722_v2 = vadd.f32 %v7721_v33, %v7720_v44  ;;  %v7741_v44 = vsel %vm204_vm1, %v7694_v39, 0.0  ;;  %v7697_v33 = vmul.f32 %v13720_v5, %v13720_v5 }
 0x523   : > { %v7724_v23 = vadd.f32 %v7723_v31, %v7722_v2  ;;  %v7743_v2 = vsel %vm204_vm1, %v7695_v13, 0.0  ;;  %v7698_v31 = vmul.f32 %v13723_v4, %v13723_v4 }
 0x525   : > { %v7726_v49 = vadd.f32 %v7725_v34, %v7724_v23  ;;  %v7745_v23 = vsel %vm204_vm1, %v7696_v27, 0.0  ;;  %v7699_v34 = vmul.f32 %v13726_v51, %v13726_v51 }
 0x527   : > { %v7728_v25 = vadd.f32 %v7727_v11, %v7726_v49  ;;  %v7747_v49 = vsel %vm204_vm1, %v7697_v33, 0.0  ;;  %v7700_v11 = vmul.f32 %v13729_v17, %v13729_v17 }
 0x529   : > { %v7730_v32 = vadd.f32 %v7729_v40, %v7728_v25  ;;  %v7749_v25 = vsel %vm204_vm1, %v7698_v31, 0.0  ;;  %v7701_v40 = vmul.f32 %v13732_v10, %v13732_v10 }
 0x52b   : > { %v7732_v38 = vadd.f32 %v7731_v56, %v7730_v32  ;;  %v7751_v32 = vsel %vm204_vm1, %v7699_v34, 0.0  ;;  %v7702_v56 = vmul.f32 %v13735_v14, %v13735_v14 }
 0x52d   : > { %v7734_v61 = vadd.f32 %v7733_v58, %v7732_v38  ;;  %v7753_v38 = vsel %vm204_vm1, %v7700_v11, 0.0  ;;  %v7703_v58 = vmul.f32 %v13738_v1, %v13738_v1 }
 0x52f   : > { %v7736_v0 = vadd.f32 %v7735_v15, %v7734_v61  ;;  %v7755_v61 = vsel %vm204_vm1, %v7701_v40, 0.0  ;;  %v7704_v15 = vmul.f32 %v13740_v43, %v13740_v43 }
 0x531   : > { %v7738_v30 = vadd.f32 %v7737_v21, %v7736_v0  ;;  %v7757_v0 = vsel %vm204_vm1, %v7702_v56, 0.0  ;;  %v7705_v21 = vmul.f32 %v13742_v7, %v13742_v7 }
 0x533   : > { %v7740_v20 = vadd.f32 %v7739_v60, %v7738_v30  ;;  %v7759_v30 = vsel %vm204_vm1, %v7703_v58, 0.0  ;;  %v7706_v60 = vmul.f32 %v13744_v42, %v13744_v42 }
 0x535   : > { %v7742_v46 = vadd.f32 %v7741_v44, %v7740_v20  ;;  %v7761_v20 = vsel %vm204_vm1, %v7704_v15, 0.0  ;;  %v7707_v44 = vmul.f32 %v13746_v19, %v13746_v19 }
 0x537   : > { %v7744_v47 = vadd.f32 %v7743_v2, %v7742_v46  ;;  %v7763_v46 = vsel %vm204_vm1, %v7705_v21, 0.0  ;;  %v7708_v2 = vmul.f32 %v13748_v45, %v13748_v45 }
 0x539   : > { %v7746_v41 = vadd.f32 %v7745_v23, %v7744_v47  ;;  %v7765_v47 = vsel %vm204_vm1, %v7706_v60, 0.0  ;;  %v7709_v23 = vmul.f32 %v13750_v3, %v13750_v3 }
 0x53b   : > { %v7748_v50 = vadd.f32 %v7747_v49, %v7746_v41  ;;  %v7767_v41 = vsel %vm204_vm1, %v7707_v44, 0.0  ;;  %v7769_v49 = vsel %vm204_vm1, %v7708_v2, 0.0  ;;  %v7771_v11 = vsel %vm204_vm1, %v7709_v23, 0.0  ;;  %v14430_v44 = vld [vmem:[#allocation6_spill] sm:$0xff]  ;;  %v14432_v2 = vld [vmem:[#allocation4_spill] sm:$0xff]  ;;  %v14435_v23 = vld [vmem:[#allocation11_spill] sm:$0xff] }
 0x53d   : > { %v7750_v9 = vadd.f32 %v7749_v25, %v7748_v50 }
 0x53f   : > { %v7752_v37 = vadd.f32 %v7751_v32, %v7750_v9 }
 0x541   : > { %v7754_v36 = vadd.f32 %v7753_v38, %v7752_v37 }
 0x543   : > { %v7756_v26 = vadd.f32 %v7755_v61, %v7754_v36 }
 0x545   : > { %v7758_v39 = vadd.f32 %v7757_v0, %v7756_v26 }
 0x547   : > { %v7760_v13 = vadd.f32 %v7759_v30, %v7758_v39 }
 0x549   : > { %v7762_v27 = vadd.f32 %v7761_v20, %v7760_v13 }
 0x54b   : > { %v7764_v33 = vadd.f32 %v7763_v46, %v7762_v27 }
 0x54d   : > { %v7766_v31 = vadd.f32 %v7765_v47, %v7764_v33  ;;  %v14431_v33 = vld [vmem:[#allocation3_spill] sm:$0xff]  ;;  %v14433_v47 = vld [vmem:[#allocation9_spill] sm:$0xff] }
 0x54f   : > { %v7768_v34 = vadd.f32 %v7767_v41, %v7766_v31  ;;  %v14434_v31 = vld [vmem:[#allocation10_spill] sm:$0xff] }
 0x551   : > { %v7770_v50 = vadd.f32 %v7769_v49, %v7768_v34  ;;  %v14436_v34 = vld [vmem:[#allocation12_spill] sm:$0xff] }
 0x553   : > { %v7772_v25 = vadd.f32 %v7771_v11, %v7770_v50  ;;  %v14437_v50 = vld [vmem:[#allocation13_spill] sm:$0xff] }
 0x555   : > { %v7773_v9 = vrot.slane %v7772_v25, 4 }
 0x557   : > { %v7774_v40 = vadd.f32 %v7773_v9, %v7772_v25  ;;  %v14438_v25 = vld [vmem:[#allocation14_spill] sm:$0xff] }
 0x559   : > { %v7775_v32 = vrot.slane %v7774_v40, 2 }
 0x55b   : > { %v7776_v37 = vadd.f32 %v7775_v32, %v7774_v40  ;;  %v14439_v40 = vld [vmem:[#allocation15_spill] sm:$0xff] }
 0x55d   : > { %v7777_v56 = vrot.slane %v7776_v37, 1 }
 0x55f   : > { %v7778_v38 = vadd.f32 %v7777_v56, %v7776_v37  ;;  %v14440_v37 = vld [vmem:[#allocation16_spill] sm:$0xff] }
 0x561   : > { %v7779_v36 = vmul.f32 0.00390625, %v7778_v38  ;;  %v14441_v38 = vld [vmem:[#allocation17_spill] sm:$0xff] }
 0x563   : > { %v7780_v58 = vadd.f32 1e-05, %v7779_v36 }
 0x565   : > { %10060 = vrsqrt.f32 %v7780_v58  ;;  %v14442_v58 = vld [vmem:[#allocation18_spill] sm:$0xff] }
 0x572   : > { %v10061_v61 = vpop.eup %10060 }
 0x573   : > { %v7782_v26 = vmul.f32 %v10061_v61, %v13753_v59  ;;  %v7783_v15 = vmul.f32 %v10061_v61, %v13756_v16  ;;  %v7784_v0 = vmul.f32 %v10061_v61, %v13759_v18  ;;  %v7785_v39 = vmul.f32 %v10061_v61, %v13762_v57 }
 0x574   : > { %v7786_v21 = vmul.f32 %v10061_v61, %v13769_v62  ;;  %v7787_v30 = vmul.f32 %v10061_v61, %v13774_v53  ;;  %v7788_v13 = vmul.f32 %v10061_v61, %v13781_v35  ;;  %v7789_v60 = vmul.f32 %v10061_v61, %v13787_v8 }
 0x575   : > { %v7790_v20 = vmul.f32 %v10061_v61, %v13793_v63  ;;  %v7791_v27 = vmul.f32 %v10061_v61, %v13799_v48  ;;  %v7792_v59 = vmul.f32 %v10061_v61, %v13693_v54  ;;  %v7793_v16 = vmul.f32 %v10061_v61, %v13696_v22 }
 0x576   : > { %v7794_v18 = vmul.f32 %v10061_v61, %v13699_v29  ;;  %v7795_v57 = vmul.f32 %v10061_v61, %v13702_v12  ;;  %v7796_v62 = vmul.f32 %v10061_v61, %v13705_v6  ;;  %v7797_v53 = vmul.f32 %v10061_v61, %v13708_v55 }
 0x577   : > { %v7798_v35 = vmul.f32 %v10061_v61, %v13711_v28  ;;  %v7799_v8 = vmul.f32 %v10061_v61, %v13714_v52  ;;  %v7800_v63 = vmul.f32 %v10061_v61, %v13717_v24  ;;  %v7801_v48 = vmul.f32 %v10061_v61, %v13720_v5 }
 0x578   : > { %v7802_v54 = vmul.f32 %v10061_v61, %v13723_v4  ;;  %v7803_v22 = vmul.f32 %v10061_v61, %v13726_v51  ;;  %v7804_v29 = vmul.f32 %v10061_v61, %v13729_v17  ;;  %v7805_v12 = vmul.f32 %v10061_v61, %v13732_v10  ;;  %v14427_v17 = vld [vmem:[#allocation7_spill] sm:$0xff] }
 0x579   : > { %v7806_v6 = vmul.f32 %v10061_v61, %v13735_v14  ;;  %v7807_v55 = vmul.f32 %v10061_v61, %v13738_v1  ;;  %v7808_v28 = vmul.f32 %v10061_v61, %v13740_v43  ;;  %v7809_v52 = vmul.f32 %v10061_v61, %v13742_v7  ;;  %v14428_v14 = vld [vmem:[#allocation8_spill] sm:$0xff]  ;;  %v14429_v43 = vld [vmem:[#allocation5_spill] sm:$0xff] }
 0x57a   : > { %v7810_v24 = vmul.f32 %v10061_v61, %v13744_v42  ;;  %v7811_v5 = vmul.f32 %v10061_v61, %v13746_v19  ;;  %v7812_v4 = vmul.f32 %v10061_v61, %v13748_v45  ;;  %v7813_v51 = vmul.f32 %v10061_v61, %v13750_v3 }
 0x57b   : > { %v7814_v10 = vadd.f32 %v7782_v26, %v14427_v17  ;;  %v7815_v1 = vadd.f32 %v7783_v15, %v14428_v14  ;;  %v7816_v7 = vadd.f32 %v7784_v0, %v14429_v43  ;;  %v7817_v46 = vadd.f32 %v7785_v39, %v14430_v44  ;;  %v14443_v26 = vld [vmem:[#allocation19_spill] sm:$0xff]  ;;  %v14444_v0 = vld [vmem:[#allocation20_spill] sm:$0xff] }
 0x57c   : > { %v7818_v42 = vadd.f32 %v7786_v21, %v14431_v33  ;;  %v7819_v19 = vadd.f32 %v7787_v30, %v14432_v2  ;;  %v7820_v45 = vadd.f32 %v7788_v13, %v14433_v47  ;;  %v7821_v3 = vadd.f32 %v7789_v60, %v14434_v31  ;;  %v14445_v21 = vld [vmem:[#allocation21_spill] sm:$0xff]  ;;  %v14446_v13 = vld [vmem:[#allocation22_spill] sm:$0xff]  ;;  %v14456_v17 = vld [vmem:[#allocation35_spill] sm:$0xff] }
 0x57d   : > { %v7822_v41 = vadd.f32 %v7790_v20, %v14435_v23  ;;  %v7823_v49 = vadd.f32 %v7791_v27, %v14436_v34  ;;  %v7824_v11 = vadd.f32 %v7792_v59, %v14437_v50  ;;  %v7825_v9 = vadd.f32 %v7793_v16, %v14438_v25  ;;  %7846 = vst.msk [vmem:[%s13911_s5] sm:$0xff] %vm204_vm1, %v7814_v10  ;;  %v14447_v20 = vld [vmem:[#allocation23_spill] sm:$0xff]  ;;  %v14448_v59 = vld [vmem:[#allocation24_spill] sm:$0xff] }
 0x57e   : > { %7847 = vst.msk [vmem:[%s13911_s5 + $0x8] sm:$0xff] %vm204_vm1, %v7815_v1  ;;  %7848 = vst.msk [vmem:[%s13911_s5 + $0x10] sm:$0xff] %vm204_vm1, %v7816_v7  ;;  %v7826_v32 = vadd.f32 %v7794_v18, %v14439_v40  ;;  %v7827_v56 = vadd.f32 %v7795_v57, %v14440_v37  ;;  %v7828_v36 = vadd.f32 %v7796_v62, %v14441_v38  ;;  %v14449_v18 = vld [vmem:[#allocation25_spill] sm:$0xff]  ;;  %v14450_v62 = vld [vmem:[#allocation26_spill] sm:$0xff] }
 0x57f   : > { %7849 = vst.msk [vmem:[%s13911_s5 + $0x18] sm:$0xff] %vm204_vm1, %v7817_v46  ;;  %v7829_v61 = vadd.f32 %v7797_v53, %v14442_v58  ;;  %7850 = vst.msk [vmem:[%s13911_s5 + $0x20] sm:$0xff] %vm204_vm1, %v7818_v42  ;;  %v7830_v15 = vadd.f32 %v7798_v35, %v14443_v26  ;;  %v7831_v39 = vadd.f32 %v7799_v8, %v14444_v0  ;;  %v14451_v35 = vld [vmem:[#allocation27_spill] sm:$0xff]  ;;  %v14457_v10 = vld [vmem:[#allocation36_spill] sm:$0xff] }
 0x580   : > { %7851 = vst.msk [vmem:[%s13911_s5 + $0x28] sm:$0xff] %vm204_vm1, %v7819_v19  ;;  %7852 = vst.msk [vmem:[%s13911_s5 + $0x30] sm:$0xff] %vm204_vm1, %v7820_v45  ;;  %v7832_v30 = vadd.f32 %v7800_v63, %v14445_v21  ;;  %v7833_v60 = vadd.f32 %v7801_v48, %v14446_v13  ;;  %v7834_v27 = vadd.f32 %v7802_v54, %v14447_v20  ;;  %v14452_v63 = vld [vmem:[#allocation28_spill] sm:$0xff]  ;;  %v14453_v54 = vld [vmem:[#allocation29_spill] sm:$0xff] }
 0x581   : > { %7853 = vst.msk [vmem:[%s13911_s5 + $0x38] sm:$0xff] %vm204_vm1, %v7821_v3  ;;  %7854 = vst.msk [vmem:[%s13911_s5 + $0x40] sm:$0xff] %vm204_vm1, %v7822_v41  ;;  %v7835_v16 = vadd.f32 %v7803_v22, %v14448_v59  ;;  %v7836_v57 = vadd.f32 %v7804_v29, %v14449_v18  ;;  %v7837_v53 = vadd.f32 %v7805_v12, %v14450_v62  ;;  %v14454_v29 = vld [vmem:[#allocation30_spill] sm:$0xff] }
 0x582   : > { %7855 = vst.msk [vmem:[%s13911_s5 + $0x48] sm:$0xff] %vm204_vm1, %v7823_v49  ;;  %7856 = vst.msk [vmem:[%s13911_s5 + $0x50] sm:$0xff] %vm204_vm1, %v7824_v11  ;;  %v7838_v8 = vadd.f32 %v7806_v6, %v14451_v35  ;;  %v7839_v48 = vadd.f32 %v7807_v55, %v14452_v63  ;;  %v7840_v22 = vadd.f32 %v7808_v28, %v14453_v54  ;;  %v14455_v6 = vld [vmem:[#allocation34_spill] sm:$0xff] }
 0x583   : > { %7857 = vst.msk [vmem:[%s13911_s5 + $0x58] sm:$0xff] %vm204_vm1, %v7825_v9  ;;  %7858 = vst.msk [vmem:[%s13911_s5 + $0x60] sm:$0xff] %vm204_vm1, %v7826_v32  ;;  %v7841_v12 = vadd.f32 %v7809_v52, %v14454_v29  ;;  %v7842_v55 = vadd.f32 %v7810_v24, %v14455_v6  ;;  %v7843_v28 = vadd.f32 %v7811_v5, %v14456_v17  ;;  %v14458_v52 = vld [vmem:[#allocation38_spill] sm:$0xff] }
 0x584   : > { %7859 = vst.msk [vmem:[%s13911_s5 + $0x68] sm:$0xff] %vm204_vm1, %v7827_v56  ;;  %7860 = vst.msk [vmem:[%s13911_s5 + $0x70] sm:$0xff] %vm204_vm1, %v7828_v36  ;;  %v7844_v14 = vadd.f32 %v7812_v4, %v14457_v10  ;;  %v7845_v1 = vadd.f32 %v7813_v51, %v14458_v52 }
 0x585   : > { %7861 = vst.msk [vmem:[%s13911_s5 + $0x78] sm:$0xff] %vm204_vm1, %v7829_v61  ;;  %7862 = vst.msk [vmem:[%s13911_s5 + $0x80] sm:$0xff] %vm204_vm1, %v7830_v15 }
 0x586   : > { %7863 = vst.msk [vmem:[%s13911_s5 + $0x88] sm:$0xff] %vm204_vm1, %v7831_v39  ;;  %7864 = vst.msk [vmem:[%s13911_s5 + $0x90] sm:$0xff] %vm204_vm1, %v7832_v30 }
 0x587   : > { %7865 = vst.msk [vmem:[%s13911_s5 + $0x98] sm:$0xff] %vm204_vm1, %v7833_v60  ;;  %7866 = vst.msk [vmem:[%s13911_s5 + $0xa0] sm:$0xff] %vm204_vm1, %v7834_v27 }
 0x588   : > { %7867 = vst.msk [vmem:[%s13911_s5 + $0xa8] sm:$0xff] %vm204_vm1, %v7835_v16  ;;  %7868 = vst.msk [vmem:[%s13911_s5 + $0xb0] sm:$0xff] %vm204_vm1, %v7836_v57 }
 0x589   : > { %7869 = vst.msk [vmem:[%s13911_s5 + $0xb8] sm:$0xff] %vm204_vm1, %v7837_v53  ;;  %7870 = vst.msk [vmem:[%s13911_s5 + $0xc0] sm:$0xff] %vm204_vm1, %v7838_v8 }
 0x58a   : > { %7871 = vst.msk [vmem:[%s13911_s5 + $0xc8] sm:$0xff] %vm204_vm1, %v7839_v48  ;;  %7872 = vst.msk [vmem:[%s13911_s5 + $0xd0] sm:$0xff] %vm204_vm1, %v7840_v22 }
 0x58b   : > { %7873 = vst.msk [vmem:[%s13911_s5 + $0xd8] sm:$0xff] %vm204_vm1, %v7841_v12  ;;  %7874 = vst.msk [vmem:[%s13911_s5 + $0xe0] sm:$0xff] %vm204_vm1, %v7842_v55 }
 0x58c   : > { %7875 = vst.msk [vmem:[%s13911_s5 + $0xe8] sm:$0xff] %vm204_vm1, %v7843_v28  ;;  %7876 = vst.msk [vmem:[%s13911_s5 + $0xf0] sm:$0xff] %vm204_vm1, %v7844_v14 }
 0x58d   : > { %7877 = vst.msk [vmem:[%s13911_s5 + $0xf8] sm:$0xff] %vm204_vm1, %v7845_v1 }
 0x58e PF: > { %s13_s12 = sadd.s32 1, %s10068_s12  }
 0x58f   : > { %p10_p4 = scmp.ge.s32.totalorder %s13_s12, 4  }
 0x591   :  { %12 = sbr.rel (!%p10_p4) target bundleno = 1 (0x1), region = 87 }

</bundles_post_ra>
